<compile_context>
chip_gen: v7x
topology: tpu7x:2x2x1
jax: 0.10.0
libtpu: 0.0.40
codegen_flags: <defaults>
</compile_context>

<pallas_src>
import math
import functools

import numpy as np
import jax
import jax.numpy as jnp
from jax import lax
from jax.experimental import pallas as pl
from jax.experimental.pallas import tpu as pltpu


def _pos_embed_kernel(nm_ref, coef_ref, out_ref, *, H, W, num_pos_feats, bt,
                      normalize, scale):
    """Single-step kernel over a batch chunk.

    nm_ref  : (bt, H*W)    f32  not_mask, flattened lane-dense (l = h*W + w)
    coef_ref: (C, 3)       f32  columns: [inv_y | inv_x | phase]
    out_ref : (bt, C, H*W) f32  out[b, c, h*W + w] == pos[b, c, h, w]
    """
    F = num_pos_feats
    C = 2 * F
    HW = H * W

    # lane -> (h, w) index rows, built in-kernel (no HBM constants).
    lane = lax.broadcasted_iota(jnp.int32, (1, HW), 1).astype(jnp.float32)
    hof = jnp.floor((lane + 0.5) * (1.0 / W))       # (1, HW)  == l // W (exact)
    wof = lane - hof * W                            # (1, HW)  == l %  W (exact)

    v = nm_ref[...]                                 # (bt, HW), values in {0, 1}
    zpad = jnp.zeros_like(v)

    def shift_up(t, s):    # result[:, l] = t[:, l - s]  (0 where l < s)
        return jnp.concatenate([zpad, t], axis=1)[:, HW - s: 2 * HW - s]

    def shift_down(t, s):  # result[:, l] = t[:, l + s]  (0 where l + s >= HW)
        return jnp.concatenate([t, zpad], axis=1)[:, s: HW + s]

    # ---- cumulative sums as segmented log-step scans (all lane-dense) ------
    x_cum = v                                       # cumsum over w within a row
    s = 1
    while s < W:
        x_cum = x_cum + jnp.where(wof >= float(s), shift_up(x_cum, s), 0.0)
        s *= 2
    y_cum = v                                       # cumsum over h at fixed w
    s = 1
    while s < H:
        y_cum = y_cum + shift_up(y_cum, s * W)      # zero-fill guards h' < 0
        s *= 2

    if normalize:
        eps = 1e-06
        # Per-segment totals: the cumsums are monotone non-decreasing, so a
        # right-to-left max-scan broadcasts the last (== max == total) value.
        x_tot = x_cum
        s = 1
        while s < W:
            x_tot = jnp.maximum(
                x_tot,
                jnp.where(wof < float(W - s), shift_down(x_tot, s), 0.0))
            s *= 2
        y_tot = y_cum
        s = 1
        while s < H:
            y_tot = jnp.maximum(y_tot, shift_down(y_tot, s * W))
            s *= 2
        # Normalize BEFORE the channel expansion (small (bt, HW) work).
        y_emb = y_cum * (scale / (y_tot + eps))
        x_emb = x_cum * (scale / (x_tot + eps))
    else:
        y_emb = y_cum
        x_emb = x_cum

    inv_y = coef_ref[:, 0:1]                        # (C, 1): 1/dim_t, 0 on x half
    inv_x = coef_ref[:, 1:2]                        # (C, 1): 0 on y half, 1/dim_t
    phase = coef_ref[:, 2:3]                        # (C, 1): 0 (even) / pi/2 (odd)

    # ---- channel expansion (broadcast FMA) + one sin per output element ----
    for b in range(bt):
        pre = (y_emb[b:b + 1, :] * inv_y
               + x_emb[b:b + 1, :] * inv_x
               + phase)                             # (C, HW)
        out_ref[b] = jnp.sin(pre)


def position_embedding_sine(mask, *, num_pos_feats=32, temperature=10000,
                            normalize=False, scale=None):
    """mask: (B, H, W) bool. Returns pos: (B, 2*num_pos_feats, H, W) f32 (NCHW)."""
    if scale is not None and normalize is False:
        raise ValueError('normalize should be True if scale is passed')
    if scale is None:
        scale = 2 * math.pi

    B, H, W = mask.shape
    F = num_pos_feats
    C = 2 * F
    HW = H * W  # NOTE: multiple of 128 here -> fully lane-dense blocks/stores.

    # Flattened, lane-dense not-mask (free reshape; lane index l = h*W + w).
    not_mask = (~mask).astype(jnp.float32).reshape(B, HW)

    # Tiny trace-time coefficient table (768 B): channel c < F uses y_embed,
    # c >= F uses x_embed; phase turns sin into cos on odd feature indices.
    i = np.arange(F, dtype=np.float32)
    dim_t = np.float32(temperature) ** (2.0 * np.floor(i / 2.0) / np.float32(F))
    inv_dim_t = (np.float32(1.0) / dim_t).astype(np.float32)        # (F,)
    c = np.arange(C)
    feat = np.where(c < F, c, c - F)
    inv = inv_dim_t[feat]
    coef = np.stack([np.where(c < F, inv, 0.0),
                     np.where(c >= F, inv, 0.0),
                     np.where(feat % 2 == 0, 0.0, np.pi / 2.0)],
                    axis=1).astype(np.float32)                      # (C, 3)

    bt = B                         # whole (small) batch in one grid step
    nb = pl.cdiv(B, bt)

    kernel = functools.partial(_pos_embed_kernel, H=H, W=W, num_pos_feats=F,
                               bt=bt, normalize=normalize, scale=float(scale))

    n_steps = (max(H - 1, 1).bit_length() + max(W - 1, 1).bit_length())
    n_steps *= 2 if normalize else 1
    cost = pl.CostEstimate(
        flops=B * HW * (4 * n_steps + 8) + B * C * HW * 5,
        transcendentals=B * C * HW,
        bytes_accessed=4 * (B * HW + B * C * HW + 3 * C))

    out = pl.pallas_call(
        kernel,
        out_shape=jax.ShapeDtypeStruct((B, C, HW), jnp.float32),
        grid=(nb,),
        in_specs=[
            pl.BlockSpec((bt, HW), lambda i: (i, 0)),       # not_mask (flat)
            pl.BlockSpec((C, 3), lambda i: (0, 0)),         # [inv_y|inv_x|phase]
        ],
        out_specs=pl.BlockSpec((bt, C, HW), lambda i: (i, 0, 0)),
        compiler_params=pltpu.CompilerParams(
            dimension_semantics=("parallel",)),
        cost_estimate=cost,
    )(not_mask, coef)

    # (B, C, H*W) -> (B, C, H, W) is a FREE reshape; no transpose needed.
    return out.reshape(B, C, H, W)


def _reference(mask, *, num_pos_feats, temperature, normalize, scale):
    """Pure-JAX transcription of the PyTorch forward (for validation)."""
    if scale is None:
        scale = 2 * math.pi
    not_mask = (~mask).astype(jnp.float32)
    y_embed = jnp.cumsum(not_mask, axis=1)
    x_embed = jnp.cumsum(not_mask, axis=2)
    if normalize:
        eps = 1e-06
        y_embed = y_embed / (y_embed[:, -1:, :] + eps) * scale
        x_embed = x_embed / (x_embed[:, :, -1:] + eps) * scale
    dim_t = jnp.arange(num_pos_feats, dtype=jnp.float32)
    dim_t = temperature ** (2 * (dim_t // 2) / num_pos_feats)
    pos_x = x_embed[:, :, :, None] / dim_t
    pos_y = y_embed[:, :, :, None] / dim_t
    pos_x = jnp.stack((jnp.sin(pos_x[..., 0::2]), jnp.cos(pos_x[..., 1::2])),
                      axis=4).reshape(pos_x.shape[:3] + (-1,))
    pos_y = jnp.stack((jnp.sin(pos_y[..., 0::2]), jnp.cos(pos_y[..., 1::2])),
                      axis=4).reshape(pos_y.shape[:3] + (-1,))
    pos = jnp.transpose(jnp.concatenate((pos_y, pos_x), axis=3), (0, 3, 1, 2))
    return pos


if __name__ == "__main__":
    key = jax.random.PRNGKey(0)
    B, H, W = 2, 16, 16
    num_pos_feats = 32  # -> C = 64 output channels

    mask = jax.random.bernoulli(key, p=0.3, shape=(B, H, W))  # (B, H, W) bool

    # default config (normalize=False)
    pos = position_embedding_sine(mask, num_pos_feats=num_pos_feats)
    pos = jax.block_until_ready(pos)
    ref = _reference(mask, num_pos_feats=num_pos_feats, temperature=10000,
                     normalize=False, scale=None)
    assert pos.shape == (B, 2 * num_pos_feats, H, W)
    assert jnp.allclose(pos, ref, atol=5e-5, rtol=1e-5), \
        float(jnp.max(jnp.abs(pos - ref)))

    # normalized config (as commonly used in DETR-style models)
    pos_n = position_embedding_sine(mask, num_pos_feats=num_pos_feats,
                                    normalize=True, scale=2 * math.pi)
    pos_n = jax.block_until_ready(pos_n)
    ref_n = _reference(mask, num_pos_feats=num_pos_feats, temperature=10000,
                       normalize=True, scale=2 * math.pi)
    assert jnp.allclose(pos_n, ref_n, atol=5e-5, rtol=1e-5), \
        float(jnp.max(jnp.abs(pos_n - ref_n)))

    print("KERNEL_OK")
</pallas_src>

<mosaic_0001>
module attributes {stable_mosaic.version = 11 : i64} {
  func.func @_pos_embed_kernel(%arg0: i32, %arg1: memref<2x256xf32, #tpu.memory_space<vmem>>, %arg2: memref<64x3xf32, #tpu.memory_space<vmem>>, %arg3: memref<2x64x256xf32, #tpu.memory_space<vmem>>) attributes {dimension_semantics = [#tpu.dimension_semantics<parallel>], iteration_bounds = array<i64: 1>, scalar_prefetch = 0 : i64, scratch_operands = 0 : i64, tpu.core_type = #tpu.core_type<tc>, window_params = [{transform_indices = @transform_0, window_bounds = array<i64: 2, 256>}, {pipeline_mode = #tpu.pipeline_mode<synchronous>, transform_indices = @transform_1, window_bounds = array<i64: 64, 3>}, {transform_indices = @transform_2, window_bounds = array<i64: 2, 64, 256>}]} {
    %0 = tpu.iota {dimensions = array<i32: 1>} : vector<1x256xi32>
    %1 = arith.sitofp %0 : vector<1x256xi32> to vector<1x256xf32>
    %cst = arith.constant 5.000000e-01 : f32
    %2 = vector.broadcast %cst : f32 to vector<1x256xf32>
    %3 = arith.addf %1, %2 : vector<1x256xf32>
    %cst_0 = arith.constant 6.250000e-02 : f32
    %4 = vector.broadcast %cst_0 : f32 to vector<1x256xf32>
    %5 = arith.mulf %3, %4 : vector<1x256xf32>
    %6 = math.floor %5 : vector<1x256xf32>
    %cst_1 = arith.constant 1.600000e+01 : f32
    %7 = vector.broadcast %cst_1 : f32 to vector<1x256xf32>
    %8 = arith.mulf %6, %7 : vector<1x256xf32>
    %9 = arith.subf %1, %8 : vector<1x256xf32>
    %c0 = arith.constant 0 : index
    %c0_2 = arith.constant 0 : index
    %10 = vector.load %arg1[%c0, %c0_2] : memref<2x256xf32, #tpu.memory_space<vmem>>, vector<2x256xf32>
    %cst_3 = arith.constant 0.000000e+00 : f32
    %11 = vector.broadcast %cst_3 : f32 to vector<2x256xf32>
    %cst_4 = arith.constant 1.000000e+00 : f32
    %12 = vector.broadcast %cst_4 : f32 to vector<1x256xf32>
    %13 = arith.cmpf oge, %9, %12 : vector<1x256xf32>
    %14 = tpu.concatenate %11, %10 in 1 : vector<2x256xf32>, vector<2x256xf32> -> vector<2x512xf32>
    %15 = vector.extract_strided_slice %14 {offsets = [0, 255], sizes = [2, 256], strides = [1, 1]} : vector<2x512xf32> to vector<2x256xf32>
    %cst_5 = arith.constant 0.000000e+00 : f32
    %16 = vector.shape_cast %13 : vector<1x256xi1> to vector<1x256xi1>
    %17 = vector.broadcast %16 : vector<1x256xi1> to vector<2x256xi1>
    %18 = vector.broadcast %cst_5 : f32 to vector<2x256xf32>
    %19 = arith.select %17, %15, %18 : vector<2x256xi1>, vector<2x256xf32>
    %20 = arith.addf %10, %19 : vector<2x256xf32>
    %cst_6 = arith.constant 2.000000e+00 : f32
    %21 = vector.broadcast %cst_6 : f32 to vector<1x256xf32>
    %22 = arith.cmpf oge, %9, %21 : vector<1x256xf32>
    %23 = tpu.concatenate %11, %20 in 1 : vector<2x256xf32>, vector<2x256xf32> -> vector<2x512xf32>
    %24 = vector.extract_strided_slice %23 {offsets = [0, 254], sizes = [2, 256], strides = [1, 1]} : vector<2x512xf32> to vector<2x256xf32>
    %cst_7 = arith.constant 0.000000e+00 : f32
    %25 = vector.shape_cast %22 : vector<1x256xi1> to vector<1x256xi1>
    %26 = vector.broadcast %25 : vector<1x256xi1> to vector<2x256xi1>
    %27 = vector.broadcast %cst_7 : f32 to vector<2x256xf32>
    %28 = arith.select %26, %24, %27 : vector<2x256xi1>, vector<2x256xf32>
    %29 = arith.addf %20, %28 : vector<2x256xf32>
    %cst_8 = arith.constant 4.000000e+00 : f32
    %30 = vector.broadcast %cst_8 : f32 to vector<1x256xf32>
    %31 = arith.cmpf oge, %9, %30 : vector<1x256xf32>
    %32 = tpu.concatenate %11, %29 in 1 : vector<2x256xf32>, vector<2x256xf32> -> vector<2x512xf32>
    %33 = vector.extract_strided_slice %32 {offsets = [0, 252], sizes = [2, 256], strides = [1, 1]} : vector<2x512xf32> to vector<2x256xf32>
    %cst_9 = arith.constant 0.000000e+00 : f32
    %34 = vector.shape_cast %31 : vector<1x256xi1> to vector<1x256xi1>
    %35 = vector.broadcast %34 : vector<1x256xi1> to vector<2x256xi1>
    %36 = vector.broadcast %cst_9 : f32 to vector<2x256xf32>
    %37 = arith.select %35, %33, %36 : vector<2x256xi1>, vector<2x256xf32>
    %38 = arith.addf %29, %37 : vector<2x256xf32>
    %cst_10 = arith.constant 8.000000e+00 : f32
    %39 = vector.broadcast %cst_10 : f32 to vector<1x256xf32>
    %40 = arith.cmpf oge, %9, %39 : vector<1x256xf32>
    %41 = tpu.concatenate %11, %38 in 1 : vector<2x256xf32>, vector<2x256xf32> -> vector<2x512xf32>
    %42 = vector.extract_strided_slice %41 {offsets = [0, 248], sizes = [2, 256], strides = [1, 1]} : vector<2x512xf32> to vector<2x256xf32>
    %cst_11 = arith.constant 0.000000e+00 : f32
    %43 = vector.shape_cast %40 : vector<1x256xi1> to vector<1x256xi1>
    %44 = vector.broadcast %43 : vector<1x256xi1> to vector<2x256xi1>
    %45 = vector.broadcast %cst_11 : f32 to vector<2x256xf32>
    %46 = arith.select %44, %42, %45 : vector<2x256xi1>, vector<2x256xf32>
    %47 = arith.addf %38, %46 : vector<2x256xf32>
    %48 = tpu.concatenate %11, %10 in 1 : vector<2x256xf32>, vector<2x256xf32> -> vector<2x512xf32>
    %49 = vector.extract_strided_slice %48 {offsets = [0, 240], sizes = [2, 256], strides = [1, 1]} : vector<2x512xf32> to vector<2x256xf32>
    %50 = arith.addf %10, %49 : vector<2x256xf32>
    %51 = tpu.concatenate %11, %50 in 1 : vector<2x256xf32>, vector<2x256xf32> -> vector<2x512xf32>
    %52 = vector.extract_strided_slice %51 {offsets = [0, 224], sizes = [2, 256], strides = [1, 1]} : vector<2x512xf32> to vector<2x256xf32>
    %53 = arith.addf %50, %52 : vector<2x256xf32>
    %54 = tpu.concatenate %11, %53 in 1 : vector<2x256xf32>, vector<2x256xf32> -> vector<2x512xf32>
    %55 = vector.extract_strided_slice %54 {offsets = [0, 192], sizes = [2, 256], strides = [1, 1]} : vector<2x512xf32> to vector<2x256xf32>
    %56 = arith.addf %53, %55 : vector<2x256xf32>
    %57 = tpu.concatenate %11, %56 in 1 : vector<2x256xf32>, vector<2x256xf32> -> vector<2x512xf32>
    %58 = vector.extract_strided_slice %57 {offsets = [0, 128], sizes = [2, 256], strides = [1, 1]} : vector<2x512xf32> to vector<2x256xf32>
    %59 = arith.addf %56, %58 : vector<2x256xf32>
    %c0_12 = arith.constant 0 : index
    %c0_13 = arith.constant 0 : index
    %60 = vector.load %arg2[%c0_12, %c0_13] : memref<64x3xf32, #tpu.memory_space<vmem>>, vector<64x1xf32>
    %c0_14 = arith.constant 0 : index
    %c1 = arith.constant 1 : index
    %61 = vector.load %arg2[%c0_14, %c1] : memref<64x3xf32, #tpu.memory_space<vmem>>, vector<64x1xf32>
    %c0_15 = arith.constant 0 : index
    %c2 = arith.constant 2 : index
    %62 = vector.load %arg2[%c0_15, %c2] : memref<64x3xf32, #tpu.memory_space<vmem>>, vector<64x1xf32>
    %63 = vector.extract_strided_slice %59 {offsets = [0, 0], sizes = [1, 256], strides = [1, 1]} : vector<2x256xf32> to vector<1x256xf32>
    %64 = vector.broadcast %63 : vector<1x256xf32> to vector<64x256xf32>
    %65 = vector.broadcast %60 : vector<64x1xf32> to vector<64x256xf32>
    %66 = arith.mulf %64, %65 : vector<64x256xf32>
    %67 = vector.extract_strided_slice %47 {offsets = [0, 0], sizes = [1, 256], strides = [1, 1]} : vector<2x256xf32> to vector<1x256xf32>
    %68 = vector.broadcast %67 : vector<1x256xf32> to vector<64x256xf32>
    %69 = vector.broadcast %61 : vector<64x1xf32> to vector<64x256xf32>
    %70 = arith.mulf %68, %69 : vector<64x256xf32>
    %71 = arith.addf %66, %70 : vector<64x256xf32>
    %72 = vector.broadcast %62 : vector<64x1xf32> to vector<64x256xf32>
    %73 = arith.addf %71, %72 : vector<64x256xf32>
    %74 = math.sin %73 : vector<64x256xf32>
    %c0_16 = arith.constant 0 : index
    %c0_17 = arith.constant 0 : index
    %c0_18 = arith.constant 0 : index
    %75 = vector.load %arg3[%c0_16, %c0_17, %c0_18] : memref<2x64x256xf32, #tpu.memory_space<vmem>>, vector<1x64x256xf32>
    %76 = vector.shape_cast %75 : vector<1x64x256xf32> to vector<64x256xf32>
    %77 = vector.shape_cast %74 : vector<64x256xf32> to vector<1x64x256xf32>
    tpu.vector_store %arg3[%c0_16, %c0_17, %c0_18], %77 {strides = array<i32>} : memref<2x64x256xf32, #tpu.memory_space<vmem>>, vector<1x64x256xf32>,
    %78 = vector.extract_strided_slice %59 {offsets = [1, 0], sizes = [1, 256], strides = [1, 1]} : vector<2x256xf32> to vector<1x256xf32>
    %79 = vector.broadcast %78 : vector<1x256xf32> to vector<64x256xf32>
    %80 = vector.broadcast %60 : vector<64x1xf32> to vector<64x256xf32>
    %81 = arith.mulf %79, %80 : vector<64x256xf32>
    %82 = vector.extract_strided_slice %47 {offsets = [1, 0], sizes = [1, 256], strides = [1, 1]} : vector<2x256xf32> to vector<1x256xf32>
    %83 = vector.broadcast %82 : vector<1x256xf32> to vector<64x256xf32>
    %84 = vector.broadcast %61 : vector<64x1xf32> to vector<64x256xf32>
    %85 = arith.mulf %83, %84 : vector<64x256xf32>
    %86 = arith.addf %81, %85 : vector<64x256xf32>
    %87 = vector.broadcast %62 : vector<64x1xf32> to vector<64x256xf32>
    %88 = arith.addf %86, %87 : vector<64x256xf32>
    %89 = math.sin %88 : vector<64x256xf32>
    %c1_19 = arith.constant 1 : index
    %c0_20 = arith.constant 0 : index
    %c0_21 = arith.constant 0 : index
    %90 = vector.load %arg3[%c1_19, %c0_20, %c0_21] : memref<2x64x256xf32, #tpu.memory_space<vmem>>, vector<1x64x256xf32>
    %91 = vector.shape_cast %90 : vector<1x64x256xf32> to vector<64x256xf32>
    %92 = vector.shape_cast %89 : vector<64x256xf32> to vector<1x64x256xf32>
    tpu.vector_store %arg3[%c1_19, %c0_20, %c0_21], %92 {strides = array<i32>} : memref<2x64x256xf32, #tpu.memory_space<vmem>>, vector<1x64x256xf32>,
    return
  }
  func.func @transform_0(%arg0: i32) -> (i32, i32) {
    %c0_i32 = arith.constant 0 : i32
    %c0_i32_0 = arith.constant 0 : i32
    return %arg0, %c0_i32 : i32, i32
  }
  func.func @transform_1(%arg0: i32) -> (i32, i32) {
    %c0_i32 = arith.constant 0 : i32
    %c0_i32_0 = arith.constant 0 : i32
    %c0_i32_1 = arith.constant 0 : i32
    return %c0_i32, %c0_i32_0 : i32, i32
  }
  func.func @transform_2(%arg0: i32) -> (i32, i32, i32) {
    %c0_i32 = arith.constant 0 : i32
    %c0_i32_0 = arith.constant 0 : i32
    %c0_i32_1 = arith.constant 0 : i32
    return %arg0, %c0_i32, %c0_i32_0 : i32, i32, i32
  }
}

</mosaic_0001>

<bundles_post_ra>
// kernel: tpu_custom_call.1
= control target key start
LH: loop header
LB: loop body
LE: loop exit
PB: predicated region body
PF: predicated region fallthrough
CT: control target
= control target key end

     0   :  { %v12_v0 = vlaneseq  ;;  %v4419_v1 = vmov 0.0   ;;  %s4420_s9 = smov 1   ;;  %v4421_v2 = vmov 1983009808   ;;  %s7504_s0 = inlined_call_operand.vmem [shape: f32[2,256], index: 0, kind: input, shape index: {}]   ;;  %s7505_s1 = inlined_call_operand.vmem [shape: f32[64,3], index: 1, kind: input, shape index: {}]   ;;  %s7506_s2 = inlined_call_operand.hbm [shape: f32[2,64,256], index: 2, kind: output, shape index: {}]  }
   0x1   :  { %44 = vrot.lane.b32.xlu0 %v4419_v1, %s4420_s9  ;;  %v32_v3 = vunpack.c.l.s4 %v4421_v2 }
   0x2   :  { %7 = vsyncpa [#allocation3], 0  ;;  %v4455_v4 = vshrl.u32 %v12_v0, 7  ;;  %v27_v6 = vld [vmem:[%s7504_s0] sm:$0xf]  ;;  %s4422_s12 = smov 2  }
   0x3   :  { %v33_v5 = vunpack.c.0.s8 %v32_v3  ;;  %s4423_s0 = smov 16   ;;  %v13_v14 = vand.u32 127, %v12_v0  ;;  %vm50_vm0 = vcmask 7168   ;;  %vm208_vm3 = vcmask 130048   ;;  %s4425_s13 = smov 4   ;;  %v294_v63 = vld [vmem:[%s7505_s1] sm:$0xff] }
   0x4   :  { %v4424_v47 = vmov 0   ;;  %s4426_s14 = smov 32   ;;  %vm90_vm4 = vcmask 15360   ;;  %v296_v0 = vld [vmem:[%s7505_s1 + $0x10] sm:$0xff]  ;;  %s4427_s19 = smov 8   ;;  %v297_v2 = vld [vmem:[%s7505_s1 + $0x18] sm:$0xff] }
   0x5   :  { %v4461_v7 = vsub.s32 %v33_v5, %v4455_v4  ;;  %v14_v15 = vadd.s32 128, %v13_v14  ;;  %v15_v16 = vcvt.s32.f32 %v13_v14  ;;  %4261 = vset.pattern.permute.xlu1 %v4424_v47  ;;  %4262 = vset.pattern.permute.xlu0 %v4424_v47  ;;  %v295_v3 = vld [vmem:[%s7505_s1 + $0x8] sm:$0xff]  ;;  %vm240_vm7 = vcmask 261120   ;;  %s4437_s4 = smov [#allocation2]  }
   0x6   :  { %v299_v5 = vld [vmem:[%s7505_s1 + $0x28] sm:$0xff]  ;;  %vm130_vm8 = vcmask 31744   ;;  %vm272_vm11 = vcmask 523264   ;;  %vm170_vm12 = vcmask 64512   ;;  %s3974_s5 = sshll.u32 %s4437_s4, 4  ;;  %s3975_s5 = int_to_ptr.vmem [resolvable:$true] %s3974_s5 }
   0x7   :  { %v37_v8 = vrot.slane %v27_v6, %v4461_v7  ;;  %v16_v17 = vcvt.s32.f32 %v14_v15  ;;  %v17_v18 = vadd.f32 0.5, %v15_v16  ;;  %s4395_s6 = scalar_lea.vmem %s3975_s5, 4096  ;;  %p4400_p1 = scmp.lt.s32.totalorder %s3975_s5, %s3975_s5 }
   0x8   :  { %p4396_p0 = scmp.ne.s32.totalorder %s3975_s5, %s4395_s6  ;;  %p4401_p2 = scmp.lt.s32.totalorder %s4395_s6, %s4395_s6 }
   0x9   :  { %46 = vrot.lane.b32.xlu0 %v37_v8, %s4420_s9  ;;  %v38_v9 = vcombine.high %v37_v8, %v37_v8  ;;  %v189_v10 = vcombine.low %v4419_v1, %v37_v8  ;;  %v18_v19 = vadd.f32 0.5, %v16_v17  ;;  %v19_v20 = vmul.f32 0.0625, %v17_v18  ;;  %v301_v8 = vld [vmem:[%s7505_s1 + $0x38] sm:$0xff] }
   0xa   :  { %v4429_v18 = vmov 2   ;;  %p4402_p3 = por %p4401_p2, %p4400_p1 }
   0xb   :  { %48 = vrot.lane.b32.xlu1 %v38_v9, %s4420_s9  ;;  %v203_v11 = vrot.slane %v38_v9, %v4461_v7  ;;  %v196_v12 = vrot.slane %v189_v10, %v4461_v7  ;;  %v20_v21 = vmul.f32 0.0625, %v18_v19  ;;  %v21_v22 = vfloor.f32 %v19_v20  ;;  %v300_v9 = vld [vmem:[%s7505_s1 + $0x30] sm:$0xff] }
   0xc   :  { %p4403_p4 = pnand %p4402_p3, %p4396_p0 }
   0xd   :  { %v204_v13 = vcombine.low %v196_v12, %v203_v11  ;;  %84 = vrot.lane.b32.xlu0 %v4419_v1, %s4422_s12  ;;  %v22_v23 = vfloor.f32 %v20_v21  ;;  %v23_v24 = vmul.f32 16.0, %v21_v22  ;;  %v4428_v12 = vmov 1  }
   0xf   :  { %205 = vrot.lane.b32.xlu1 %v204_v13, %s4423_s0  ;;  %v24_v25 = vmul.f32 16.0, %v22_v23  ;;  %v4470_v27 = vsub.f32 %v15_v16, %v23_v24 }
  0x11   :  { %v4472_v28 = vsub.f32 %v16_v17, %v24_v25  ;;  %vm28_vm1 = vcmp.ge.f32.partialorder %v4470_v27, 1.0  ;;  %vm69_vm5 = vcmp.ge.f32.partialorder %v4470_v27, 2.0  ;;  %vm109_vm9 = vcmp.ge.f32.partialorder %v4470_v27, 4.0 }
  0x12   :  { %vm149_vm13 = vcmp.ge.f32.partialorder %v4470_v27, 8.0 }
  0x13   :  { %vm29_vm2 = vcmp.ge.f32.partialorder %v4472_v28, 1.0  ;;  %vm70_vm6 = vcmp.ge.f32.partialorder %v4472_v28, 2.0  ;;  %vm110_vm10 = vcmp.ge.f32.partialorder %v4472_v28, 4.0  ;;  %vm150_vm14 = vcmp.ge.f32.partialorder %v4472_v28, 8.0 }
  0x73   :  { %v45_v26 = vpop.permute.xlu0 %44 }
  0x7b   :  { %v47_v29 = vpop.permute.xlu0 %46 }
  0x7c   :  { %v51_v30 = vsel %vm50_vm0, %v45_v26, %v47_v29 }
  0x7d   :  { %v49_v31 = vpop.permute.xlu1 %48  ;;  %v55_v33 = vsel %vm28_vm1, %v51_v30, 0.0 }
  0x7e   :  { %v52_v32 = vsel %vm50_vm0, %v47_v29, %v49_v31 }
  0x7f   :  { %v56_v34 = vsel %vm29_vm2, %v52_v32, 0.0  ;;  %v85_v51 = vpop.permute.xlu0 %84 }
  0x80   :  { %v59_v35 = vcombine.low %v55_v33, %v56_v34 }
  0x81   :  { %v206_v36 = vpop.permute.xlu1 %205 }
  0x82   :  { %v66_v37 = vrot.slane %v59_v35, %v4461_v7  ;;  %v207_v38 = vrot.slane %v206_v36, 2 }
  0x84   :  { %v209_v39 = vsel %vm208_vm3, %v206_v36, %v207_v38  ;;  %v68_v40 = vadd.f32 %v66_v37, %v27_v6 }
  0x85   :  { %v4477_v41 = vadd.f32 %v209_v39, %v27_v6  ;;  %v298_v6 = vld [vmem:[%s7505_s1 + $0x20] sm:$0xff]  ;;  %s4430_s1 = smov 64  }
  0x86   :  { %v78_v42 = vrot.slane %v68_v40, %v4461_v7 }
  0x87   :  { %v219_v43 = vrot.slane %v4477_v41, %v4461_v7 }
  0x88   :  { %86 = vrot.lane.b32.xlu1 %v78_v42, %s4422_s12  ;;  %v79_v44 = vcombine.high %v78_v42, %v78_v42 }
  0x89   :  { %v220_v45 = vcombine.high %v219_v43, %v219_v43  ;;  %v221_v46 = vcombine.low %v4419_v1, %v219_v43 }
  0x8a   :  { %88 = vrot.lane.b32.xlu0 %v79_v44, %s4422_s12 }
  0x8b   :  { %v228_v48 = vrot.slane %v221_v46, %v4461_v7  ;;  %v235_v49 = vrot.slane %v220_v45, %v4461_v7 }
  0x8d   :  { %v236_v50 = vcombine.low %v228_v48, %v235_v49 }
  0x8e   :  { %124 = vrot.lane.b32.xlu0 %v4419_v1, %s4425_s13 }
  0x8f   :  { %237 = vrot.lane.b32.xlu1 %v236_v50, %s4426_s14 }
  0xfa   :  { %v87_v52 = vpop.permute.xlu1 %86 }
  0xfb   :  { %v91_v53 = vsel %vm90_vm4, %v85_v51, %v87_v52 }
  0xfc   :  { %v89_v54 = vpop.permute.xlu0 %88  ;;  %v95_v56 = vsel %vm69_vm5, %v91_v53, 0.0 }
  0xfd   :  { %v92_v55 = vsel %vm90_vm4, %v87_v52, %v89_v54 }
  0xfe   :  { %v96_v57 = vsel %vm70_vm6, %v92_v55, 0.0 }
  0xff   :  { %v99_v58 = vcombine.low %v95_v56, %v96_v57 }
 0x100   :  { %v125_v22 = vpop.permute.xlu0 %124 }
 0x101   :  { %v106_v59 = vrot.slane %v99_v58, %v4461_v7  ;;  %v238_v10 = vpop.permute.xlu1 %237 }
 0x102   :  { %v239_v11 = vrot.slane %v238_v10, 2 }
 0x103   :  { %v4491_v60 = vadd.f32 %v106_v59, %v68_v40 }
 0x104   :  { %v241_v13 = vsel %vm240_vm7, %v238_v10, %v239_v11 }
 0x105   :  { %v118_v61 = vrot.slane %v4491_v60, %v4461_v7  ;;  %v243_v14 = vadd.f32 %v241_v13, %v4477_v41  ;;  %v2194_v13 = vsub.s32 3, %v4455_v4 }
 0x107   :  { %126 = vrot.lane.b32.xlu1 %v118_v61, %s4425_s13  ;;  %v119_v62 = vcombine.high %v118_v61, %v118_v61  ;;  %v251_v15 = vrot.slane %v243_v14, %v4461_v7 }
 0x109   :  { %128 = vrot.lane.b32.xlu0 %v119_v62, %s4425_s13  ;;  %v252_v16 = vcombine.high %v251_v15, %v251_v15  ;;  %v253_v17 = vcombine.low %v4419_v1, %v251_v15 }
 0x10b   :  { %323 = vperm.xlu1 %4261, %v294_v63   ;;  %v260_v19 = vrot.slane %v253_v17, %v4461_v7  ;;  %v267_v20 = vrot.slane %v252_v16, %v4461_v7 }
 0x10d   :  { %164 = vrot.lane.b32.xlu0 %v4419_v1, %s4427_s19  ;;  %v268_v21 = vcombine.low %v260_v19, %v267_v20 }
 0x10f   :  { %333 = vperm.xlu1 %4261, %v296_v0  }
 0x111   :  { %328 = vperm.xlu0 %4262, %v295_v3  }
 0x113   :  { %338 = vperm.xlu1 %4261, %v297_v2  }
 0x115   :  { %343 = vperm.xlu0 %4262, %v298_v6  }
 0x117   :  { %348 = vperm.xlu1 %4261, %v299_v5  }
 0x119   :  { %353 = vperm.xlu0 %4262, %v300_v9  }
 0x11b   :  { %358 = vperm.xlu1 %4261, %v301_v8  }
 0x11d   :  { %4263 = vset.pattern.permute.xlu0 %v4428_v12 }
 0x11e   :  { %397 = vperm.xlu0 %4263, %v294_v63  }
 0x11f   :  { %4264 = vset.pattern.permute.xlu1 %v4428_v12 }
 0x120   :  { %401 = vperm.xlu1 %4264, %v295_v3  }
 0x122   :  { %409 = vperm.xlu0 %4263, %v297_v2  }
 0x124   :  { %405 = vperm.xlu1 %4264, %v296_v0  }
 0x126   :  { %417 = vperm.xlu0 %4263, %v299_v5  }
 0x128   :  { %413 = vperm.xlu1 %4264, %v298_v6  }
 0x12a   :  { %425 = vperm.xlu0 %4263, %v301_v8  }
 0x12c   :  { %421 = vperm.xlu1 %4264, %v300_v9  }
 0x12e   :  { %4266 = vset.pattern.permute.xlu0 %v4429_v18 }
 0x130   :  { %4265 = vset.pattern.permute.xlu1 %v4429_v18 }
 0x131   :  { %461 = vperm.xlu1 %4265, %v294_v63   ;;  %v305_v63 = vsub.s32 0, %v4455_v4 }
 0x135   :  { %269 = vrot.lane.b32.xlu1 %v268_v21, %s4430_s1 }
 0x179   :  { %v127_v23 = vpop.permute.xlu1 %126 }
 0x17a   :  { %v131_v24 = vsel %vm130_vm8, %v125_v22, %v127_v23 }
 0x17b   :  { %v129_v25 = vpop.permute.xlu0 %128  ;;  %v135_v29 = vsel %vm109_vm9, %v131_v24, 0.0 }
 0x17c   :  { %v132_v26 = vsel %vm130_vm8, %v127_v23, %v129_v25 }
 0x17d   :  { %v136_v30 = vsel %vm110_vm10, %v132_v26, 0.0 }
 0x17e   :  { %v139_v31 = vcombine.low %v135_v29, %v136_v30 }
 0x17f   :  { %v165_v43 = vpop.permute.xlu0 %164 }
 0x180   :  { %v146_v32 = vrot.slane %v139_v31, %v4461_v7 }
 0x182   :  { %v148_v33 = vadd.f32 %v146_v32, %v4491_v60 }
 0x184   :  { %v158_v34 = vrot.slane %v148_v33, %v4461_v7 }
 0x186   :  { %166 = vrot.lane.b32.xlu1 %v158_v34, %s4427_s19  ;;  %v159_v35 = vcombine.high %v158_v34, %v158_v34 }
 0x188   :  { %168 = vrot.lane.b32.xlu0 %v159_v35, %s4427_s19 }
 0x18a   :  { %469 = vperm.xlu1 %4265, %v296_v0   ;;  %v4533_v36 = vpop.permute.xlu1 %323  ;;  %v309_v0 = vsub.s32 2, %v4455_v4 }
 0x18c   :  { %465 = vperm.xlu0 %4266, %v295_v3  }
 0x18e   :  { %473 = vperm.xlu1 %4265, %v297_v2   ;;  %v4535_v37 = vpop.permute.xlu1 %333  ;;  %v2190_v2 = vsub.s32 1, %v4455_v4 }
 0x190   :  { %477 = vperm.xlu0 %4266, %v298_v6   ;;  %v4549_v45 = vpop.permute.xlu0 %328 }
 0x192   :  { %481 = vperm.xlu1 %4265, %v299_v5   ;;  %v4537_v38 = vpop.permute.xlu1 %338 }
 0x193   :  { %7533 = vst [vmem:[#allocation5_spill] sm:$0xff] %v4537_v38 }
 0x194   :  { %485 = vperm.xlu0 %4266, %v300_v9   ;;  %v4553_v47 = vpop.permute.xlu0 %343 }
 0x195   :  { %7538 = vst [vmem:[#allocation10_spill] sm:$0xff] %v4553_v47 }
 0x196   :  { %489 = vperm.xlu1 %4265, %v301_v8   ;;  %v4539_v39 = vpop.permute.xlu1 %348 }
 0x197   :  { %7534 = vst [vmem:[#allocation6_spill] sm:$0xff] %v4539_v39 }
 0x198   :  { %v4557_v49 = vpop.permute.xlu0 %353 }
 0x199   :  { %7539 = vst [vmem:[#allocation11_spill] sm:$0xff] %v4557_v49 }
 0x19a   :  { %v4541_v40 = vpop.permute.xlu1 %358 }
 0x19b   :  { %7535 = vst [vmem:[#allocation7_spill] sm:$0xff] %v4541_v40 }
 0x19d   :  { %v398_v51 = vpop.permute.xlu0 %397 }
 0x19f   :  { %v4543_v41 = vpop.permute.xlu1 %401 }
 0x1a1   :  { %v4559_v54 = vpop.permute.xlu0 %409 }
 0x1a2   :  { %7540 = vst [vmem:[#allocation12_spill] sm:$0xff] %v4559_v54 }
 0x1a3   :  { %v4545_v42 = vpop.permute.xlu1 %405 }
 0x1a5   :  { %v4562_v57 = vpop.permute.xlu0 %417 }
 0x1a6   :  { %7541 = vst [vmem:[#allocation13_spill] sm:$0xff] %v4562_v57 }
 0x1a7   :  { %v4547_v44 = vpop.permute.xlu1 %413 }
 0x1a8   :  { %7536 = vst [vmem:[#allocation8_spill] sm:$0xff] %v4547_v44 }
 0x1a9   :  { %v4565_v59 = vpop.permute.xlu0 %425 }
 0x1aa   :  { %7542 = vst [vmem:[#allocation14_spill] sm:$0xff] %v4565_v59  ;;  %v7552_v59 = vmov 1326507024  }
 0x1ab   :  { %v4551_v46 = vpop.permute.xlu1 %421 }
 0x1ac   :  { %7537 = vst [vmem:[#allocation9_spill] sm:$0xff] %v4551_v46 }
 0x1b0   :  { %v4555_v48 = vpop.permute.xlu1 %461 }
 0x1b4   :  { %v270_v50 = vpop.permute.xlu1 %269 }
 0x1b5   :  { %v271_v52 = vrot.slane %v270_v50, 2 }
 0x1b7   :  { %v273_v53 = vsel %vm272_vm11, %v270_v50, %v271_v52 }
 0x1b8   :  { %v275_v55 = vadd.f32 %v273_v53, %v243_v14 }
 0x1ba   :  { %v283_v56 = vrot.slane %v275_v55, %v4461_v7 }
 0x1bc   :  { %v284_v58 = vcombine.low %v4419_v1, %v283_v56 }
 0x1be   :  { %v291_v60 = vrot.slane %v284_v58, %v4461_v7 }
 0x1c0   :  { %v293_v3 = vadd.f32 %v291_v60, %v275_v55 }
 0x1c2   :  { %v306_v10 = vrot.slane %v293_v3, %v305_v63  ;;  %v310_v11 = vrot.slane %v293_v3, %v309_v0  ;;  %v2191_v12 = vrot.slane %v293_v3, %v2190_v2  ;;  %v2195_v21 = vrot.slane %v293_v3, %v2194_v13 }
 0x1c4   :  { %v4575_v14 = vrot.slane %v306_v10, %v305_v63  ;;  %v4577_v15 = vrot.slane %v310_v11, %v305_v63  ;;  %v4579_v16 = vrot.slane %v2191_v12, %v2190_v2  ;;  %v4598_v32 = vrot.slane %v2195_v21, %v2190_v2 }
 0x1c6   :  { %v361_v4 = vmul.f32 %v4533_v36, %v4575_v14  ;;  %v2206_v25 = vmul.f32 %v4579_v16, %v4533_v36  ;;  %v2207_v55 = vmul.f32 %v4598_v32, %v4533_v36 }
 0x1f8   :  { %v167_v61 = vpop.permute.xlu1 %166 }
 0x1f9   :  { %v171_v62 = vsel %vm170_vm12, %v165_v43, %v167_v61 }
 0x1fa   :  { %v169_v5 = vpop.permute.xlu0 %168  ;;  %v175_v6 = vsel %vm149_vm13, %v171_v62, 0.0 }
 0x1fb   :  { %v172_v1 = vsel %vm170_vm12, %v167_v61, %v169_v5 }
 0x1fc   :  { %v176_v8 = vsel %vm150_vm14, %v172_v1, 0.0 }
 0x1fd   :  { %v179_v9 = vcombine.low %v175_v6, %v176_v8 }
 0x1ff   :  { %v186_v27 = vrot.slane %v179_v9, %v4461_v7  ;;  %v362_v7 = vmul.f32 %v4533_v36, %v4577_v15 }
 0x201   :  { %v188_v28 = vadd.f32 %v186_v27, %v148_v33 }
 0x203   :  { %v381_v17 = vrot.slane %v188_v28, %v305_v63  ;;  %v385_v18 = vrot.slane %v188_v28, %v309_v0  ;;  %v2225_v19 = vrot.slane %v188_v28, %v2190_v2  ;;  %v2229_v20 = vrot.slane %v188_v28, %v2194_v13 }
 0x204   :  { %v4627_v13 = vmul.f32 %v4535_v37, %v4575_v14  ;;  %v4631_v28 = vmul.f32 %v4535_v37, %v4577_v15 }
 0x205   :  { %v4581_v22 = vrot.slane %v381_v17, %v305_v63  ;;  %v4583_v23 = vrot.slane %v385_v18, %v305_v63  ;;  %v4585_v24 = vrot.slane %v2225_v19, %v2190_v2  ;;  %v4595_v30 = vrot.slane %v2229_v20, %v2190_v2 }
 0x207   :  { %v428_v26 = vmul.f32 %v398_v51, %v4581_v22  ;;  %v429_v29 = vmul.f32 %v398_v51, %v4583_v23  ;;  %v2240_v31 = vmul.f32 %v4585_v24, %v398_v51  ;;  %v2241_v52 = vmul.f32 %v4595_v30, %v398_v51 }
 0x208   :  { %v4639_v18 = vmul.f32 %v4545_v42, %v4581_v22 }
 0x209   :  { %v444_v33 = vadd.f32 %v428_v26, %v361_v4  ;;  %v445_v34 = vadd.f32 %v429_v29, %v362_v7  ;;  %v2256_v35 = vadd.f32 %v2240_v31, %v2206_v25  ;;  %v2257_v0 = vadd.f32 %v2241_v52, %v2207_v55 }
 0x20a   :  { %v7516_v55 = vmov 2475754826  }
 0x20b   :  { %v4601_v43 = vadd.f32 %v4555_v48, %v444_v33  ;;  %v4604_v50 = vadd.f32 %v4555_v48, %v445_v34  ;;  %v4608_v53 = vadd.f32 %v2256_v35, %v4555_v48  ;;  %v4622_v9 = vadd.f32 %v2257_v0, %v4555_v48 }
 0x20c   :  { %v4635_v48 = vmul.f32 %v4579_v16, %v4535_v37  ;;  %v7520_v33 = vmov 683565275  }
 0x20d   :  { %v7509_v56 = vand.u32 2147483647, %v4601_v43  ;;  %v511_v58 = vand.u32 2139095040, %v4601_v43  ;;  %v7508_v60 = vand.u32 2147483647, %v4604_v50  ;;  %v615_v61 = vand.u32 2139095040, %v4604_v50 }
 0x20e   :  { %v2291_v3 = vand.u32 2139095040, %v4608_v53  ;;  %v7507_v12 = vand.u32 2147483647, %v4608_v53  ;;  %vm510_vm12 = vcmp.lt.s32.totalorder %v4601_v43, 0 }
 0x20f   :  { %v512_v62 = vshrl.u32 %v511_v58, 23  ;;  %v515_v63 = vand.u32 8388607, %v7509_v56  ;;  %v616_v51 = vshrl.u32 %v615_v61, 23  ;;  %v619_v2 = vand.u32 8388607, %v7508_v60 }
 0x210   :  { %v2292_v1 = vshrl.u32 %v2291_v3, 23  ;;  %v4647_v25 = vand.u32 8388607, %v7507_v12  ;;  %v7514_v61 = vmov 2131351028  }
 0x211   :  { %v3985_v36 = vadd.s32 4294967169, %v512_v62  ;;  %v3989_v5 = vadd.s32 4294967169, %v616_v51  ;;  %v516_v6 = vor.u32 8388608, %v515_v63  ;;  %v620_v10 = vor.u32 8388608, %v619_v2 }
 0x212   :  { %v4049_v27 = vadd.s32 4294967169, %v2292_v1  ;;  %v7510_v63 = vmov 2102212464   ;;  %v7512_v51 = vmov 920167782  }
 0x213   :  { %v518_v8 = vadd.s32 1, %v3985_v36  ;;  %v622_v11 = vadd.s32 1, %v3989_v5  ;;  %v4641_v21 = vshll.u32 %v516_v6, 8  ;;  %v4643_v7 = vshll.u32 %v620_v10, 8 }
 0x214   :  { %v4649_v26 = vadd.s32 1, %v4049_v27 }
 0x215   :  { %vm519_vm15 = vcmp.gt.s32.totalorder %v518_v8, 0  ;;  %vm623_vm0 = vcmp.gt.s32.totalorder %v622_v11, 0 }
 0x216   :  { %v520_v17 = vsel %vm519_vm15, %v518_v8, 0  ;;  %v624_v4 = vsel %vm623_vm0, %v622_v11, 0  ;;  %v7518_v8 = vmov 1326507024   ;;  %vm2299_vm5 = vcmp.gt.s32.totalorder %v4649_v26, 0 }
 0x217   :  { %v521_v19 = vshrl.u32 %v520_v17, 5  ;;  %v522_v20 = vand.u32 31, %v520_v17  ;;  %v4653_v35 = vshrl.u32 %v624_v4, 5  ;;  %v626_v52 = vand.u32 31, %v624_v4 }
 0x219   :  { %v523_v31 = vsub.s32 32, %v522_v20  ;;  %v525_v34 = vshll.u32 %v7520_v33, %v522_v20  ;;  %v528_v58 = vshll.u32 %v7516_v55, %v522_v20  ;;  %v531_v62 = vshll.u32 %v7514_v61, %v522_v20 }
 0x21a   :  { %v534_v0 = vshll.u32 %v7510_v63, %v522_v20  ;;  %v537_v2 = vshll.u32 %v7512_v51, %v522_v20  ;;  %vm540_vm1 = vcmp.lt.s32.totalorder %v521_v19, 1  ;;  %vm541_vm2 = vcmp.lt.s32.totalorder %v521_v19, 2 }
 0x21b   :  { %v526_v3 = vshrl.u32 %v7516_v55, %v523_v31  ;;  %v529_v36 = vshrl.u32 %v7514_v61, %v523_v31  ;;  %v532_v5 = vshrl.u32 %v7510_v63, %v523_v31  ;;  %v524_v1 = vshrl.u32 %v7520_v33, %v523_v31 }
 0x21c   :  { %v535_v6 = vshrl.u32 %v7512_v51, %v523_v31  ;;  %v538_v10 = vshrl.u32 %v7518_v8, %v523_v31  ;;  %v627_v4 = vsub.s32 32, %v626_v52  ;;  %vm542_vm3 = vcmp.lt.s32.totalorder %v521_v19, 3 }
 0x21d   :  { %v527_v11 = vor.u32 %v526_v3, %v525_v34  ;;  %v530_v27 = vor.u32 %v529_v36, %v528_v58  ;;  %v533_v17 = vor.u32 %v532_v5, %v531_v62  ;;  %vm543_vm4 = vcmp.lt.s32.totalorder %v521_v19, 4 }
 0x21e   :  { %v536_v20 = vor.u32 %v535_v6, %v534_v0  ;;  %v539_v12 = vor.u32 %v538_v10, %v537_v2  ;;  %v629_v31 = vshll.u32 %v7520_v33, %v626_v52  ;;  %v7543_v62 = vmov 2475754826  }
 0x21f   :  { %v544_v60 = vsel %vm540_vm1, %v524_v1, %v527_v11  ;;  %v545_v56 = vsel %vm543_vm4, %v533_v17, 2102212464  ;;  %v548_v29 = vsel %vm540_vm1, %v527_v11, %v530_v27  ;;  %v552_v63 = vsel %vm540_vm1, %v530_v27, %v533_v17 }
 0x220   :  { %v546_v51 = vsel %vm542_vm3, %v530_v27, %v545_v56  ;;  %v549_v61 = vsel %vm543_vm4, %v536_v20, 920167782  ;;  %v553_v55 = vsel %vm543_vm4, %v539_v12, 1326507024  ;;  %v630_v0 = vshrl.u32 %v7543_v62, %v627_v4 }
 0x221   :  { %v550_v34 = vsel %vm542_vm3, %v533_v17, %v549_v61  ;;  %v554_v58 = vsel %vm542_vm3, %v536_v20, %v553_v55  ;;  %v632_v2 = vshll.u32 %v7543_v62, %v626_v52  ;;  %v547_v3 = vsel %vm541_vm2, %v544_v60, %v546_v51 }
 0x222   :  { %v551_v36 = vsel %vm541_vm2, %v548_v29, %v550_v34  ;;  %v555_v5 = vsel %vm541_vm2, %v552_v63, %v554_v58  ;;  %v7544_v1 = vmov 2131351028   ;;  %v631_v55 = vor.u32 %v630_v0, %v629_v31 }
 0x223   :  { %v633_v56 = vshrl.u32 %v7544_v1, %v627_v4  ;;  %v4677_v12 = vmul.u32.u64.low %v4641_v21, %v555_v5  ;;  %v4678_v6 = vmul.u32.u64.high %v4641_v21, %v555_v5, %v4677_v12  ;;  %v635_v27 = vshll.u32 %v7544_v1, %v626_v52 }
 0x224   :  { %v4681_v10 = vmul.u32.u64.low %v4641_v21, %v551_v36  ;;  %v4682_v61 = vmul.u32.u64.high %v4641_v21, %v551_v36, %v4681_v10  ;;  %v7545_v60 = vmov 2102212464   ;;  %v628_v19 = vshrl.u32 %v7520_v33, %v627_v4 }
 0x225   :  { %v634_v11 = vor.u32 %v633_v56, %v632_v2  ;;  %v636_v51 = vshrl.u32 %v7545_v60, %v627_v4  ;;  %v638_v29 = vshll.u32 %v7545_v60, %v626_v52  ;;  %v7546_v63 = vmov 920167782  }
 0x226   :  { %v639_v17 = vshrl.u32 %v7546_v63, %v627_v4  ;;  %v642_v20 = vshrl.u32 %v7518_v8, %v627_v4  ;;  %v563_v34 = vmul.u32 %v4641_v21, %v547_v3  ;;  %v641_v36 = vshll.u32 %v7546_v63, %v626_v52 }
 0x227   :  { %v637_v58 = vor.u32 %v636_v51, %v635_v27  ;;  %vm644_vm6 = vcmp.lt.s32.totalorder %v4653_v35, 1  ;;  %vm565_vm7 = vc.u32 %v4678_v6, %v4681_v10  ;;  %v566_v31 = vadd.s32 1, %v4682_v61 }
 0x228   :  { %v640_v0 = vor.u32 %v639_v17, %v638_v29  ;;  %vm645_vm8 = vcmp.lt.s32.totalorder %v4653_v35, 2  ;;  %v643_v2 = vor.u32 %v642_v20, %v641_v36  ;;  %vm646_vm9 = vcmp.lt.s32.totalorder %v4653_v35, 3 }
 0x229   :  { %vm647_vm10 = vcmp.lt.s32.totalorder %v4653_v35, 4  ;;  %v652_v4 = vsel %vm644_vm6, %v631_v55, %v634_v11  ;;  %v567_v21 = vsel %vm565_vm7, %v566_v31, %v4682_v61  ;;  %v656_v5 = vsel %vm644_vm6, %v634_v11, %v637_v58 }
 0x22a   :  { %v649_v3 = vsel %vm647_vm10, %v637_v58, 2102212464  ;;  %v653_v52 = vsel %vm647_vm10, %v640_v0, 920167782  ;;  %v568_v56 = vadd.s32 %v567_v21, %v563_v34  ;;  %v648_v12 = vsel %vm644_vm6, %v628_v19, %v631_v55 }
 0x22b   :  { %v654_v27 = vsel %vm646_vm9, %v637_v58, %v653_v52  ;;  %v657_v51 = vsel %vm647_vm10, %v643_v2, 1326507024  ;;  %v650_v8 = vsel %vm646_vm9, %v634_v11, %v649_v3  ;;  %v2300_v20 = vsel %vm2299_vm5, %v4649_v26, 0 }
 0x22c   :  { %v655_v29 = vsel %vm645_vm8, %v652_v4, %v654_v27  ;;  %v658_v17 = vsel %vm646_vm9, %v640_v0, %v657_v51  ;;  %v569_v36 = vadd.s32 536870912, %v568_v56  ;;  %v7522_v19 = vand.u32 2147483647, %v4622_v9 }
 0x22d   :  { %v659_v61 = vsel %vm645_vm8, %v656_v5, %v658_v17  ;;  %v4709_v31 = vmul.u32.u64.low %v4643_v7, %v655_v29  ;;  %v4710_v33 = vmul.u32.u64.high %v4643_v7, %v655_v29, %v4709_v31  ;;  %v433_v34 = vmul.f32 %v4545_v42, %v4583_v23 }
 0x22e   :  { %v4714_v55 = vmul.u32.u64.low %v4643_v7, %v659_v61  ;;  %v4715_v11 = vmul.u32.u64.high %v4643_v7, %v659_v61, %v4714_v55  ;;  %v570_v58 = vshrl.u32 %v569_v36, 30  ;;  %v651_v26 = vsel %vm645_vm8, %v648_v12, %v650_v8 }
 0x22f   :  { %v2296_v0 = vor.u32 8388608, %v4647_v25  ;;  %v2302_v2 = vand.u32 31, %v2300_v20  ;;  %v4725_v4 = vmul.f32 %v4598_v32, %v4535_v37  ;;  %v4729_v21 = vadd.f32 %v4639_v18, %v4627_v13 }
 0x230   :  { %v4733_v3 = vmul.f32 %v4585_v24, %v4545_v42  ;;  %v4737_v52 = vmul.f32 %v4595_v30, %v4545_v42  ;;  %v571_v35 = vshll.u32 %v570_v58, 30  ;;  %v670_v25 = vadd.s32 1, %v4710_v33 }
 0x231   :  { %v2303_v8 = vsub.s32 32, %v2302_v2  ;;  %v7547_v5 = vand.u32 2139095040, %v4622_v9  ;;  %v667_v12 = vmul.u32 %v4643_v7, %v651_v26  ;;  %vm669_vm11 = vc.u32 %v4715_v11, %v4709_v31 }
 0x232   :  { %v4747_v13 = vand.u32 8388607, %v7522_v19  ;;  %v4750_v18 = vadd.f32 %v433_v34, %v4631_v28  ;;  %v4753_v42 = vsub.s32 %v568_v56, %v571_v35  ;;  %v671_v27 = vsel %vm669_vm11, %v670_v25, %v4710_v33 }
 0x233   :  { %v2396_v37 = vshrl.u32 %v7547_v5, 23  ;;  %v4756_v51 = vshll.u32 %v2296_v0, 8  ;;  %v7548_v7 = vand.u32 2147483647, %v4601_v43  ;;  %v564_v17 = vadd.s32 %v4681_v10, %v4678_v6 }
 0x234   :  { %v672_v36 = vadd.s32 %v671_v27, %v667_v12  ;;  %v4766_v28 = vshrl.u32 %v2300_v20, 5  ;;  %v2306_v61 = vshrl.u32 %v7543_v62, %v2303_v8  ;;  %v574_v56 = vsub.s32 0, %v4753_v42 }
 0x235   :  { %vm4760_vm13 = vcmp.le.f32.partialorder %v7548_v7, 0.7853982  ;;  %v2309_v33 = vshrl.u32 %v7544_v1, %v2303_v8  ;;  %v2312_v55 = vshrl.u32 %v7545_v60, %v2303_v8  ;;  %v4053_v34 = vadd.s32 4294967169, %v2396_v37 }
 0x236   :  { %v594_v26 = vsub.s32 4, %v570_v58  ;;  %v673_v0 = vadd.s32 536870912, %v672_v36  ;;  %v7551_v35 = vmov 683565275   ;;  %v3986_v6 = vmin.u32 %v574_v56, %v4753_v42 }
 0x237   :  { %v2305_v25 = vshll.u32 %v7551_v35, %v2302_v2  ;;  %v2308_v10 = vshll.u32 %v7543_v62, %v2302_v2  ;;  %v2311_v20 = vshll.u32 %v7544_v1, %v2302_v2  ;;  %v2315_v12 = vshrl.u32 %v7546_v63, %v2303_v8 }
 0x238   :  { %v674_v27 = vshrl.u32 %v673_v0, 30  ;;  %v2314_v19 = vshll.u32 %v7545_v60, %v2302_v2  ;;  %v2318_v37 = vshrl.u32 %v7552_v59, %v2303_v8  ;;  %v576_v40 = vclz %v3986_v6 }
 0x239   :  { %v2307_v7 = vor.u32 %v2306_v61, %v2305_v25  ;;  %v2310_v46 = vor.u32 %v2309_v33, %v2308_v10  ;;  %v2313_v49 = vor.u32 %v2312_v55, %v2311_v20  ;;  %v2317_v39 = vshll.u32 %v7546_v63, %v2302_v2 }
 0x23a   :  { %v595_v56 = vsel %vm510_vm12, %v594_v26, %v570_v58  ;;  %v675_v5 = vshll.u32 %v674_v27, 30  ;;  %v2316_v57 = vor.u32 %v2315_v12, %v2314_v19  ;;  %vm2320_vm14 = vcmp.lt.s32.totalorder %v4766_v28, 1 }
 0x23b   :  { %v3987_v44 = vadd.s32 4294967294, %v576_v40  ;;  %v2319_v47 = vor.u32 %v2318_v37, %v2317_v39  ;;  %vm2321_vm15 = vcmp.lt.s32.totalorder %v4766_v28, 2  ;;  %vm2323_vm0 = vcmp.lt.s32.totalorder %v4766_v28, 4 }
 0x23c   :  { %vm614_vm1 = vcmp.lt.s32.totalorder %v4604_v50, 0  ;;  %v4787_v61 = vsub.s32 %v672_v36, %v675_v5  ;;  %v2304_v33 = vshrl.u32 %v7551_v35, %v2303_v8  ;;  %vm2322_vm2 = vcmp.lt.s32.totalorder %v4766_v28, 3 }
 0x23d   :  { %v2329_v58 = vsel %vm2323_vm0, %v2316_v57, 920167782  ;;  %vm3988_vm3 = vcmp.lt.s32.totalorder %v3987_v44, 0  ;;  %v597_v40 = vsel %vm4760_vm13, 0, %v595_v56  ;;  %v2328_v39 = vsel %vm2320_vm14, %v2307_v7, %v2310_v46 }
 0x23e   :  { %v2330_v19 = vsel %vm2322_vm2, %v2313_v49, %v2329_v58  ;;  %v579_v2 = vsel %vm3988_vm3, 0, %v3987_v44  ;;  %v678_v36 = vsub.s32 0, %v4787_v61  ;;  %v698_v55 = vsub.s32 4, %v674_v27 }
 0x23f   :  { %v2332_v8 = vsel %vm2320_vm14, %v2310_v46, %v2313_v49  ;;  %v580_v26 = vsub.s32 32, %v579_v2  ;;  %v584_v0 = vsub.s32 4294967266, %v579_v2  ;;  %v7553_v25 = vand.u32 2147483647, %v4604_v50 }
 0x240   :  { %v2325_v6 = vsel %vm2323_vm0, %v2313_v49, 2102212464  ;;  %v2333_v44 = vsel %vm2323_vm0, %v2319_v47, 1326507024  ;;  %v581_v10 = vshll.u32 %v4753_v42, %v579_v2  ;;  %v3990_v20 = vmin.u32 %v678_v36, %v4787_v61 }
 0x241   :  { %vm4804_vm4 = vcmp.le.f32.partialorder %v7553_v25, 0.7853982  ;;  %v2331_v12 = vsel %vm2321_vm15, %v2328_v39, %v2330_v19  ;;  %v2334_v37 = vsel %vm2322_vm2, %v2316_v57, %v2333_v44  ;;  %v582_v56 = vshrl.u32 %v564_v17, %v580_v26 }
 0x242   :  { %v585_v58 = vadd.s32 127, %v584_v0  ;;  %v2335_v25 = vsel %vm2321_vm15, %v2332_v8, %v2334_v37  ;;  %v2402_v54 = vadd.s32 1, %v4053_v34  ;;  %v601_v49 = vadd.s32 3, %v597_v40 }
 0x243   :  { %v680_v38 = vclz %v3990_v20  ;;  %v2324_v47 = vsel %vm2320_vm14, %v2304_v33, %v2307_v7  ;;  %v2326_v42 = vsel %vm2322_vm2, %v2310_v46, %v2325_v6  ;;  %v583_v2 = vor.u32 %v582_v56, %v581_v10 }
 0x244   :  { %v586_v36 = vshll.u32 %v585_v58, 23  ;;  %v4825_v39 = vmul.u32.u64.low %v4756_v51, %v2335_v25  ;;  %v4826_v19 = vmul.u32.u64.high %v4756_v51, %v2335_v25, %v4825_v39  ;;  %vm2403_vm5 = vcmp.gt.s32.totalorder %v2402_v54, 0 }
 0x245   :  { %v3991_v57 = vadd.s32 4294967294, %v680_v38  ;;  %v4829_v17 = vmul.u32.u64.low %v4756_v51, %v2331_v12  ;;  %v4830_v26 = vmul.u32.u64.high %v4756_v51, %v2331_v12, %v4829_v17  ;;  %v668_v7 = vadd.s32 %v4709_v31, %v4715_v11 }
 0x246   :  { %v587_v34 = vor.u32 4788187, %v586_v36  ;;  %v699_v46 = vsel %vm614_vm1, %v698_v55, %v674_v27  ;;  %v2404_v33 = vsel %vm2403_vm5, %v2402_v54, 0  ;;  %v4837_v40 = vand.u32 3, %v601_v49 }
 0x247   :  { %vm3992_vm6 = vcmp.lt.s32.totalorder %v3991_v57, 0  ;;  %v2327_v38 = vsel %vm2321_vm15, %v2324_v47, %v2326_v42  ;;  %v2406_v8 = vand.u32 31, %v2404_v33  ;;  %v590_v6 = vcvt.s32.f32 %v583_v2 }
 0x248   :  { %v588_v0 = vand.u32 2147483647, %v587_v34  ;;  %v683_v44 = vsel %vm3992_vm6, 0, %v3991_v57  ;;  %vm2345_vm7 = vc.u32 %v4826_v19, %v4829_v17  ;;  %v701_v31 = vsel %vm4804_vm4, 0, %v699_v46 }
 0x249   :  { %v684_v10 = vsub.s32 32, %v683_v44  ;;  %v688_v20 = vsub.s32 4294967266, %v683_v44  ;;  %v2346_v54 = vadd.s32 1, %v4830_v26  ;;  %v2343_v27 = vmul.u32 %v4756_v51, %v2327_v38 }
 0x24a   :  { %v591_v11 = vmul.f32 %v590_v6, %v588_v0  ;;  %v4847_v55 = vshrl.u32 %v2404_v33, 5  ;;  %v2407_v28 = vsub.s32 32, %v2406_v8  ;;  %v685_v12 = vshll.u32 %v4787_v61, %v683_v44  ;;  %v4863_v0 = vpop.permute.xlu1 %469 }
 0x24b   :  { %v686_v37 = vshrl.u32 %v668_v7, %v684_v10  ;;  %v689_v56 = vadd.s32 127, %v688_v20  ;;  %v2347_v58 = vsel %vm2345_vm7, %v2346_v54, %v4830_v26  ;;  %v2409_v47 = vshll.u32 %v7551_v35, %v2406_v8 }
 0x24c   :  { %v592_v25 = vxor.u32 2147483648, %v591_v11  ;;  %v2348_v49 = vadd.s32 %v2347_v58, %v2343_v27  ;;  %v2410_v42 = vshrl.u32 %v7543_v62, %v2407_v28  ;;  %v2412_v39 = vshll.u32 %v7543_v62, %v2406_v8 }
 0x24d   :  { %v687_v2 = vor.u32 %v686_v37, %v685_v12  ;;  %v690_v36 = vshll.u32 %v689_v56, 23  ;;  %v2413_v51 = vshrl.u32 %v7544_v1, %v2407_v28  ;;  %v2415_v34 = vshll.u32 %v7544_v1, %v2406_v8 }
 0x24e   :  { %v593_v57 = vsel %vm510_vm12, %v592_v25, %v591_v11  ;;  %v2349_v61 = vadd.s32 536870912, %v2348_v49  ;;  %v2416_v26 = vshrl.u32 %v7545_v60, %v2407_v28  ;;  %v2411_v33 = vor.u32 %v2410_v42, %v2409_v47 }
 0x24f   :  { %v596_v7 = vsel %vm4760_vm13, %v4601_v43, %v593_v57  ;;  %v691_v46 = vor.u32 4788187, %v690_v36  ;;  %v2418_v38 = vshll.u32 %v7545_v60, %v2406_v8  ;;  %v694_v6 = vcvt.s32.f32 %v687_v2 }
 0x250   :  { %4267 = vcosq.f32 %v596_v7  ;;  %v4865_v44 = vshrl.u32 %v2349_v61, 30  ;;  %v2419_v10 = vshrl.u32 %v7546_v63, %v2407_v28  ;;  %v2414_v54 = vor.u32 %v2413_v51, %v2412_v39 }
 0x251   :  { %4269 = vsinq.f32 %v596_v7  ;;  %v692_v20 = vand.u32 2147483647, %v691_v46  ;;  %v2422_v11 = vshrl.u32 %v7552_v59, %v2407_v28  ;;  %v4872_v12 = vadd.f32 %v4863_v0, %v4729_v21 }
 0x252   :  { %v2351_v29 = vshll.u32 %v4865_v44, 30  ;;  %v2420_v27 = vor.u32 %v2419_v10, %v2418_v38  ;;  %v4876_v37 = vadd.f32 %v4733_v3, %v4635_v48  ;;  %v2417_v58 = vor.u32 %v2416_v26, %v2415_v34 }
 0x253   :  { %v695_v56 = vmul.f32 %v694_v6, %v692_v20  ;;  %v2421_v25 = vshll.u32 %v7546_v63, %v2406_v8  ;;  %v4881_v47 = vadd.f32 %v4863_v0, %v4750_v18  ;;  %v705_v42 = vadd.s32 3, %v701_v31 }
 0x254   :  { %v4883_v2 = vsub.s32 %v2348_v49, %v2351_v29  ;;  %vm2424_vm8 = vcmp.lt.s32.totalorder %v4847_v55, 1  ;;  %v7556_v21 = vor.u32 8388608, %v4747_v13  ;;  %vm604_vm9 = vcmp.eq.s32.totalorder %v4837_v40, 0 }
 0x255   :  { %v696_v48 = vxor.u32 2147483648, %v695_v56  ;;  %v2423_v3 = vor.u32 %v2422_v11, %v2421_v25  ;;  %vm2427_vm10 = vcmp.lt.s32.totalorder %v4847_v55, 4  ;;  %v2432_v8 = vsel %vm2424_vm8, %v2411_v33, %v2414_v54 }
 0x256   :  { %v4888_v36 = vshll.u32 %v7556_v21, 8  ;;  %vm603_vm11 = vcmp.lt.s32.totalorder %v4837_v40, 2  ;;  %v2354_v18 = vsub.s32 0, %v4883_v2  ;;  %v2408_v31 = vshrl.u32 %v7551_v35, %v2407_v28 }
 0x257   :  { %vm2426_vm12 = vcmp.lt.s32.totalorder %v4847_v55, 3  ;;  %v2433_v13 = vsel %vm2427_vm10, %v2420_v27, 920167782  ;;  %vm600_vm13 = vweird.f32 %v4601_v43  ;;  %v697_v49 = vsel %vm614_vm1, %v696_v48, %v695_v56 }
 0x258   :  { %vm2290_vm14 = vcmp.lt.s32.totalorder %v4608_v53, 0  ;;  %vm2425_vm15 = vcmp.lt.s32.totalorder %v4847_v55, 2  ;;  %v2429_v39 = vsel %vm2427_vm10, %v2417_v58, 2102212464  ;;  %v2434_v28 = vsel %vm2426_vm12, %v2417_v58, %v2433_v13 }
 0x259   :  { %v700_v51 = vsel %vm4804_vm4, %v4604_v50, %v697_v49  ;;  %v4050_v57 = vmin.u32 %v2354_v18, %v4883_v2  ;;  %v2435_v61 = vsel %vm2425_vm15, %v2432_v8, %v2434_v28  ;;  %v2436_v34 = vsel %vm2424_vm8, %v2414_v54, %v2417_v58 }
 0x25a   :  { %4271 = vcosq.f32 %v700_v51  ;;  %v2437_v26 = vsel %vm2427_vm10, %v2423_v3, 1326507024  ;;  %v4920_v7 = vmul.u32.u64.low %v4888_v36, %v2435_v61  ;;  %v4921_v46 = vmul.u32.u64.high %v4888_v36, %v2435_v61, %v4920_v7  ;;  %v4268_v38 = vpop.eup %4267 }
 0x25b   :  { %vm607_vm0 = vcmp.eq.s32.totalorder %v4837_v40, 2  ;;  %4273 = vsinq.f32 %v700_v51  ;;  %v4925_v5 = vand.u32 3, %v705_v42  ;;  %v7557_v6 = vand.u32 2147483647, %v4608_v53  ;;  %v4270_v11 = vpop.eup %4269 }
 0x25c   :  { %v2356_v20 = vclz %v4050_v57  ;;  %v608_v29 = vxor.u32 2147483648, %v4268_v38  ;;  %v2428_v56 = vsel %vm2424_vm8, %v2408_v31, %v2411_v33  ;;  %v2430_v58 = vsel %vm2426_vm12, %v2414_v54, %v2429_v39 }
 0x25d   :  { %vm4929_vm1 = vcmp.le.f32.partialorder %v7557_v6, 0.7853982  ;;  %v2438_v25 = vsel %vm2426_vm12, %v2420_v27, %v2437_v26  ;;  %v605_v42 = vxor.u32 2147483648, %v4270_v11  ;;  %v2374_v48 = vsub.s32 4, %v4865_v44 }
 0x25e   :  { %v4051_v21 = vadd.s32 4294967294, %v2356_v20  ;;  %v2439_v3 = vsel %vm2425_vm15, %v2436_v34, %v2438_v25  ;;  %v609_v8 = vsel %vm607_vm0, %v608_v29, %v4270_v11  ;;  %v2344_v18 = vadd.s32 %v4829_v17, %v4826_v19 }
 0x25f   :  { %v4945_v13 = vmul.u32.u64.low %v4888_v36, %v2439_v3  ;;  %v4946_v33 = vmul.u32.u64.high %v4888_v36, %v2439_v3, %v4945_v13  ;;  %v606_v54 = vsel %vm604_vm9, %v4268_v38, %v605_v42  ;;  %v2431_v27 = vsel %vm2425_vm15, %v2428_v56, %v2430_v58 }
 0x260   :  { %vm4052_vm2 = vcmp.lt.s32.totalorder %v4051_v21, 0  ;;  %v2450_v31 = vadd.s32 1, %v4921_v46  ;;  %v610_v49 = vsel %vm603_vm11, %v606_v54, %v609_v8  ;;  %vm707_vm3 = vcmp.lt.s32.totalorder %v4925_v5, 2 }
 0x261   :  { %v2359_v39 = vsel %vm4052_vm2, 0, %v4051_v21  ;;  %v924_v19 = vand.u32 2147483647, %v4872_v12  ;;  %v927_v17 = vand.u32 2139095040, %v4872_v12  ;;  %v611_v28 = vsel %vm600_vm13, nan, %v610_v49 }
 0x262   :  { %vm704_vm4 = vweird.f32 %v4604_v50  ;;  %v2360_v51 = vsub.s32 32, %v2359_v39  ;;  %v2364_v55 = vsub.s32 4294967266, %v2359_v39  ;;  %v2375_v57 = vsel %vm2290_vm14, %v2374_v48, %v4865_v44  ;;  %2172 = vst [vmem:[#allocation2] sm:$0xff] %v611_v28 }
 0x263   :  { %vm708_vm5 = vcmp.eq.s32.totalorder %v4925_v5, 0  ;;  %v2447_v40 = vmul.u32 %v4888_v36, %v2431_v27  ;;  %vm2449_vm6 = vc.u32 %v4946_v33, %v4920_v7  ;;  %v928_v61 = vshrl.u32 %v927_v17, 23 }
 0x264   :  { %v2361_v43 = vshll.u32 %v4883_v2, %v2359_v39  ;;  %v2362_v34 = vshrl.u32 %v2344_v18, %v2360_v51  ;;  %v2365_v26 = vadd.s32 127, %v2364_v55  ;;  %v2451_v38 = vsel %vm2449_vm6, %v2450_v31, %v4921_v46  ;;  %v4272_v6 = vpop.eup %4271 }
 0x265   :  { %v2377_v20 = vsel %vm4929_vm1, 0, %v2375_v57  ;;  %v2452_v44 = vadd.s32 %v2451_v38, %v2447_v40  ;;  %v4001_v11 = vadd.s32 4294967169, %v928_v61  ;;  %v931_v29 = vand.u32 8388607, %v924_v19  ;;  %v4274_v36 = vpop.eup %4273 }
 0x266   :  { %vm711_vm7 = vcmp.eq.s32.totalorder %v4925_v5, 2  ;;  %v712_v56 = vxor.u32 2147483648, %v4272_v6  ;;  %v2363_v58 = vor.u32 %v2362_v34, %v2361_v43  ;;  %v2366_v25 = vshll.u32 %v2365_v26, 23 }
 0x267   :  { %v709_v2 = vxor.u32 2147483648, %v4274_v36  ;;  %v2453_v42 = vadd.s32 536870912, %v2452_v44  ;;  %v934_v21 = vadd.s32 1, %v4001_v11  ;;  %v1028_v46 = vand.u32 2147483647, %v4881_v47 }
 0x268   :  { %v713_v48 = vsel %vm711_vm7, %v712_v56, %v4274_v36  ;;  %v2367_v3 = vor.u32 4788187, %v2366_v25  ;;  %v2381_v8 = vadd.s32 3, %v2377_v20  ;;  %v1031_v18 = vand.u32 2139095040, %v4881_v47 }
 0x269   :  { %v710_v13 = vsel %vm708_vm5, %v4272_v6, %v709_v2  ;;  %v2454_v54 = vshrl.u32 %v2453_v42, 30  ;;  %v932_v27 = vor.u32 8388608, %v931_v29  ;;  %vm935_vm8 = vcmp.gt.s32.totalorder %v934_v21, 0 }
 0x26a   :  { %v714_v31 = vsel %vm707_vm3, %v710_v13, %v713_v48  ;;  %v2368_v49 = vand.u32 2147483647, %v2367_v3  ;;  %v2370_v39 = vcvt.s32.f32 %v2363_v58  ;;  %v936_v17 = vsel %vm935_vm8, %v934_v21, 0 }
 0x26b   :  { %v715_v28 = vsel %vm704_vm4, nan, %v714_v31  ;;  %v2455_v51 = vshll.u32 %v2454_v54, 30  ;;  %v1032_v55 = vshrl.u32 %v1031_v18, 23  ;;  %v4985_v57 = vand.u32 8388607, %v1028_v46 }
 0x26c   :  { %2173 = vst [vmem:[#allocation2 + $0x8] sm:$0xff] %v715_v28  ;;  %v2371_v40 = vmul.f32 %v2370_v39, %v2368_v49  ;;  %v938_v61 = vand.u32 31, %v936_v17  ;;  %v4989_v43 = vadd.f32 %v4737_v52, %v4725_v4  ;;  %v4993_v5 = vadd.f32 %v4876_v37, %v4863_v0 }
 0x26d   :  { %v4995_v34 = vand.u32 3, %v2381_v8  ;;  %vm2394_vm9 = vcmp.lt.s32.totalorder %v4622_v9, 0  ;;  %v2448_v50 = vadd.s32 %v4920_v7, %v4946_v33  ;;  %v5000_v26 = vsub.s32 %v2452_v44, %v2455_v51 }
 0x26e   :  { %v2372_v38 = vxor.u32 2147483648, %v2371_v40  ;;  %v2478_v6 = vsub.s32 4, %v2454_v54  ;;  %v5002_v20 = vshrl.u32 %v936_v17, 5  ;;  %v939_v11 = vsub.s32 32, %v938_v61 }
 0x26f   :  { %v2458_v4 = vsub.s32 0, %v5000_v26  ;;  %v5005_v52 = vshll.u32 %v932_v27, 8  ;;  %v4005_v37 = vadd.s32 4294967169, %v1032_v55  ;;  %v1036_v29 = vor.u32 8388608, %v4985_v57 }
 0x270   :  { %v2373_v36 = vsel %vm2290_vm14, %v2372_v38, %v2371_v40  ;;  %v941_v56 = vshll.u32 %v7551_v35, %v938_v61  ;;  %v942_v7 = vshrl.u32 %v7543_v62, %v939_v11  ;;  %v945_v33 = vshrl.u32 %v7544_v1, %v939_v11 }
 0x271   :  { %v2376_v44 = vsel %vm4929_vm1, %v4608_v53, %v2373_v36  ;;  %v4054_v58 = vmin.u32 %v2458_v4, %v5000_v26  ;;  %v944_v25 = vshll.u32 %v7543_v62, %v938_v61  ;;  %v948_v2 = vshrl.u32 %v7545_v60, %v939_v11 }
 0x272   :  { %4275 = vcosq.f32 %v2376_v44  ;;  %v5021_v42 = vsel %vm2394_vm9, %v2478_v6, %v2454_v54  ;;  %v947_v21 = vshll.u32 %v7544_v1, %v938_v61  ;;  %vm956_vm10 = vcmp.lt.s32.totalorder %v5002_v20, 1 }
 0x273   :  { %4277 = vsinq.f32 %v2376_v44  ;;  %v2460_v48 = vclz %v4054_v58  ;;  %v943_v3 = vor.u32 %v942_v7, %v941_v56  ;;  %v946_v10 = vor.u32 %v945_v33, %v944_v25 }
 0x274   :  { %v940_v8 = vshrl.u32 %v7551_v35, %v939_v11  ;;  %v949_v18 = vor.u32 %v948_v2, %v947_v21  ;;  %v950_v13 = vshll.u32 %v7545_v60, %v938_v61  ;;  %v951_v27 = vshrl.u32 %v7546_v63, %v939_v11 }
 0x275   :  { %v7560_v31 = vand.u32 2147483647, %v4622_v9  ;;  %v4055_v49 = vadd.s32 4294967294, %v2460_v48  ;;  %v953_v39 = vshll.u32 %v7546_v63, %v938_v61  ;;  %v954_v17 = vshrl.u32 %v7552_v59, %v939_v11 }
 0x276   :  { %vm959_vm12 = vcmp.lt.s32.totalorder %v5002_v20, 4  ;;  %vm2387_vm13 = vcmp.eq.s32.totalorder %v4995_v34, 2  ;;  %v952_v28 = vor.u32 %v951_v27, %v950_v13  ;;  %vm957_vm14 = vcmp.lt.s32.totalorder %v5002_v20, 2 }
 0x277   :  { %vm5030_vm11 = vcmp.le.f32.partialorder %v7560_v31, 0.7853982  ;;  %vm958_vm15 = vcmp.lt.s32.totalorder %v5002_v20, 3  ;;  %v961_v51 = vsel %vm959_vm12, %v949_v18, 2102212464  ;;  %vm2384_vm0 = vcmp.eq.s32.totalorder %v4995_v34, 0 }
 0x278   :  { %vm4056_vm1 = vcmp.lt.s32.totalorder %v4055_v49, 0  ;;  %v955_v55 = vor.u32 %v954_v17, %v953_v39  ;;  %v960_v40 = vsel %vm956_vm10, %v940_v8, %v943_v3  ;;  %v964_v61 = vsel %vm956_vm10, %v943_v3, %v946_v10 }
 0x279   :  { %vm2383_vm2 = vcmp.lt.s32.totalorder %v4995_v34, 2  ;;  %v2463_v38 = vsel %vm4056_vm1, 0, %v4055_v49  ;;  %v962_v6 = vsel %vm958_vm15, %v946_v10, %v961_v51  ;;  %v965_v11 = vsel %vm959_vm12, %v952_v28, 920167782 }
 0x27a   :  { %v1038_v4 = vadd.s32 1, %v4005_v37  ;;  %vm2380_vm3 = vweird.f32 %v4608_v53  ;;  %v2464_v36 = vsub.s32 32, %v2463_v38  ;;  %v2468_v56 = vsub.s32 4294967266, %v2463_v38 }
 0x27b   :  { %v966_v7 = vsel %vm958_vm15, %v949_v18, %v965_v11  ;;  %v968_v33 = vsel %vm956_vm10, %v946_v10, %v949_v18  ;;  %v2465_v44 = vshll.u32 %v5000_v26, %v2463_v38  ;;  %v969_v25 = vsel %vm959_vm12, %v955_v55, 1326507024 }
 0x27c   :  { %v967_v58 = vsel %vm957_vm14, %v964_v61, %v966_v7  ;;  %vm1039_vm4 = vcmp.gt.s32.totalorder %v1038_v4, 0  ;;  %v2466_v37 = vshrl.u32 %v2448_v50, %v2464_v36  ;;  %v2469_v2 = vadd.s32 127, %v2468_v56  ;;  %v4276_v3 = vpop.eup %4275 }
 0x27d   :  { %v970_v21 = vsel %vm958_vm15, %v952_v28, %v969_v25  ;;  %v1040_v48 = vsel %vm1039_vm4, %v1038_v4, 0  ;;  %v963_v8 = vsel %vm957_vm14, %v960_v40, %v962_v6  ;;  %v4278_v13 = vpop.eup %4277  ;;  %v2388_v27 = vxor.u32 2147483648, %v4276_v3 }
 0x27e   :  { %v971_v26 = vsel %vm957_vm14, %v968_v33, %v970_v21  ;;  %v5069_v10 = vmul.u32.u64.low %v5005_v52, %v967_v58  ;;  %v5070_v18 = vmul.u32.u64.high %v5005_v52, %v967_v58, %v5069_v10  ;;  %v2467_v50 = vor.u32 %v2466_v37, %v2465_v44 }
 0x27f   :  { %v2470_v31 = vshll.u32 %v2469_v2, 23  ;;  %v1042_v49 = vand.u32 31, %v1040_v48  ;;  %v2385_v39 = vxor.u32 2147483648, %v4278_v13  ;;  %v2481_v17 = vsel %vm5030_vm11, 0, %v5021_v42 }
 0x280   :  { %v5077_v28 = vmul.u32.u64.low %v5005_v52, %v971_v26  ;;  %v5078_v51 = vmul.u32.u64.high %v5005_v52, %v971_v26, %v5077_v28  ;;  %v2389_v20 = vsel %vm2387_vm13, %v2388_v27, %v4278_v13  ;;  %v979_v40 = vmul.u32 %v5005_v52, %v963_v8 }
 0x281   :  { %v2471_v55 = vor.u32 4788187, %v2470_v31  ;;  %v1043_v61 = vsub.s32 32, %v1042_v49  ;;  %v2386_v38 = vsel %vm2384_vm0, %v4276_v3, %v2385_v39  ;;  %v2474_v6 = vcvt.s32.f32 %v2467_v50 }
 0x282   :  { %v982_v11 = vadd.s32 1, %v5070_v18  ;;  %v1041_v4 = vshrl.u32 %v1040_v48, 5  ;;  %v2390_v42 = vsel %vm2383_vm2, %v2386_v38, %v2389_v20  ;;  %v1045_v56 = vshll.u32 %v7551_v35, %v1042_v49 }
 0x283   :  { %v2472_v36 = vand.u32 2147483647, %v2471_v55  ;;  %v1046_v7 = vshrl.u32 %v7543_v62, %v1043_v61  ;;  %v2391_v33 = vsel %vm2380_vm3, nan, %v2390_v42  ;;  %vm981_vm5 = vc.u32 %v5078_v51, %v5069_v10 }
 0x284   :  { %v1048_v52 = vshll.u32 %v7543_v62, %v1042_v49  ;;  %v1049_v44 = vshrl.u32 %v7544_v1, %v1043_v61  ;;  %3953 = vst [vmem:[#allocation2 + $0x80] sm:$0xff] %v2391_v33  ;;  %v983_v34 = vsel %vm981_vm5, %v982_v11, %v5070_v18  ;;  %v1051_v37 = vshll.u32 %v7544_v1, %v1042_v49 }
 0x285   :  { %v2475_v58 = vmul.f32 %v2474_v6, %v2472_v36  ;;  %v1047_v25 = vor.u32 %v1046_v7, %v1045_v56  ;;  %v984_v2 = vadd.s32 %v983_v34, %v979_v40  ;;  %v1052_v48 = vshrl.u32 %v7545_v60, %v1043_v61 }
 0x286   :  { %v1050_v21 = vor.u32 %v1049_v44, %v1048_v52  ;;  %v1054_v53 = vshll.u32 %v7545_v60, %v1042_v49  ;;  %v1055_v8 = vshrl.u32 %v7546_v63, %v1043_v61  ;;  %v1057_v26 = vshll.u32 %v7546_v63, %v1042_v49 }
 0x287   :  { %v2476_v3 = vxor.u32 2147483648, %v2475_v58  ;;  %v1058_v13 = vshrl.u32 %v7552_v59, %v1043_v61  ;;  %v2485_v27 = vadd.s32 3, %v2481_v17  ;;  %v985_v50 = vadd.s32 536870912, %v984_v2 }
 0x288   :  { %v1053_v31 = vor.u32 %v1052_v48, %v1051_v37  ;;  %vm1060_vm6 = vcmp.lt.s32.totalorder %v1041_v4, 1  ;;  %v1044_v39 = vshrl.u32 %v7551_v35, %v1043_v61  ;;  %v1056_v28 = vor.u32 %v1055_v8, %v1054_v53 }
 0x289   :  { %v2477_v18 = vsel %vm2394_vm9, %v2476_v3, %v2475_v58  ;;  %v1059_v20 = vor.u32 %v1058_v13, %v1057_v26  ;;  %v986_v40 = vshrl.u32 %v985_v50, 30  ;;  %vm1061_vm7 = vcmp.lt.s32.totalorder %v1041_v4, 2 }
 0x28a   :  { %v2480_v55 = vsel %vm5030_vm11, %v4622_v9, %v2477_v18  ;;  %vm1063_vm8 = vcmp.lt.s32.totalorder %v1041_v4, 4  ;;  %v1068_v17 = vsel %vm1060_vm6, %v1047_v25, %v1050_v21  ;;  %vm1062_vm10 = vcmp.lt.s32.totalorder %v1041_v4, 3 }
 0x28b   :  { %4279 = vcosq.f32 %v2480_v55  ;;  %v1065_v49 = vsel %vm1063_vm8, %v1053_v31, 2102212464  ;;  %v1069_v38 = vsel %vm1063_vm8, %v1056_v28, 920167782  ;;  %v987_v6 = vshll.u32 %v986_v40, 30 }
 0x28c   :  { %4281 = vsinq.f32 %v2480_v55  ;;  %v1064_v11 = vsel %vm1060_vm6, %v1044_v39, %v1047_v25  ;;  %v1070_v61 = vsel %vm1062_vm10, %v1053_v31, %v1069_v38  ;;  %v1072_v42 = vsel %vm1060_vm6, %v1050_v21, %v1053_v31 }
 0x28d   :  { %v1073_v36 = vsel %vm1063_vm8, %v1059_v20, 1326507024  ;;  %v1076_v54 = vshll.u32 %v1036_v29, 8  ;;  %v5114_v56 = vsub.s32 %v984_v2, %v987_v6  ;;  %v1066_v7 = vsel %vm1062_vm10, %v1050_v21, %v1065_v49 }
 0x28e   :  { %v1071_v33 = vsel %vm1061_vm7, %v1068_v17, %v1070_v61  ;;  %v1074_v52 = vsel %vm1062_vm10, %v1056_v28, %v1073_v36  ;;  %v1010_v44 = vsub.s32 4, %v986_v40  ;;  %v2486_v25 = vand.u32 3, %v2485_v27 }
 0x28f   :  { %v1075_v58 = vsel %vm1061_vm7, %v1072_v42, %v1074_v52  ;;  %v5118_v34 = vmul.u32.u64.low %v1076_v54, %v1071_v33  ;;  %v5119_v37 = vmul.u32.u64.high %v1076_v54, %v1071_v33, %v5118_v34  ;;  %v990_v48 = vsub.s32 0, %v5114_v56 }
 0x290   :  { %v5123_v53 = vmul.u32.u64.low %v1076_v54, %v1075_v58  ;;  %v5124_v3 = vmul.u32.u64.high %v1076_v54, %v1075_v58, %v5123_v53  ;;  %v5128_v57 = vadd.f32 %v4989_v43, %v4863_v0  ;;  %vm926_vm9 = vcmp.lt.s32.totalorder %v4872_v12, 0 }
 0x291   :  { %v4002_v29 = vmin.u32 %v990_v48, %v5114_v56  ;;  %v1067_v2 = vsel %vm1061_vm7, %v1064_v11, %v1066_v7  ;;  %v2707_v21 = vand.u32 2139095040, %v4993_v5  ;;  %vm2484_vm11 = vweird.f32 %v4622_v9 }
 0x292   :  { %v1011_v8 = vsel %vm926_vm9, %v1010_v44, %v986_v40  ;;  %v1086_v26 = vadd.s32 1, %v5119_v37  ;;  %v2704_v13 = vand.u32 2147483647, %v4993_v5  ;;  %vm2487_vm12 = vcmp.lt.s32.totalorder %v2486_v25, 2 }
 0x293   :  { %vm2488_vm13 = vcmp.eq.s32.totalorder %v2486_v25, 0  ;;  %vm5141_vm14 = vcmp.le.f32.partialorder %v924_v19, 0.7853982  ;;  %v992_v43 = vclz %v4002_v29  ;;  %vm2491_vm15 = vcmp.eq.s32.totalorder %v2486_v25, 2 }
 0x294   :  { %v1083_v27 = vmul.u32 %v1076_v54, %v1067_v2  ;;  %vm1085_vm0 = vc.u32 %v5124_v3, %v5118_v34  ;;  %v2708_v50 = vshrl.u32 %v2707_v21, 23  ;;  %v1013_v28 = vsel %vm5141_vm14, 0, %v1011_v8 }
 0x295   :  { %v4280_v4 = vpop.eup %4279  ;;  %v4003_v39 = vadd.s32 4294967294, %v992_v43  ;;  %v1087_v20 = vsel %vm1085_vm0, %v1086_v26, %v5119_v37  ;;  %v2711_v49 = vand.u32 8388607, %v2704_v13  ;;  %v980_v38 = vadd.s32 %v5069_v10, %v5078_v51 }
 0x296   :  { %v4282_v31 = vpop.eup %4281  ;;  %v2492_v18 = vxor.u32 2147483648, %v4280_v4  ;;  %v1088_v55 = vadd.s32 %v1087_v20, %v1083_v27  ;;  %v4065_v40 = vadd.s32 4294967169, %v2708_v50  ;;  %v2811_v6 = vand.u32 2139095040, %v5128_v57 }
 0x297   :  { %v2489_v19 = vxor.u32 2147483648, %v4282_v31  ;;  %vm4004_vm1 = vcmp.lt.s32.totalorder %v4003_v39, 0  ;;  %v1017_v52 = vadd.s32 3, %v1013_v28  ;;  %v2712_v37 = vor.u32 8388608, %v2711_v49 }
 0x298   :  { %v2493_v17 = vsel %vm2491_vm15, %v2492_v18, %v4282_v31  ;;  %v995_v61 = vsel %vm4004_vm1, 0, %v4003_v39  ;;  %v1089_v42 = vadd.s32 536870912, %v1088_v55  ;;  %v2714_v36 = vadd.s32 1, %v4065_v40 }
 0x299   :  { %v2490_v11 = vsel %vm2488_vm13, %v4280_v4, %v2489_v19  ;;  %v996_v7 = vsub.s32 32, %v995_v61  ;;  %v1000_v33 = vsub.s32 4294967266, %v995_v61  ;;  %v997_v10 = vshll.u32 %v5114_v56, %v995_v61 }
 0x29a   :  { %v2494_v54 = vsel %vm2487_vm12, %v2490_v11, %v2493_v17  ;;  %v1090_v58 = vshrl.u32 %v1089_v42, 30  ;;  %vm2715_vm2 = vcmp.gt.s32.totalorder %v2714_v36, 0  ;;  %v2812_v25 = vshrl.u32 %v2811_v6, 23 }
 0x29b   :  { %v2495_v44 = vsel %vm2484_vm11, nan, %v2494_v54  ;;  %v998_v51 = vshrl.u32 %v980_v38, %v996_v7  ;;  %v1001_v48 = vadd.s32 127, %v1000_v33  ;;  %v2716_v53 = vsel %vm2715_vm2, %v2714_v36, 0 }
 0x29c   :  { %3954 = vst [vmem:[#allocation2 + $0x88] sm:$0xff] %v2495_v44  ;;  %v1091_v29 = vshll.u32 %v1090_v58, 30  ;;  %v1114_v2 = vsub.s32 4, %v1090_v58  ;;  %v2718_v21 = vand.u32 31, %v2716_v53  ;;  %vm5162_vm3 = vcmp.le.f32.partialorder %v1028_v46, 0.7853982 }
 0x29d   :  { %v999_v8 = vor.u32 %v998_v51, %v997_v10  ;;  %v1002_v26 = vshll.u32 %v1001_v48, 23  ;;  %vm1030_vm4 = vcmp.lt.s32.totalorder %v4881_v47, 0  ;;  %v5167_v43 = vand.u32 3, %v1017_v52 }
 0x29e   :  { %v1084_v56 = vadd.s32 %v5118_v34, %v5124_v3  ;;  %v1092_v4 = vsub.s32 %v1088_v55, %v1091_v29  ;;  %v2719_v27 = vsub.s32 32, %v2718_v21  ;;  %v2717_v31 = vshrl.u32 %v2716_v53, 5 }
 0x29f   :  { %v1003_v50 = vor.u32 4788187, %v1002_v26  ;;  %v5171_v18 = vshll.u32 %v2712_v37, 8  ;;  %v2808_v39 = vand.u32 2147483647, %v5128_v57  ;;  %v5176_v46 = vsel %vm1030_vm4, %v1114_v2, %v1090_v58 }
 0x2a0   :  { %v1094_v28 = vsub.s32 0, %v1092_v4  ;;  %v2722_v20 = vshrl.u32 %v7543_v62, %v2719_v27  ;;  %v4069_v19 = vadd.s32 4294967169, %v2812_v25  ;;  %v1006_v49 = vcvt.s32.f32 %v999_v8 }
 0x2a1   :  { %v1004_v40 = vand.u32 2147483647, %v1003_v50  ;;  %v2725_v34 = vshrl.u32 %v7544_v1, %v2719_v27  ;;  %v2728_v3 = vshrl.u32 %v7545_v60, %v2719_v27  ;;  %v2721_v17 = vshll.u32 %v7551_v35, %v2718_v21 }
 0x2a2   :  { %v4006_v55 = vmin.u32 %v1094_v28, %v1092_v4  ;;  %v2724_v38 = vshll.u32 %v7543_v62, %v2718_v21  ;;  %v2727_v6 = vshll.u32 %v7544_v1, %v2718_v21  ;;  %v1117_v61 = vsel %vm5162_vm3, 0, %v5176_v46 }
 0x2a3   :  { %v1007_v11 = vmul.f32 %v1006_v49, %v1004_v40  ;;  %v2730_v42 = vshll.u32 %v7545_v60, %v2718_v21  ;;  %v2731_v36 = vshrl.u32 %v7546_v63, %v2719_v27  ;;  %v2723_v7 = vor.u32 %v2722_v20, %v2721_v17 }
 0x2a4   :  { %v1096_v54 = vclz %v4006_v55  ;;  %v2726_v33 = vor.u32 %v2725_v34, %v2724_v38  ;;  %v2729_v52 = vor.u32 %v2728_v3, %v2727_v6  ;;  %v2733_v37 = vshll.u32 %v7546_v63, %v2718_v21 }
 0x2a5   :  { %v1008_v44 = vxor.u32 2147483648, %v1007_v11  ;;  %v2732_v58 = vor.u32 %v2731_v36, %v2730_v42  ;;  %v2734_v10 = vshrl.u32 %v7552_v59, %v2719_v27  ;;  %v2720_v48 = vshrl.u32 %v7551_v35, %v2719_v27 }
 0x2a6   :  { %v4007_v51 = vadd.s32 4294967294, %v1096_v54  ;;  %vm2736_vm5 = vcmp.lt.s32.totalorder %v2717_v31, 1  ;;  %vm2737_vm6 = vcmp.lt.s32.totalorder %v2717_v31, 2  ;;  %vm2738_vm7 = vcmp.lt.s32.totalorder %v2717_v31, 3 }
 0x2a7   :  { %v1009_v53 = vsel %vm926_vm9, %v1008_v44, %v1007_v11  ;;  %v2735_v29 = vor.u32 %v2734_v10, %v2733_v37  ;;  %vm2739_vm8 = vcmp.lt.s32.totalorder %v2717_v31, 4  ;;  %v2740_v21 = vsel %vm2736_vm5, %v2720_v48, %v2723_v7 }
 0x2a8   :  { %v1012_v2 = vsel %vm5141_vm14, %v4872_v12, %v1009_v53  ;;  %vm4008_vm10 = vcmp.lt.s32.totalorder %v4007_v51, 0  ;;  %v2741_v25 = vsel %vm2739_vm8, %v2729_v52, 2102212464  ;;  %v2744_v26 = vsel %vm2736_vm5, %v2723_v7, %v2726_v33 }
 0x2a9   :  { %4283 = vcosq.f32 %v1012_v2  ;;  %v1099_v8 = vsel %vm4008_vm10, 0, %v4007_v51  ;;  %v2745_v27 = vsel %vm2739_vm8, %v2732_v58, 920167782  ;;  %v2742_v46 = vsel %vm2738_vm7, %v2726_v33, %v2741_v25 }
 0x2aa   :  { %4285 = vsinq.f32 %v1012_v2  ;;  %v1100_v50 = vsub.s32 32, %v1099_v8  ;;  %v1104_v28 = vsub.s32 4294967266, %v1099_v8  ;;  %v1101_v20 = vshll.u32 %v1092_v4, %v1099_v8 }
 0x2ab   :  { %v2746_v0 = vsel %vm2738_vm7, %v2729_v52, %v2745_v27  ;;  %v2748_v40 = vsel %vm2736_vm5, %v2726_v33, %v2729_v52  ;;  %v2749_v49 = vsel %vm2739_vm8, %v2735_v29, 1326507024  ;;  %v2743_v38 = vsel %vm2737_vm6, %v2740_v21, %v2742_v46 }
 0x2ac   :  { %v1102_v34 = vshrl.u32 %v1084_v56, %v1100_v50  ;;  %v1105_v3 = vadd.s32 127, %v1104_v28  ;;  %v2747_v55 = vsel %vm2737_vm6, %v2744_v26, %v2746_v0  ;;  %v2750_v17 = vsel %vm2738_vm7, %v2732_v58, %v2749_v49 }
 0x2ad   :  { %v2751_v6 = vsel %vm2737_vm6, %v2748_v40, %v2750_v17  ;;  %v5210_v11 = vmul.u32.u64.low %v5171_v18, %v2747_v55  ;;  %v5211_v42 = vmul.u32.u64.high %v5171_v18, %v2747_v55, %v5210_v11  ;;  %v5220_v56 = vmul.f32 %v4549_v45, %v4575_v14 }
 0x2ae   :  { %v1103_v4 = vor.u32 %v1102_v34, %v1101_v20  ;;  %v1106_v36 = vshll.u32 %v1105_v3, 23  ;;  %v5215_v54 = vmul.u32.u64.low %v5171_v18, %v2751_v6  ;;  %v5216_v7 = vmul.u32.u64.high %v5171_v18, %v2751_v6, %v5215_v54 }
 0x2af   :  { %v5224_v33 = vmul.f32 %v4549_v45, %v4577_v15  ;;  %v2818_v31 = vadd.s32 1, %v4069_v19  ;;  %vm1016_vm9 = vweird.f32 %v4872_v12  ;;  %vm1019_vm11 = vcmp.lt.s32.totalorder %v5167_v43, 2 }
 0x2b0   :  { %v1107_v52 = vor.u32 4788187, %v1106_v36  ;;  %v2815_v44 = vand.u32 8388607, %v2808_v39  ;;  %v1121_v58 = vadd.s32 3, %v1117_v61  ;;  %v2759_v37 = vmul.u32 %v5171_v18, %v2743_v38 }
 0x2b1   :  { %v2762_v10 = vadd.s32 1, %v5211_v42  ;;  %vm2819_vm12 = vcmp.gt.s32.totalorder %v2818_v31, 0  ;;  %v1110_v48 = vcvt.s32.f32 %v1103_v4  ;;  %vm2761_vm13 = vc.u32 %v5216_v7, %v5210_v11 }
 0x2b2   :  { %v1108_v51 = vand.u32 2147483647, %v1107_v52  ;;  %v2820_v19 = vsel %vm2819_vm12, %v2818_v31, 0  ;;  %vm1020_vm14 = vcmp.eq.s32.totalorder %v5167_v43, 0  ;;  %vm1023_vm15 = vcmp.eq.s32.totalorder %v5167_v43, 2 }
 0x2b3   :  { %v4284_v53 = vpop.eup %4283  ;;  %v2763_v29 = vsel %vm2761_vm13, %v2762_v10, %v5211_v42  ;;  %v2822_v2 = vand.u32 31, %v2820_v19  ;;  %v2816_v8 = vor.u32 8388608, %v2815_v44  ;;  %v5237_v27 = vand.u32 3, %v1121_v58 }
 0x2b4   :  { %v4286_v61 = vpop.eup %4285  ;;  %v1024_v21 = vxor.u32 2147483648, %v4284_v53  ;;  %v1111_v18 = vmul.f32 %v1110_v48, %v1108_v51  ;;  %v2764_v25 = vadd.s32 %v2763_v29, %v2759_v37  ;;  %v430_v28 = vmul.f32 %v4543_v41, %v4581_v22 }
 0x2b5   :  { %v1021_v26 = vxor.u32 2147483648, %v4286_v61  ;;  %v2823_v50 = vsub.s32 32, %v2822_v2  ;;  %v2825_v40 = vshll.u32 %v7551_v35, %v2822_v2  ;;  %v2828_v3 = vshll.u32 %v7543_v62, %v2822_v2 }
 0x2b6   :  { %v1025_v46 = vsel %vm1023_vm15, %v1024_v21, %v4286_v61  ;;  %v1112_v20 = vxor.u32 2147483648, %v1111_v18  ;;  %v2765_v0 = vadd.s32 536870912, %v2764_v25  ;;  %v2821_v54 = vshrl.u32 %v2820_v19, 5 }
 0x2b7   :  { %v1022_v49 = vsel %vm1020_vm14, %v4284_v53, %v1021_v26  ;;  %v2826_v34 = vshrl.u32 %v7543_v62, %v2823_v50  ;;  %v2829_v55 = vshrl.u32 %v7544_v1, %v2823_v50  ;;  %v2832_v42 = vshrl.u32 %v7545_v60, %v2823_v50 }
 0x2b8   :  { %v1026_v17 = vsel %vm1019_vm11, %v1022_v49, %v1025_v46  ;;  %v1113_v38 = vsel %vm1030_vm4, %v1112_v20, %v1111_v18  ;;  %v5251_v6 = vshrl.u32 %v2765_v0, 30  ;;  %v2831_v31 = vshll.u32 %v7544_v1, %v2822_v2 }
 0x2b9   :  { %v1027_v4 = vsel %vm1016_vm9, nan, %v1026_v17  ;;  %v1116_v36 = vsel %vm5162_vm3, %v4881_v47, %v1113_v38  ;;  %v2827_v52 = vor.u32 %v2826_v34, %v2825_v40  ;;  %v2830_v44 = vor.u32 %v2829_v55, %v2828_v3  ;;  %v5284_v40 = vpop.permute.xlu0 %465 }
 0x2ba   :  { %4287 = vcosq.f32 %v1116_v36  ;;  %2176 = vst [vmem:[#allocation2 + $0x20] sm:$0xff] %v1027_v4  ;;  %v2767_v43 = vshll.u32 %v5251_v6, 30  ;;  %v2833_v58 = vor.u32 %v2832_v42, %v2831_v31  ;;  %v2834_v37 = vshll.u32 %v7545_v60, %v2822_v2 }
 0x2bb   :  { %4289 = vsinq.f32 %v1116_v36  ;;  %v2835_v12 = vshrl.u32 %v7546_v63, %v2823_v50  ;;  %v2837_v9 = vshll.u32 %v7546_v63, %v2822_v2  ;;  %v2838_v51 = vshrl.u32 %v7552_v59, %v2823_v50 }
 0x2bc   :  { %v5263_v10 = vsub.s32 %v2764_v25, %v2767_v43  ;;  %v5267_v48 = vshll.u32 %v2816_v8, 8  ;;  %vm2706_vm0 = vcmp.lt.s32.totalorder %v4993_v5, 0  ;;  %v2824_v19 = vshrl.u32 %v7551_v35, %v2823_v50 }
 0x2bd   :  { %v2836_v53 = vor.u32 %v2835_v12, %v2834_v37  ;;  %vm2840_vm1 = vcmp.lt.s32.totalorder %v2821_v54, 1  ;;  %v446_v29 = vadd.f32 %v430_v28, %v5220_v56  ;;  %v2839_v21 = vor.u32 %v2838_v51, %v2837_v9 }
 0x2be   :  { %v2770_v61 = vsub.s32 0, %v5263_v10  ;;  %vm2841_vm2 = vcmp.lt.s32.totalorder %v2821_v54, 2  ;;  %vm2843_vm3 = vcmp.lt.s32.totalorder %v2821_v54, 4  ;;  %vm2842_vm4 = vcmp.lt.s32.totalorder %v2821_v54, 3 }
 0x2bf   :  { %v2845_v18 = vsel %vm2843_vm3, %v2833_v58, 2102212464  ;;  %v2848_v2 = vsel %vm2840_vm1, %v2827_v52, %v2830_v44  ;;  %v2849_v25 = vsel %vm2843_vm3, %v2836_v53, 920167782  ;;  %vm1123_vm5 = vcmp.lt.s32.totalorder %v5237_v27, 2 }
 0x2c0   :  { %v4066_v8 = vmin.u32 %v2770_v61, %v5263_v10  ;;  %v2844_v26 = vsel %vm2840_vm1, %v2824_v19, %v2827_v52  ;;  %v2846_v50 = vsel %vm2842_vm4, %v2830_v44, %v2845_v18  ;;  %v2850_v56 = vsel %vm2842_vm4, %v2833_v58, %v2849_v25 }
 0x2c1   :  { %vm1120_vm6 = vweird.f32 %v4881_v47  ;;  %v2851_v28 = vsel %vm2841_vm2, %v2848_v2, %v2850_v56  ;;  %v2852_v46 = vsel %vm2840_vm1, %v2830_v44, %v2833_v58  ;;  %v2853_v20 = vsel %vm2843_vm3, %v2839_v21, 1326507024 }
 0x2c2   :  { %v431_v0 = vmul.f32 %v4543_v41, %v4583_v23  ;;  %vm1124_vm7 = vcmp.eq.s32.totalorder %v5237_v27, 0  ;;  %vm1127_vm8 = vcmp.eq.s32.totalorder %v5237_v27, 2  ;;  %v2772_v49 = vclz %v4066_v8 }
 0x2c3   :  { %v2790_v34 = vsub.s32 4, %v5251_v6  ;;  %v2847_v3 = vsel %vm2841_vm2, %v2844_v26, %v2846_v50  ;;  %v2854_v55 = vsel %vm2842_vm4, %v2836_v53, %v2853_v20  ;;  %v2760_v4 = vadd.s32 %v5210_v11, %v5216_v7 }
 0x2c4   :  { %v5292_v17 = vmul.u32.u64.low %v5267_v48, %v2851_v28  ;;  %v5293_v38 = vmul.u32.u64.high %v5267_v48, %v2851_v28, %v5292_v17  ;;  %v4288_v42 = vpop.eup %4287  ;;  %v4067_v36 = vadd.s32 4294967294, %v2772_v49  ;;  %v2855_v31 = vsel %vm2841_vm2, %v2852_v46, %v2854_v55 }
 0x2c5   :  { %v5300_v43 = vadd.f32 %v5284_v40, %v446_v29  ;;  %v4290_v52 = vpop.eup %4289  ;;  %v1128_v44 = vxor.u32 2147483648, %v4288_v42  ;;  %v5303_v58 = vmul.u32.u64.low %v5267_v48, %v2855_v31  ;;  %v5304_v37 = vmul.u32.u64.high %v5267_v48, %v2855_v31, %v5303_v58 }
 0x2c6   :  { %v447_v12 = vadd.f32 %v431_v0, %v5224_v33  ;;  %v1125_v9 = vxor.u32 2147483648, %v4290_v52  ;;  %vm4068_vm10 = vcmp.lt.s32.totalorder %v4067_v36, 0  ;;  %v2791_v11 = vsel %vm2706_vm0, %v2790_v34, %v5251_v6 }
 0x2c7   :  { %v2863_v7 = vmul.u32 %v5267_v48, %v2847_v3  ;;  %v1129_v54 = vsel %vm1127_vm8, %v1128_v44, %v4290_v52  ;;  %v2775_v51 = vsel %vm4068_vm10, 0, %v4067_v36  ;;  %v2866_v19 = vadd.s32 1, %v5293_v38 }
 0x2c8   :  { %v719_v53 = vand.u32 2139095040, %v5300_v43  ;;  %v1126_v29 = vsel %vm1124_vm7, %v4288_v42, %v1125_v9  ;;  %v2776_v33 = vsub.s32 32, %v2775_v51  ;;  %v2780_v61 = vsub.s32 4294967266, %v2775_v51 }
 0x2c9   :  { %v716_v21 = vand.u32 2147483647, %v5300_v43  ;;  %v1130_v6 = vsel %vm1123_vm5, %v1126_v29, %v1129_v54  ;;  %v2777_v48 = vshll.u32 %v5263_v10, %v2775_v51  ;;  %vm2865_vm9 = vc.u32 %v5304_v37, %v5292_v17 }
 0x2ca   :  { %v5324_v18 = vadd.f32 %v5284_v40, %v447_v12  ;;  %v1131_v2 = vsel %vm1120_vm6, nan, %v1130_v6  ;;  %v2778_v25 = vshrl.u32 %v2760_v4, %v2776_v33  ;;  %v2781_v8 = vadd.s32 127, %v2780_v61 }
 0x2cb   :  { %v2867_v26 = vsel %vm2865_vm9, %v2866_v19, %v5293_v38  ;;  %2177 = vst [vmem:[#allocation2 + $0x28] sm:$0xff] %v1131_v2  ;;  %vm5331_vm11 = vcmp.le.f32.partialorder %v2704_v13, 0.7853982  ;;  %v720_v50 = vshrl.u32 %v719_v53, 23  ;;  %v723_v47 = vand.u32 8388607, %v716_v21 }
 0x2cc   :  { %v2868_v10 = vadd.s32 %v2867_v26, %v2863_v7  ;;  %v2779_v56 = vor.u32 %v2778_v25, %v2777_v48  ;;  %v2782_v28 = vshll.u32 %v2781_v8, 23  ;;  %v2793_v46 = vsel %vm5331_vm11, 0, %v2791_v11 }
 0x2cd   :  { %v3993_v0 = vadd.s32 4294967169, %v720_v50  ;;  %v820_v49 = vand.u32 2147483647, %v5324_v18  ;;  %v823_v34 = vand.u32 2139095040, %v5324_v18  ;;  %v2242_v3 = vmul.f32 %v4585_v24, %v4543_v41 }
 0x2ce   :  { %v2869_v20 = vadd.s32 536870912, %v2868_v10  ;;  %v2783_v13 = vor.u32 4788187, %v2782_v28  ;;  %v2208_v55 = vmul.f32 %v4579_v16, %v4549_v45  ;;  %v2797_v38 = vadd.s32 3, %v2793_v46 }
 0x2cf   :  { %v726_v4 = vadd.s32 1, %v3993_v0  ;;  %v2786_v31 = vcvt.s32.f32 %v2779_v56  ;;  %v2243_v52 = vmul.f32 %v4595_v30, %v4543_v41  ;;  %v724_v44 = vor.u32 8388608, %v723_v47 }
 0x2d0   :  { %v5345_v42 = vshrl.u32 %v2869_v20, 30  ;;  %v2784_v36 = vand.u32 2147483647, %v2783_v13  ;;  %v824_v12 = vshrl.u32 %v823_v34, 23  ;;  %v5352_v9 = vand.u32 8388607, %v820_v49 }
 0x2d1   :  { %vm727_vm12 = vcmp.gt.s32.totalorder %v726_v4, 0  ;;  %v2209_v11 = vmul.f32 %v4598_v32, %v4549_v45  ;;  %v2258_v54 = vadd.f32 %v2242_v3, %v2208_v55  ;;  %v5356_v19 = vand.u32 3, %v2797_v38 }
 0x2d2   :  { %v2871_v58 = vshll.u32 %v5345_v42, 30  ;;  %v2787_v7 = vmul.f32 %v2786_v31, %v2784_v36  ;;  %v728_v51 = vsel %vm727_vm12, %v726_v4, 0  ;;  %v2864_v33 = vadd.s32 %v5292_v17, %v5304_v37 }
 0x2d3   :  { %v730_v41 = vand.u32 31, %v728_v51  ;;  %v5362_v61 = vadd.f32 %v2243_v52, %v2209_v11  ;;  %v5364_v6 = vshll.u32 %v724_v44, 8  ;;  %v3997_v45 = vadd.s32 4294967169, %v824_v12 }
 0x2d4   :  { %v5358_v53 = vsub.s32 %v2868_v10, %v2871_v58  ;;  %v2788_v29 = vxor.u32 2147483648, %v2787_v7  ;;  %v828_v25 = vor.u32 8388608, %v5352_v9  ;;  %v5370_v26 = vshrl.u32 %v728_v51, 5 }
 0x2d5   :  { %v731_v2 = vsub.s32 32, %v730_v41  ;;  %v733_v10 = vshll.u32 %v7551_v35, %v730_v41  ;;  %v5374_v50 = vadd.f32 %v2258_v54, %v5284_v40  ;;  %v736_v56 = vshll.u32 %v7543_v62, %v730_v41 }
 0x2d6   :  { %v2874_v48 = vsub.s32 0, %v5358_v53  ;;  %v2789_v8 = vsel %vm2706_vm0, %v2788_v29, %v2787_v7  ;;  %v739_v28 = vshll.u32 %v7544_v1, %v730_v41  ;;  %vm2810_vm13 = vcmp.lt.s32.totalorder %v5128_v57, 0 }
 0x2d7   :  { %v2792_v17 = vsel %vm5331_vm11, %v4993_v5, %v2789_v8  ;;  %v734_v46 = vshrl.u32 %v7543_v62, %v731_v2  ;;  %v737_v47 = vshrl.u32 %v7544_v1, %v731_v2  ;;  %v740_v20 = vshrl.u32 %v7545_v60, %v731_v2 }
 0x2d8   :  { %v4070_v37 = vmin.u32 %v2874_v48, %v5358_v53  ;;  %4291 = vcosq.f32 %v2792_v17  ;;  %v2894_v27 = vsub.s32 4, %v5345_v42  ;;  %v830_v34 = vadd.s32 1, %v3997_v45 }
 0x2d9   :  { %4293 = vsinq.f32 %v2792_v17  ;;  %v735_v13 = vor.u32 %v734_v46, %v733_v10  ;;  %v738_v3 = vor.u32 %v737_v47, %v736_v56  ;;  %v741_v55 = vor.u32 %v740_v20, %v739_v28 }
 0x2da   :  { %v2876_v0 = vclz %v4070_v37  ;;  %v742_v38 = vshll.u32 %v7545_v60, %v730_v41  ;;  %v743_v36 = vshrl.u32 %v7546_v63, %v731_v2  ;;  %v745_v31 = vshll.u32 %v7546_v63, %v730_v41 }
 0x2db   :  { %v746_v52 = vshrl.u32 %v7552_v59, %v731_v2  ;;  %vm2803_vm14 = vcmp.eq.s32.totalorder %v5356_v19, 2  ;;  %vm5394_vm15 = vcmp.le.f32.partialorder %v2808_v39, 0.7853982  ;;  %v732_v58 = vshrl.u32 %v7551_v35, %v731_v2 }
 0x2dc   :  { %v4071_v4 = vadd.s32 4294967294, %v2876_v0  ;;  %vm748_vm0 = vcmp.lt.s32.totalorder %v5370_v26, 1  ;;  %vm749_vm1 = vcmp.lt.s32.totalorder %v5370_v26, 2  ;;  %vm750_vm2 = vcmp.lt.s32.totalorder %v5370_v26, 3 }
 0x2dd   :  { %vm2800_vm3 = vcmp.eq.s32.totalorder %v5356_v19, 0  ;;  %v744_v12 = vor.u32 %v743_v36, %v742_v38  ;;  %v747_v11 = vor.u32 %v746_v52, %v745_v31  ;;  %vm751_vm5 = vcmp.lt.s32.totalorder %v5370_v26, 4 }
 0x2de   :  { %vm4072_vm4 = vcmp.lt.s32.totalorder %v4071_v4, 0  ;;  %vm2799_vm6 = vcmp.lt.s32.totalorder %v5356_v19, 2  ;;  %v752_v7 = vsel %vm748_vm0, %v732_v58, %v735_v13  ;;  %v753_v54 = vsel %vm751_vm5, %v741_v55, 2102212464 }
 0x2df   :  { %v2879_v39 = vsel %vm4072_vm4, 0, %v4071_v4  ;;  %v756_v51 = vsel %vm748_vm0, %v735_v13, %v738_v3  ;;  %vm2796_vm7 = vweird.f32 %v4993_v5  ;;  %v754_v48 = vsel %vm750_vm2, %v738_v3, %v753_v54 }
 0x2e0   :  { %v2880_v41 = vsub.s32 32, %v2879_v39  ;;  %v2884_v29 = vsub.s32 4294967266, %v2879_v39  ;;  %v760_v2 = vsel %vm748_vm0, %v738_v3, %v741_v55  ;;  %v2881_v45 = vshll.u32 %v5358_v53, %v2879_v39 }
 0x2e1   :  { %v757_v8 = vsel %vm751_vm5, %v744_v12, 920167782  ;;  %v761_v10 = vsel %vm751_vm5, %v747_v11, 1326507024  ;;  %vm831_vm8 = vcmp.gt.s32.totalorder %v830_v34, 0  ;;  %v2895_v47 = vsel %vm2810_vm13, %v2894_v27, %v5345_v42 }
 0x2e2   :  { %v2882_v17 = vshrl.u32 %v2864_v33, %v2880_v41  ;;  %v2885_v37 = vadd.s32 127, %v2884_v29  ;;  %v758_v56 = vsel %vm750_vm2, %v741_v55, %v757_v8  ;;  %v762_v28 = vsel %vm750_vm2, %v744_v12, %v761_v10  ;;  %v4292_v46 = vpop.eup %4291 }
 0x2e3   :  { %v755_v20 = vsel %vm749_vm1, %v752_v7, %v754_v48  ;;  %v763_v53 = vsel %vm749_vm1, %v760_v2, %v762_v28  ;;  %v832_v0 = vsel %vm831_vm8, %v830_v34, 0  ;;  %v4294_v33 = vpop.eup %4293  ;;  %v2804_v13 = vxor.u32 2147483648, %v4292_v46 }
 0x2e4   :  { %v2883_v3 = vor.u32 %v2882_v17, %v2881_v45  ;;  %v2886_v38 = vshll.u32 %v2885_v37, 23  ;;  %v759_v55 = vsel %vm749_vm1, %v756_v51, %v758_v56  ;;  %v2801_v4 = vxor.u32 2147483648, %v4294_v33 }
 0x2e5   :  { %v5429_v36 = vmul.u32.u64.low %v5364_v6, %v763_v53  ;;  %v5430_v31 = vmul.u32.u64.high %v5364_v6, %v763_v53, %v5429_v36  ;;  %v834_v42 = vand.u32 31, %v832_v0  ;;  %v2805_v27 = vsel %vm2803_vm14, %v2804_v13, %v4294_v33 }
 0x2e6   :  { %v2887_v52 = vor.u32 4788187, %v2886_v38  ;;  %v2897_v34 = vsel %vm5394_vm15, 0, %v2895_v47  ;;  %v771_v58 = vmul.u32 %v5364_v6, %v755_v20  ;;  %v2802_v12 = vsel %vm2800_vm3, %v4292_v46, %v2801_v4 }
 0x2e7   :  { %v5440_v26 = vmul.u32.u64.low %v5364_v6, %v759_v55  ;;  %v5441_v11 = vmul.u32.u64.high %v5364_v6, %v759_v55, %v5440_v26  ;;  %v835_v39 = vsub.s32 32, %v834_v42  ;;  %v2806_v7 = vsel %vm2799_vm6, %v2802_v12, %v2805_v27 }
 0x2e8   :  { %v2888_v54 = vand.u32 2147483647, %v2887_v52  ;;  %v2890_v51 = vcvt.s32.f32 %v2883_v3  ;;  %v833_v41 = vshrl.u32 %v832_v0, 5  ;;  %v2807_v29 = vsel %vm2796_vm7, nan, %v2806_v7 }
 0x2e9   :  { %vm773_vm10 = vc.u32 %v5430_v31, %v5440_v26  ;;  %v837_v48 = vshll.u32 %v7551_v35, %v834_v42  ;;  %v840_v2 = vshll.u32 %v7543_v62, %v834_v42  ;;  %3957 = vst [vmem:[#allocation2 + $0xa0] sm:$0xff] %v2807_v29  ;;  %v838_v45 = vshrl.u32 %v7543_v62, %v835_v39 }
 0x2ea   :  { %v2891_v6 = vmul.f32 %v2890_v51, %v2888_v54  ;;  %v841_v19 = vshrl.u32 %v7544_v1, %v835_v39  ;;  %v843_v8 = vshll.u32 %v7544_v1, %v834_v42  ;;  %v774_v10 = vadd.s32 1, %v5441_v11 }
 0x2eb   :  { %v844_v5 = vshrl.u32 %v7545_v60, %v835_v39  ;;  %v846_v17 = vshll.u32 %v7545_v60, %v834_v42  ;;  %v847_v37 = vshrl.u32 %v7546_v63, %v835_v39  ;;  %v839_v28 = vor.u32 %v838_v45, %v837_v48 }
 0x2ec   :  { %v2892_v56 = vxor.u32 2147483648, %v2891_v6  ;;  %v842_v46 = vor.u32 %v841_v19, %v840_v2  ;;  %v849_v47 = vshll.u32 %v7546_v63, %v834_v42  ;;  %v775_v20 = vsel %vm773_vm10, %v774_v10, %v5441_v11 }
 0x2ed   :  { %v845_v53 = vor.u32 %v844_v5, %v843_v8  ;;  %v848_v0 = vor.u32 %v847_v37, %v846_v17  ;;  %v850_v33 = vshrl.u32 %v7552_v59, %v835_v39  ;;  %v2901_v3 = vadd.s32 3, %v2897_v34 }
 0x2ee   :  { %v2893_v13 = vsel %vm2810_vm13, %v2892_v56, %v2891_v6  ;;  %v776_v38 = vadd.s32 %v775_v20, %v771_v58  ;;  %vm852_vm9 = vcmp.lt.s32.totalorder %v833_v41, 1  ;;  %v836_v4 = vshrl.u32 %v7551_v35, %v835_v39 }
 0x2ef   :  { %v2896_v55 = vsel %vm5394_vm15, %v5128_v57, %v2893_v13  ;;  %v851_v36 = vor.u32 %v850_v33, %v849_v47  ;;  %vm854_vm11 = vcmp.lt.s32.totalorder %v833_v41, 3  ;;  %vm855_vm12 = vcmp.lt.s32.totalorder %v833_v41, 4 }
 0x2f0   :  { %4295 = vcosq.f32 %v2896_v55  ;;  %v777_v42 = vadd.s32 536870912, %v776_v38  ;;  %v860_v27 = vsel %vm852_vm9, %v839_v28, %v842_v46  ;;  %v857_v52 = vsel %vm855_vm12, %v845_v53, 2102212464 }
 0x2f1   :  { %4297 = vsinq.f32 %v2896_v55  ;;  %v861_v12 = vsel %vm855_vm12, %v848_v0, 920167782  ;;  %v864_v34 = vsel %vm852_vm9, %v842_v46, %v845_v53  ;;  %vm853_vm13 = vcmp.lt.s32.totalorder %v833_v41, 2 }
 0x2f2   :  { %v778_v58 = vshrl.u32 %v777_v42, 30  ;;  %v862_v11 = vsel %vm854_vm11, %v845_v53, %v861_v12  ;;  %v865_v44 = vsel %vm855_vm12, %v851_v36, 1326507024  ;;  %v856_v7 = vsel %vm852_vm9, %v836_v4, %v839_v28 }
 0x2f3   :  { %v863_v39 = vsel %vm853_vm13, %v860_v27, %v862_v11  ;;  %v866_v54 = vsel %vm854_vm11, %v848_v0, %v865_v44  ;;  %v868_v51 = vshll.u32 %v828_v25, 8  ;;  %v858_v2 = vsel %vm854_vm11, %v842_v46, %v857_v52 }
 0x2f4   :  { %v779_v29 = vshll.u32 %v778_v58, 30  ;;  %v802_v48 = vsub.s32 4, %v778_v58  ;;  %v867_v6 = vsel %vm853_vm13, %v864_v34, %v866_v54  ;;  %v2902_v5 = vand.u32 3, %v2901_v3 }
 0x2f5   :  { %v5481_v45 = vmul.u32.u64.low %v868_v51, %v867_v6  ;;  %v5482_v19 = vmul.u32.u64.high %v868_v51, %v867_v6, %v5481_v45  ;;  %v5484_v8 = vmul.u32.u64.low %v868_v51, %v863_v39  ;;  %v5485_v10 = vmul.u32.u64.high %v868_v51, %v863_v39, %v5484_v8 }
 0x2f6   :  { %v5487_v17 = vsub.s32 %v776_v38, %v779_v29  ;;  %v2499_v37 = vand.u32 2139095040, %v5374_v50  ;;  %vm718_vm14 = vcmp.lt.s32.totalorder %v5300_v43, 0  ;;  %v859_v25 = vsel %vm853_vm13, %v856_v7, %v858_v2 }
 0x2f7   :  { %v2496_v56 = vand.u32 2147483647, %v5374_v50  ;;  %v803_v46 = vsel %vm718_vm14, %v802_v48, %v778_v58  ;;  %vm877_vm15 = vc.u32 %v5482_v19, %v5484_v8  ;;  %v878_v47 = vadd.s32 1, %v5485_v10 }
 0x2f8   :  { %v782_v9 = vsub.s32 0, %v5487_v17  ;;  %v2500_v28 = vshrl.u32 %v2499_v37, 23  ;;  %v5500_v20 = vadd.f32 %v5362_v61, %v5284_v40  ;;  %vm2904_vm0 = vcmp.eq.s32.totalorder %v2902_v5, 0 }
 0x2f9   :  { %vm5504_vm1 = vcmp.le.f32.partialorder %v716_v21, 0.7853982  ;;  %vm2907_vm2 = vcmp.eq.s32.totalorder %v2902_v5, 2  ;;  %v875_v38 = vmul.u32 %v868_v51, %v859_v25  ;;  %v879_v55 = vsel %vm877_vm15, %v878_v47, %v5485_v10 }
 0x2fa   :  { %v4296_v53 = vpop.eup %4295  ;;  %v3994_v0 = vmin.u32 %v782_v9, %v5487_v17  ;;  %v4057_v33 = vadd.s32 4294967169, %v2500_v28  ;;  %v805_v61 = vsel %vm5504_vm1, 0, %v803_v46  ;;  %v2503_v21 = vand.u32 8388607, %v2496_v56 }
 0x2fb   :  { %v4298_v13 = vpop.eup %4297  ;;  %v2908_v3 = vxor.u32 2147483648, %v4296_v53  ;;  %v880_v42 = vadd.s32 %v879_v55, %v875_v38  ;;  %v2603_v52 = vand.u32 2139095040, %v5500_v20  ;;  %vm2900_vm3 = vweird.f32 %v5128_v57 }
 0x2fc   :  { %v2905_v4 = vxor.u32 2147483648, %v4298_v13  ;;  %v784_v40 = vclz %v3994_v0  ;;  %v2506_v27 = vadd.s32 1, %v4057_v33  ;;  %vm2903_vm4 = vcmp.lt.s32.totalorder %v2902_v5, 2 }
 0x2fd   :  { %v2909_v36 = vsel %vm2907_vm2, %v2908_v3, %v4298_v13  ;;  %v809_v11 = vadd.s32 3, %v805_v61  ;;  %v881_v44 = vadd.s32 536870912, %v880_v42  ;;  %v2504_v39 = vor.u32 8388608, %v2503_v21 }
 0x2fe   :  { %v2906_v12 = vsel %vm2904_vm0, %v4296_v53, %v2905_v4  ;;  %v3995_v34 = vadd.s32 4294967294, %v784_v40  ;;  %vm2507_vm5 = vcmp.gt.s32.totalorder %v2506_v27, 0  ;;  %v2604_v2 = vshrl.u32 %v2603_v52, 23 }
 0x2ff   :  { %v2910_v58 = vsel %vm2903_vm4, %v2906_v12, %v2909_v36  ;;  %v2508_v54 = vsel %vm2507_vm5, %v2506_v27, 0  ;;  %v5517_v29 = vshrl.u32 %v881_v44, 30  ;;  %v772_v57 = vadd.s32 %v5440_v26, %v5430_v31 }
 0x300   :  { %v2911_v7 = vsel %vm2900_vm3, nan, %v2910_v58  ;;  %vm3996_vm6 = vcmp.lt.s32.totalorder %v3995_v34, 0  ;;  %v2510_v48 = vand.u32 31, %v2508_v54  ;;  %v5522_v10 = vadd.s32 %v5484_v8, %v5482_v19 }
 0x301   :  { %3958 = vst [vmem:[#allocation2 + $0xa8] sm:$0xff] %v2911_v7  ;;  %v787_v51 = vsel %vm3996_vm6, 0, %v3995_v34  ;;  %v883_v5 = vshll.u32 %v5517_v29, 30  ;;  %v2600_v9 = vand.u32 2147483647, %v5500_v20  ;;  %v5527_v47 = vand.u32 3, %v809_v11 }
 0x302   :  { %v788_v6 = vsub.s32 32, %v787_v51  ;;  %v792_v45 = vsub.s32 4294967266, %v787_v51  ;;  %v2511_v37 = vsub.s32 32, %v2510_v48  ;;  %v789_v25 = vshll.u32 %v5487_v17, %v787_v51 }
 0x303   :  { %v5529_v53 = vsub.s32 %v880_v42, %v883_v5  ;;  %v5532_v26 = vshll.u32 %v2504_v39, 8  ;;  %v4061_v0 = vadd.s32 4294967169, %v2604_v2  ;;  %v2513_v33 = vshll.u32 %v7551_v35, %v2510_v48 }
 0x304   :  { %v790_v28 = vshrl.u32 %v772_v57, %v788_v6  ;;  %v793_v46 = vadd.s32 127, %v792_v45  ;;  %v2514_v31 = vshrl.u32 %v7543_v62, %v2511_v37  ;;  %v2517_v13 = vshrl.u32 %v7544_v1, %v2511_v37 }
 0x305   :  { %v886_v3 = vsub.s32 0, %v5529_v53  ;;  %v2509_v17 = vshrl.u32 %v2508_v54, 5  ;;  %v2516_v38 = vshll.u32 %v7543_v62, %v2510_v48  ;;  %v2520_v55 = vshrl.u32 %v7545_v60, %v2511_v37 }
 0x306   :  { %v791_v19 = vor.u32 %v790_v28, %v789_v25  ;;  %v794_v8 = vshll.u32 %v793_v46, 23  ;;  %v2515_v61 = vor.u32 %v2514_v31, %v2513_v33  ;;  %v2519_v21 = vshll.u32 %v7544_v1, %v2510_v48 }
 0x307   :  { %v3998_v36 = vmin.u32 %v886_v3, %v5529_v53  ;;  %v2518_v42 = vor.u32 %v2517_v13, %v2516_v38  ;;  %v2522_v27 = vshll.u32 %v7545_v60, %v2510_v48  ;;  %v2523_v52 = vshrl.u32 %v7546_v63, %v2511_v37 }
 0x308   :  { %v795_v4 = vor.u32 4788187, %v794_v8  ;;  %v798_v40 = vcvt.s32.f32 %v791_v19  ;;  %v2521_v34 = vor.u32 %v2520_v55, %v2519_v21  ;;  %v2525_v58 = vshll.u32 %v7546_v63, %v2510_v48 }
 0x309   :  { %v2526_v11 = vshrl.u32 %v7552_v59, %v2511_v37  ;;  %vm822_vm7 = vcmp.lt.s32.totalorder %v5324_v18, 0  ;;  %v888_v44 = vclz %v3998_v36  ;;  %v906_v7 = vsub.s32 4, %v5517_v29 }
 0x30a   :  { %v796_v12 = vand.u32 2147483647, %v795_v4  ;;  %v2512_v39 = vshrl.u32 %v7551_v35, %v2511_v37  ;;  %v2610_v54 = vadd.s32 1, %v4061_v0  ;;  %v2524_v2 = vor.u32 %v2523_v52, %v2522_v27 }
 0x30b   :  { %v2527_v57 = vor.u32 %v2526_v11, %v2525_v58  ;;  %vm2528_vm8 = vcmp.lt.s32.totalorder %v2509_v17, 1  ;;  %v3999_v6 = vadd.s32 4294967294, %v888_v44  ;;  %vm2529_vm10 = vcmp.lt.s32.totalorder %v2509_v17, 2 }
 0x30c   :  { %v799_v51 = vmul.f32 %v798_v40, %v796_v12  ;;  %vm2530_vm9 = vcmp.lt.s32.totalorder %v2509_v17, 3  ;;  %vm2531_vm11 = vcmp.lt.s32.totalorder %v2509_v17, 4  ;;  %v2536_v5 = vsel %vm2528_vm8, %v2515_v61, %v2518_v42 }
 0x30d   :  { %v2533_v48 = vsel %vm2531_vm11, %v2521_v34, 2102212464  ;;  %v2537_v25 = vsel %vm2531_vm11, %v2524_v2, 920167782  ;;  %vm4000_vm12 = vcmp.lt.s32.totalorder %v3999_v6, 0  ;;  %v2532_v28 = vsel %vm2528_vm8, %v2512_v39, %v2515_v61 }
 0x30e   :  { %v800_v45 = vxor.u32 2147483648, %v799_v51  ;;  %v2534_v37 = vsel %vm2530_vm9, %v2518_v42, %v2533_v48  ;;  %v2538_v46 = vsel %vm2530_vm9, %v2521_v34, %v2537_v25  ;;  %v891_v0 = vsel %vm4000_vm12, 0, %v3999_v6 }
 0x30f   :  { %v2539_v19 = vsel %vm2529_vm10, %v2536_v5, %v2538_v46  ;;  %v2540_v8 = vsel %vm2528_vm8, %v2518_v42, %v2521_v34  ;;  %v892_v13 = vsub.s32 32, %v891_v0  ;;  %v893_v3 = vshll.u32 %v5529_v53, %v891_v0 }
 0x310   :  { %v801_v31 = vsel %vm718_vm14, %v800_v45, %v799_v51  ;;  %v896_v38 = vsub.s32 4294967266, %v891_v0  ;;  %v2541_v55 = vsel %vm2531_vm11, %v2527_v57, 1326507024  ;;  %v907_v41 = vsel %vm822_vm7, %v906_v7, %v5517_v29 }
 0x311   :  { %v804_v33 = vsel %vm5504_vm1, %v5300_v43, %v801_v31  ;;  %v5564_v4 = vmul.u32.u64.low %v5532_v26, %v2539_v19  ;;  %v5565_v40 = vmul.u32.u64.high %v5532_v26, %v2539_v19, %v5564_v4  ;;  %v894_v61 = vshrl.u32 %v5522_v10, %v892_v13 }
 0x312   :  { %4299 = vcosq.f32 %v804_v33  ;;  %v897_v21 = vadd.s32 127, %v896_v38  ;;  %v2542_v36 = vsel %vm2530_vm9, %v2524_v2, %v2541_v55  ;;  %v2535_v53 = vsel %vm2529_vm10, %v2532_v28, %v2534_v37 }
 0x313   :  { %4301 = vsinq.f32 %v804_v33  ;;  %v2543_v42 = vsel %vm2529_vm10, %v2540_v8, %v2542_v36  ;;  %vm2611_vm13 = vcmp.gt.s32.totalorder %v2610_v54, 0  ;;  %v895_v27 = vor.u32 %v894_v61, %v893_v3 }
 0x314   :  { %v898_v52 = vshll.u32 %v897_v21, 23  ;;  %v5576_v12 = vmul.u32.u64.low %v5532_v26, %v2543_v42  ;;  %v5577_v34 = vmul.u32.u64.high %v5532_v26, %v2543_v42, %v5576_v12  ;;  %vm5581_vm14 = vcmp.le.f32.partialorder %v820_v49, 0.7853982 }
 0x315   :  { %v2554_v58 = vadd.s32 1, %v5565_v40  ;;  %v2607_v29 = vand.u32 8388607, %v2600_v9  ;;  %v2612_v17 = vsel %vm2611_vm13, %v2610_v54, 0  ;;  %v909_v44 = vsel %vm5581_vm14, 0, %v907_v41 }
 0x316   :  { %v899_v11 = vor.u32 4788187, %v898_v52  ;;  %v2614_v7 = vand.u32 31, %v2612_v17  ;;  %vm811_vm15 = vcmp.lt.s32.totalorder %v5527_v47, 2  ;;  %vm812_vm0 = vcmp.eq.s32.totalorder %v5527_v47, 0 }
 0x317   :  { %vm815_vm1 = vcmp.eq.s32.totalorder %v5527_v47, 2  ;;  %v2551_v49 = vmul.u32 %v5532_v26, %v2535_v53  ;;  %vm808_vm2 = vweird.f32 %v5300_v43  ;;  %v902_v51 = vcvt.s32.f32 %v895_v27  ;;  %v7575_v47 = vld [vmem:[#allocation5_spill] sm:$0xff] }
 0x318   :  { %v900_v39 = vand.u32 2147483647, %v899_v11  ;;  %vm2553_vm3 = vc.u32 %v5577_v34, %v5564_v4  ;;  %v2615_v54 = vsub.s32 32, %v2614_v7  ;;  %v913_v2 = vadd.s32 3, %v909_v44 }
 0x319   :  { %v2555_v57 = vsel %vm2553_vm3, %v2554_v58, %v5565_v40  ;;  %v2608_v6 = vor.u32 8388608, %v2607_v29  ;;  %v5598_v45 = vshrl.u32 %v2612_v17, 5  ;;  %v2617_v25 = vshll.u32 %v7551_v35, %v2614_v7 }
 0x31a   :  { %v903_v48 = vmul.f32 %v902_v51, %v900_v39  ;;  %v2556_v5 = vadd.s32 %v2555_v57, %v2551_v49  ;;  %v2618_v26 = vshrl.u32 %v7543_v62, %v2615_v54  ;;  %v2620_v37 = vshll.u32 %v7543_v62, %v2614_v7 }
 0x31b   :  { %v2621_v46 = vshrl.u32 %v7544_v1, %v2615_v54  ;;  %v2623_v31 = vshll.u32 %v7544_v1, %v2614_v7  ;;  %v2624_v0 = vshrl.u32 %v7545_v60, %v2615_v54  ;;  %v2627_v3 = vshrl.u32 %v7546_v63, %v2615_v54 }
 0x31c   :  { %v4300_v28 = vpop.eup %4299  ;;  %v904_v33 = vxor.u32 2147483648, %v903_v48  ;;  %v2557_v13 = vadd.s32 536870912, %v2556_v5  ;;  %v2619_v55 = vor.u32 %v2618_v26, %v2617_v25  ;;  %v2626_v61 = vshll.u32 %v7545_v60, %v2614_v7 }
 0x31d   :  { %v4302_v19 = vpop.eup %4301  ;;  %v816_v8 = vxor.u32 2147483648, %v4300_v28  ;;  %v2622_v40 = vor.u32 %v2621_v46, %v2620_v37  ;;  %v2625_v53 = vor.u32 %v2624_v0, %v2623_v31  ;;  %v2629_v52 = vshll.u32 %v7546_v63, %v2614_v7 }
 0x31e   :  { %v813_v38 = vxor.u32 2147483648, %v4302_v19  ;;  %v905_v36 = vsel %vm822_vm7, %v904_v33, %v903_v48  ;;  %v5612_v41 = vshrl.u32 %v2557_v13, 30  ;;  %v2630_v12 = vshrl.u32 %v7552_v59, %v2615_v54 }
 0x31f   :  { %v817_v21 = vsel %vm815_vm1, %v816_v8, %v4302_v19  ;;  %v908_v27 = vsel %vm5581_vm14, %v5324_v18, %v905_v36  ;;  %v2628_v17 = vor.u32 %v2627_v3, %v2626_v61  ;;  %v914_v44 = vand.u32 3, %v913_v2  ;;  %v7576_v2 = vld [vmem:[#allocation12_spill] sm:$0xff] }
 0x320   :  { %v814_v42 = vsel %vm812_vm0, %v4300_v28, %v813_v38  ;;  %4303 = vcosq.f32 %v908_v27  ;;  %v2559_v29 = vshll.u32 %v5612_v41, 30  ;;  %v2631_v49 = vor.u32 %v2630_v12, %v2629_v52  ;;  %v5659_v38 = vpop.permute.xlu1 %473 }
 0x321   :  { %v818_v58 = vsel %vm811_vm15, %v814_v42, %v817_v21  ;;  %4305 = vsinq.f32 %v908_v27  ;;  %vm2632_vm4 = vcmp.lt.s32.totalorder %v5598_v45, 1  ;;  %v5629_v7 = vshll.u32 %v2608_v6, 8 }
 0x322   :  { %v819_v11 = vsel %vm808_vm2, nan, %v818_v58  ;;  %v5626_v10 = vsub.s32 %v2556_v5, %v2559_v29  ;;  %v367_v39 = vmul.f32 %v7575_v47, %v4575_v14  ;;  %vm2498_vm5 = vcmp.lt.s32.totalorder %v5374_v50, 0 }
 0x323   :  { %2174 = vst [vmem:[#allocation2 + $0x10] sm:$0xff] %v819_v11  ;;  %v2616_v51 = vshrl.u32 %v7551_v35, %v2615_v54  ;;  %vm2635_vm6 = vcmp.lt.s32.totalorder %v5598_v45, 4  ;;  %v2640_v43 = vsel %vm2632_vm4, %v2619_v55, %v2622_v40  ;;  %v434_v57 = vmul.f32 %v7576_v2, %v4581_v22 }
 0x324   :  { %v2562_v48 = vsub.s32 0, %v5626_v10  ;;  %vm2634_vm7 = vcmp.lt.s32.totalorder %v5598_v45, 3  ;;  %v2637_v6 = vsel %vm2635_vm6, %v2625_v53, 2102212464  ;;  %v2641_v5 = vsel %vm2635_vm6, %v2628_v17, 920167782 }
 0x325   :  { %vm2633_vm8 = vcmp.lt.s32.totalorder %v5598_v45, 2  ;;  %v2642_v25 = vsel %vm2634_vm7, %v2625_v53, %v2641_v5  ;;  %v2644_v54 = vsel %vm2632_vm4, %v2622_v40, %v2625_v53  ;;  %v2645_v26 = vsel %vm2635_vm6, %v2631_v49, 1326507024 }
 0x326   :  { %v4058_v28 = vmin.u32 %v2562_v48, %v5626_v10  ;;  %v2636_v37 = vsel %vm2632_vm4, %v2616_v51, %v2619_v55  ;;  %v2643_v46 = vsel %vm2633_vm8, %v2640_v43, %v2642_v25  ;;  %v2646_v31 = vsel %vm2634_vm7, %v2628_v17, %v2645_v26 }
 0x327   :  { %vm912_vm10 = vweird.f32 %v5324_v18  ;;  %v2638_v0 = vsel %vm2634_vm7, %v2622_v40, %v2637_v6  ;;  %v2647_v19 = vsel %vm2633_vm8, %v2644_v54, %v2646_v31  ;;  %vm915_vm9 = vcmp.lt.s32.totalorder %v914_v44, 2 }
 0x328   :  { %v5654_v8 = vmul.u32.u64.low %v5629_v7, %v2643_v46  ;;  %v5655_v33 = vmul.u32.u64.high %v5629_v7, %v2643_v46, %v5654_v8  ;;  %v2564_v13 = vclz %v4058_v28  ;;  %v2582_v3 = vsub.s32 4, %v5612_v41 }
 0x329   :  { %v435_v55 = vmul.f32 %v7576_v2, %v4583_v23  ;;  %vm916_vm11 = vcmp.eq.s32.totalorder %v914_v44, 0  ;;  %v5664_v40 = vmul.u32.u64.low %v5629_v7, %v2647_v19  ;;  %v5665_v61 = vmul.u32.u64.high %v5629_v7, %v2647_v19, %v5664_v40 }
 0x32a   :  { %v450_v21 = vadd.f32 %v434_v57, %v367_v39  ;;  %v4304_v36 = vpop.eup %4303  ;;  %vm919_vm12 = vcmp.eq.s32.totalorder %v914_v44, 2  ;;  %v4059_v53 = vadd.s32 4294967294, %v2564_v13  ;;  %v2639_v42 = vsel %vm2633_vm8, %v2636_v37, %v2638_v0 }
 0x32b   :  { %v368_v27 = vmul.f32 %v7575_v47, %v4577_v15  ;;  %v4306_v52 = vpop.eup %4305  ;;  %v920_v12 = vxor.u32 2147483648, %v4304_v36  ;;  %v2552_v58 = vadd.s32 %v5564_v4, %v5577_v34  ;;  %v2658_v29 = vadd.s32 1, %v5655_v33 }
 0x32c   :  { %v5675_v17 = vadd.f32 %v5659_v38, %v450_v21  ;;  %v917_v11 = vxor.u32 2147483648, %v4306_v52  ;;  %vm4060_vm13 = vcmp.lt.s32.totalorder %v4059_v53, 0  ;;  %v2583_v45 = vsel %vm2498_vm5, %v2582_v3, %v5612_v41 }
 0x32d   :  { %v451_v49 = vadd.f32 %v435_v55, %v368_v27  ;;  %v921_v39 = vsel %vm919_vm12, %v920_v12, %v4306_v52  ;;  %v2567_v51 = vsel %vm4060_vm13, 0, %v4059_v53  ;;  %v2655_v43 = vmul.u32 %v5629_v7, %v2639_v42 }
 0x32e   :  { %vm2657_vm14 = vc.u32 %v5665_v61, %v5654_v8  ;;  %v918_v4 = vsel %vm916_vm11, %v4304_v36, %v917_v11  ;;  %v2568_v34 = vsub.s32 32, %v2567_v51  ;;  %v2572_v57 = vsub.s32 4294967266, %v2567_v51 }
 0x32f   :  { %v5685_v48 = vadd.f32 %v5659_v38, %v451_v49  ;;  %v922_v6 = vsel %vm915_vm9, %v918_v4, %v921_v39  ;;  %v2569_v5 = vshll.u32 %v5626_v10, %v2567_v51  ;;  %v2659_v41 = vsel %vm2657_vm14, %v2658_v29, %v5655_v33 }
 0x330   :  { %v1132_v25 = vand.u32 2147483647, %v5675_v17  ;;  %v923_v7 = vsel %vm912_vm10, nan, %v922_v6  ;;  %v2570_v54 = vshrl.u32 %v2552_v58, %v2568_v34  ;;  %v2573_v26 = vadd.s32 127, %v2572_v57 }
 0x331   :  { %v2660_v28 = vadd.s32 %v2659_v41, %v2655_v43  ;;  %2175 = vst [vmem:[#allocation2 + $0x18] sm:$0xff] %v923_v7  ;;  %v1135_v37 = vand.u32 2139095040, %v5675_v17  ;;  %vm5696_vm15 = vcmp.le.f32.partialorder %v2496_v56, 0.7853982  ;;  %v1239_v19 = vand.u32 2139095040, %v5685_v48 }
 0x332   :  { %v2571_v10 = vor.u32 %v2570_v54, %v2569_v5  ;;  %v2574_v46 = vshll.u32 %v2573_v26, 23  ;;  %v2585_v0 = vsel %vm5696_vm15, 0, %v2583_v45  ;;  %v1139_v3 = vand.u32 8388607, %v1132_v25 }
 0x333   :  { %v2661_v31 = vadd.s32 536870912, %v2660_v28  ;;  %v1136_v18 = vshrl.u32 %v1135_v37, 23  ;;  %v1236_v56 = vand.u32 2147483647, %v5685_v48  ;;  %v1240_v40 = vshrl.u32 %v1239_v19, 23 }
 0x334   :  { %v2575_v33 = vor.u32 4788187, %v2574_v46  ;;  %v2578_v36 = vcvt.s32.f32 %v2571_v10  ;;  %v2589_v53 = vadd.s32 3, %v2585_v0  ;;  %v2246_v12 = vmul.f32 %v4585_v24, %v7576_v2 }
 0x335   :  { %v5703_v13 = vshrl.u32 %v2661_v31, 30  ;;  %v4009_v55 = vadd.s32 4294967169, %v1136_v18  ;;  %v4013_v52 = vadd.s32 4294967169, %v1240_v40  ;;  %v2212_v11 = vmul.f32 %v4579_v16, %v7575_v47 }
 0x336   :  { %v2576_v21 = vand.u32 2147483647, %v2575_v33  ;;  %v1140_v45 = vor.u32 8388608, %v1139_v3  ;;  %v5717_v49 = vmul.f32 %v4598_v32, %v7575_v47  ;;  %v5721_v39 = vand.u32 8388607, %v1236_v56 }
 0x337   :  { %v2663_v42 = vshll.u32 %v5703_v13, 30  ;;  %v1142_v27 = vadd.s32 1, %v4009_v55  ;;  %v1246_v51 = vadd.s32 1, %v4013_v52  ;;  %v5723_v4 = vand.u32 3, %v2589_v53 }
 0x338   :  { %v2579_v58 = vmul.f32 %v2578_v36, %v2576_v21  ;;  %v5728_v5 = vmul.f32 %v4595_v30, %v7576_v2  ;;  %v5730_v47 = vadd.f32 %v2246_v12, %v2212_v11  ;;  %v2656_v7 = vadd.s32 %v5654_v8, %v5665_v61 }
 0x339   :  { %v5711_v29 = vsub.s32 %v2660_v28, %v2663_v42  ;;  %vm1143_vm0 = vcmp.gt.s32.totalorder %v1142_v27, 0  ;;  %vm1247_vm1 = vcmp.gt.s32.totalorder %v1246_v51, 0  ;;  %v5737_v26 = vshll.u32 %v1140_v45, 8 }
 0x33a   :  { %v2580_v43 = vxor.u32 2147483648, %v2579_v58  ;;  %v1144_v57 = vsel %vm1143_vm0, %v1142_v27, 0  ;;  %v2686_v37 = vsub.s32 4, %v5703_v13  ;;  %v1244_v10 = vor.u32 8388608, %v5721_v39 }
 0x33b   :  { %v2666_v34 = vsub.s32 0, %v5711_v29  ;;  %v1146_v6 = vand.u32 31, %v1144_v57  ;;  %v1145_v31 = vshrl.u32 %v1144_v57, 5  ;;  %v5744_v0 = vsel %vm1247_vm1, %v1246_v51, 0 }
 0x33c   :  { %v2581_v41 = vsel %vm2498_vm5, %v2580_v43, %v2579_v58  ;;  %vm2602_vm2 = vcmp.lt.s32.totalorder %v5500_v20, 0  ;;  %vm2595_vm3 = vcmp.eq.s32.totalorder %v5723_v4, 2  ;;  %vm2592_vm5 = vcmp.eq.s32.totalorder %v5723_v4, 0 }
 0x33d   :  { %v4062_v54 = vmin.u32 %v2666_v34, %v5711_v29  ;;  %v2584_v28 = vsel %vm5696_vm15, %v5374_v50, %v2581_v41  ;;  %v1147_v2 = vsub.s32 32, %v1146_v6  ;;  %v1149_v8 = vshll.u32 %v7551_v35, %v1146_v6 }
 0x33e   :  { %4307 = vcosq.f32 %v2584_v28  ;;  %v1152_v18 = vshll.u32 %v7543_v62, %v1146_v6  ;;  %v1155_v33 = vshll.u32 %v7544_v1, %v1146_v6  ;;  %v1158_v40 = vshll.u32 %v7545_v60, %v1146_v6 }
 0x33f   :  { %v2668_v46 = vclz %v4062_v54  ;;  %4309 = vsinq.f32 %v2584_v28  ;;  %v1150_v61 = vshrl.u32 %v7543_v62, %v1147_v2  ;;  %v1153_v44 = vshrl.u32 %v7544_v1, %v1147_v2 }
 0x340   :  { %v1156_v3 = vshrl.u32 %v7545_v60, %v1147_v2  ;;  %v1159_v21 = vshrl.u32 %v7546_v63, %v1147_v2  ;;  %v1161_v36 = vshll.u32 %v7546_v63, %v1146_v6  ;;  %v1162_v27 = vshrl.u32 %v7552_v59, %v1147_v2 }
 0x341   :  { %v4063_v19 = vadd.s32 4294967294, %v2668_v46  ;;  %v1151_v55 = vor.u32 %v1150_v61, %v1149_v8  ;;  %v1154_v53 = vor.u32 %v1153_v44, %v1152_v18  ;;  %v1148_v12 = vshrl.u32 %v7551_v35, %v1147_v2 }
 0x342   :  { %v1157_v42 = vor.u32 %v1156_v3, %v1155_v33  ;;  %v1160_v58 = vor.u32 %v1159_v21, %v1158_v40  ;;  %vm1164_vm6 = vcmp.lt.s32.totalorder %v1145_v31, 1  ;;  %vm2591_vm7 = vcmp.lt.s32.totalorder %v5723_v4, 2 }
 0x343   :  { %vm4064_vm4 = vcmp.lt.s32.totalorder %v4063_v19, 0  ;;  %vm5763_vm8 = vcmp.le.f32.partialorder %v2600_v9, 0.7853982  ;;  %v1163_v43 = vor.u32 %v1162_v27, %v1161_v36  ;;  %vm1165_vm10 = vcmp.lt.s32.totalorder %v1145_v31, 2 }
 0x344   :  { %v2671_v52 = vsel %vm4064_vm4, 0, %v4063_v19  ;;  %vm2588_vm9 = vweird.f32 %v5374_v50  ;;  %vm1166_vm11 = vcmp.lt.s32.totalorder %v1145_v31, 3  ;;  %vm1167_vm12 = vcmp.lt.s32.totalorder %v1145_v31, 4 }
 0x345   :  { %v2672_v45 = vsub.s32 32, %v2671_v52  ;;  %v2676_v51 = vsub.s32 4294967266, %v2671_v52  ;;  %v2673_v34 = vshll.u32 %v5711_v29, %v2671_v52  ;;  %v1172_v57 = vsel %vm1164_vm6, %v1151_v55, %v1154_v53 }
 0x346   :  { %v1169_v54 = vsel %vm1167_vm12, %v1157_v42, 2102212464  ;;  %v1173_v28 = vsel %vm1167_vm12, %v1160_v58, 920167782  ;;  %v1168_v9 = vsel %vm1164_vm6, %v1148_v12, %v1151_v55  ;;  %v1176_v46 = vsel %vm1164_vm6, %v1154_v53, %v1157_v42 }
 0x347   :  { %v2674_v6 = vshrl.u32 %v2656_v7, %v2672_v45  ;;  %v2677_v41 = vadd.s32 127, %v2676_v51  ;;  %v1174_v2 = vsel %vm1166_vm11, %v1157_v42, %v1173_v28  ;;  %v1177_v8 = vsel %vm1167_vm12, %v1163_v43, 1326507024 }
 0x348   :  { %v4308_v61 = vpop.eup %4307  ;;  %v1170_v29 = vsel %vm1166_vm11, %v1154_v53, %v1169_v54  ;;  %v1175_v44 = vsel %vm1165_vm10, %v1172_v57, %v1174_v2  ;;  %v1178_v7 = vsel %vm1166_vm11, %v1160_v58, %v1177_v8  ;;  %v2687_v42 = vsel %vm2602_vm2, %v2686_v37, %v5703_v13 }
 0x349   :  { %v2675_v18 = vor.u32 %v2674_v6, %v2673_v34  ;;  %v2678_v19 = vshll.u32 %v2677_v41, 23  ;;  %v4310_v33 = vpop.eup %4309  ;;  %v2596_v3 = vxor.u32 2147483648, %v4308_v61  ;;  %v1179_v27 = vsel %vm1165_vm10, %v1176_v46, %v1178_v7 }
 0x34a   :  { %v5777_v40 = vmul.u32.u64.low %v5737_v26, %v1175_v44  ;;  %v5778_v21 = vmul.u32.u64.high %v5737_v26, %v1175_v44, %v5777_v40  ;;  %v2593_v55 = vxor.u32 2147483648, %v4310_v33  ;;  %v1171_v52 = vsel %vm1165_vm10, %v1168_v9, %v1170_v29 }
 0x34b   :  { %v2679_v36 = vor.u32 4788187, %v2678_v19  ;;  %v2597_v53 = vsel %vm2595_vm3, %v2596_v3, %v4310_v33  ;;  %v5789_v12 = vmul.u32.u64.low %v5737_v26, %v1179_v27  ;;  %v5790_v58 = vmul.u32.u64.high %v5737_v26, %v1179_v27, %v5789_v12 }
 0x34c   :  { %v2594_v45 = vsel %vm2592_vm5, %v4308_v61, %v2593_v55  ;;  %v2682_v43 = vcvt.s32.f32 %v2675_v18  ;;  %v1250_v34 = vand.u32 31, %v5744_v0  ;;  %v2689_v37 = vsel %vm5763_vm8, 0, %v2687_v42 }
 0x34d   :  { %v2680_v51 = vand.u32 2147483647, %v2679_v36  ;;  %v2598_v13 = vsel %vm2591_vm7, %v2594_v45, %v2597_v53  ;;  %v1190_v31 = vadd.s32 1, %v5778_v21  ;;  %v5802_v57 = vadd.f32 %v5730_v47, %v5659_v38 }
 0x34e   :  { %v2599_v6 = vsel %vm2588_vm9, nan, %v2598_v13  ;;  %v1251_v54 = vsub.s32 32, %v1250_v34  ;;  %v5808_v28 = vshll.u32 %v1244_v10, 8  ;;  %v1187_v4 = vmul.u32 %v5737_v26, %v1171_v52 }
 0x34f   :  { %v2683_v41 = vmul.f32 %v2682_v43, %v2680_v51  ;;  %3955 = vst [vmem:[#allocation2 + $0x90] sm:$0xff] %v2599_v6  ;;  %vm1189_vm13 = vc.u32 %v5790_v58, %v5777_v40  ;;  %v1249_v9 = vshrl.u32 %v5744_v0, 5  ;;  %v1253_v47 = vshll.u32 %v7551_v35, %v1250_v34 }
 0x350   :  { %v1191_v50 = vsel %vm1189_vm13, %v1190_v31, %v5778_v21  ;;  %v1254_v46 = vshrl.u32 %v7543_v62, %v1251_v54  ;;  %v1256_v8 = vshll.u32 %v7543_v62, %v1250_v34  ;;  %v1257_v10 = vshrl.u32 %v7544_v1, %v1251_v54 }
 0x351   :  { %v2684_v2 = vxor.u32 2147483648, %v2683_v41  ;;  %v1192_v39 = vadd.s32 %v1191_v50, %v1187_v4  ;;  %v1259_v61 = vshll.u32 %v7544_v1, %v1250_v34  ;;  %v1260_v26 = vshrl.u32 %v7545_v60, %v1251_v54 }
 0x352   :  { %v1255_v0 = vor.u32 %v1254_v46, %v1253_v47  ;;  %v1262_v19 = vshll.u32 %v7545_v60, %v1250_v34  ;;  %v1263_v29 = vshrl.u32 %v7546_v63, %v1251_v54  ;;  %v1258_v3 = vor.u32 %v1257_v10, %v1256_v8 }
 0x353   :  { %v2685_v18 = vsel %vm2602_vm2, %v2684_v2, %v2683_v41  ;;  %v1193_v33 = vadd.s32 536870912, %v1192_v39  ;;  %v1261_v7 = vor.u32 %v1260_v26, %v1259_v61  ;;  %v1265_v55 = vshll.u32 %v7546_v63, %v1250_v34 }
 0x354   :  { %v2688_v44 = vsel %vm5763_vm8, %v5500_v20, %v2685_v18  ;;  %v1264_v21 = vor.u32 %v1263_v29, %v1262_v19  ;;  %v1266_v36 = vshrl.u32 %v7552_v59, %v1251_v54  ;;  %v2693_v42 = vadd.s32 3, %v2689_v37 }
 0x355   :  { %4311 = vcosq.f32 %v2688_v44  ;;  %v1194_v27 = vshrl.u32 %v1193_v33, 30  ;;  %vm1268_vm14 = vcmp.lt.s32.totalorder %v1249_v9, 1  ;;  %v1252_v53 = vshrl.u32 %v7551_v35, %v1251_v54 }
 0x356   :  { %4313 = vsinq.f32 %v2688_v44  ;;  %v1267_v52 = vor.u32 %v1266_v36, %v1265_v55  ;;  %vm1271_vm15 = vcmp.lt.s32.totalorder %v1249_v9, 4  ;;  %v1276_v12 = vsel %vm1268_vm14, %v1255_v0, %v1258_v3 }
 0x357   :  { %v1195_v11 = vshll.u32 %v1194_v27, 30  ;;  %vm1270_vm0 = vcmp.lt.s32.totalorder %v1249_v9, 3  ;;  %v1273_v45 = vsel %vm1271_vm15, %v1261_v7, 2102212464  ;;  %v1277_v51 = vsel %vm1271_vm15, %v1264_v21, 920167782 }
 0x358   :  { %vm1269_vm1 = vcmp.lt.s32.totalorder %v1249_v9, 2  ;;  %v1278_v43 = vsel %vm1270_vm0, %v1261_v7, %v1277_v51  ;;  %v1280_v13 = vsel %vm1268_vm14, %v1258_v3, %v1261_v7  ;;  %v1281_v31 = vsel %vm1271_vm15, %v1267_v52, 1326507024 }
 0x359   :  { %v5831_v34 = vsub.s32 %v1192_v39, %v1195_v11  ;;  %v1218_v6 = vsub.s32 4, %v1194_v27  ;;  %v1272_v41 = vsel %vm1268_vm14, %v1252_v53, %v1255_v0  ;;  %v1279_v37 = vsel %vm1269_vm1, %v1276_v12, %v1278_v43 }
 0x35a   :  { %v1274_v4 = vsel %vm1270_vm0, %v1258_v3, %v1273_v45  ;;  %v1282_v47 = vsel %vm1270_vm0, %v1264_v21, %v1281_v31  ;;  %v5835_v54 = vmul.u32.u64.low %v5808_v28, %v1279_v37  ;;  %v5836_v2 = vmul.u32.u64.high %v5808_v28, %v1279_v37, %v5835_v54 }
 0x35b   :  { %vm2692_vm2 = vweird.f32 %v5500_v20  ;;  %v2694_v50 = vand.u32 3, %v2693_v42  ;;  %v1198_v46 = vsub.s32 0, %v5831_v34  ;;  %v1283_v8 = vsel %vm1269_vm1, %v1280_v13, %v1282_v47 }
 0x35c   :  { %v2263_v39 = vadd.f32 %v5728_v5, %v5717_v49  ;;  %vm1134_vm3 = vcmp.lt.s32.totalorder %v5675_v17, 0  ;;  %v5846_v10 = vmul.u32.u64.low %v5808_v28, %v1283_v8  ;;  %v5847_v61 = vmul.u32.u64.high %v5808_v28, %v1283_v8, %v5846_v10 }
 0x35d   :  { %v2915_v26 = vand.u32 2139095040, %v5802_v57  ;;  %vm5852_vm4 = vcmp.le.f32.partialorder %v1132_v25, 0.7853982  ;;  %v4010_v0 = vmin.u32 %v1198_v46, %v5831_v34  ;;  %v1219_v19 = vsel %vm1134_vm3, %v1218_v6, %v1194_v27 }
 0x35e   :  { %v1275_v49 = vsel %vm1269_vm1, %v1272_v41, %v1274_v4  ;;  %v1294_v29 = vadd.s32 1, %v5836_v2  ;;  %v5862_v44 = vadd.f32 %v2263_v39, %v5659_v38  ;;  %v2912_v33 = vand.u32 2147483647, %v5802_v57  ;;  %v7583_v39 = vld [vmem:[#allocation10_spill] sm:$0xff] }
 0x35f   :  { %v4312_v5 = vpop.eup %4311  ;;  %v2916_v3 = vshrl.u32 %v2915_v26, 23  ;;  %vm2696_vm5 = vcmp.eq.s32.totalorder %v2694_v50, 0  ;;  %vm2699_vm6 = vcmp.eq.s32.totalorder %v2694_v50, 2  ;;  %v1200_v21 = vclz %v4010_v0 }
 0x360   :  { %v4314_v25 = vpop.eup %4313  ;;  %v2700_v7 = vxor.u32 2147483648, %v4312_v5  ;;  %v1221_v36 = vsel %vm5852_vm4, 0, %v1219_v19  ;;  %v1291_v9 = vmul.u32 %v5808_v28, %v1275_v49  ;;  %vm1293_vm7 = vc.u32 %v5847_v61, %v5835_v54 }
 0x361   :  { %v2697_v55 = vxor.u32 2147483648, %v4314_v25  ;;  %v4011_v38 = vadd.s32 4294967294, %v1200_v21  ;;  %v1295_v27 = vsel %vm1293_vm7, %v1294_v29, %v5836_v2  ;;  %v4073_v53 = vadd.s32 4294967169, %v2916_v3  ;;  %v7584_v29 = vld [vmem:[#allocation8_spill] sm:$0xff] }
 0x362   :  { %v2701_v42 = vsel %vm2699_vm6, %v2700_v7, %v4314_v25  ;;  %vm2695_vm8 = vcmp.lt.s32.totalorder %v2694_v50, 2  ;;  %v1296_v12 = vadd.s32 %v1295_v27, %v1291_v9  ;;  %v2919_v11 = vand.u32 8388607, %v2912_v33 }
 0x363   :  { %v2698_v52 = vsel %vm2696_vm5, %v4312_v5, %v2697_v55  ;;  %v1188_v51 = vadd.s32 %v5777_v40, %v5790_v58  ;;  %vm4012_vm10 = vcmp.lt.s32.totalorder %v4011_v38, 0  ;;  %v2922_v28 = vadd.s32 1, %v4073_v53 }
 0x364   :  { %v2702_v45 = vsel %vm2695_vm8, %v2698_v52, %v2701_v42  ;;  %v1203_v13 = vsel %vm4012_vm10, 0, %v4011_v38  ;;  %v1225_v31 = vadd.s32 3, %v1221_v36  ;;  %v1297_v6 = vadd.s32 536870912, %v1296_v12 }
 0x365   :  { %v2703_v43 = vsel %vm2692_vm2, nan, %v2702_v45  ;;  %v1204_v41 = vsub.s32 32, %v1203_v13  ;;  %v1208_v37 = vsub.s32 4294967266, %v1203_v13  ;;  %vm2923_vm9 = vcmp.gt.s32.totalorder %v2922_v28, 0 }
 0x366   :  { %3956 = vst [vmem:[#allocation2 + $0x98] sm:$0xff] %v2703_v43  ;;  %v3016_v4 = vand.u32 2147483647, %v5862_v44  ;;  %v5878_v47 = vshrl.u32 %v1297_v6, 30  ;;  %v2920_v2 = vor.u32 8388608, %v2919_v11  ;;  %v2924_v50 = vsel %vm2923_vm9, %v2922_v28, 0 }
 0x367   :  { %v3019_v40 = vand.u32 2139095040, %v5862_v44  ;;  %v1205_v58 = vshll.u32 %v5831_v34, %v1203_v13  ;;  %v1206_v46 = vshrl.u32 %v1188_v51, %v1204_v41  ;;  %v1209_v20 = vadd.s32 127, %v1208_v37 }
 0x368   :  { %v2926_v8 = vand.u32 31, %v2924_v50  ;;  %v5884_v10 = vmul.f32 %v7583_v39, %v4575_v14  ;;  %v5888_v26 = vmul.f32 %v7583_v39, %v4577_v15  ;;  %v1299_v0 = vshll.u32 %v5878_v47, 30 }
 0x369   :  { %v1207_v19 = vor.u32 %v1206_v46, %v1205_v58  ;;  %v1210_v49 = vshll.u32 %v1209_v20, 23  ;;  %v5893_v3 = vmul.f32 %v7584_v29, %v4581_v22  ;;  %v5895_v34 = vand.u32 3, %v1225_v31 }
 0x36a   :  { %v2927_v5 = vsub.s32 32, %v2926_v8  ;;  %v1292_v25 = vadd.s32 %v5835_v54, %v5847_v61  ;;  %v5899_v7 = vsub.s32 %v1296_v12, %v1299_v0  ;;  %v5901_v21 = vshll.u32 %v2920_v2, 8 }
 0x36b   :  { %v1211_v55 = vor.u32 4788187, %v1210_v49  ;;  %v5903_v36 = vshrl.u32 %v2924_v50, 5  ;;  %v3020_v9 = vshrl.u32 %v3019_v40, 23  ;;  %v5907_v42 = vand.u32 8388607, %v3016_v4 }
 0x36c   :  { %v1302_v38 = vsub.s32 0, %v5899_v7  ;;  %v2930_v27 = vshrl.u32 %v7543_v62, %v2927_v5  ;;  %v2933_v53 = vshrl.u32 %v7544_v1, %v2927_v5  ;;  %v2935_v54 = vshll.u32 %v7544_v1, %v2926_v8 }
 0x36d   :  { %v1212_v61 = vand.u32 2147483647, %v1211_v55  ;;  %v1214_v52 = vcvt.s32.f32 %v1207_v19  ;;  %v2936_v12 = vshrl.u32 %v7545_v60, %v2927_v5  ;;  %v2939_v11 = vshrl.u32 %v7546_v63, %v2927_v5 }
 0x36e   :  { %v4014_v45 = vmin.u32 %v1302_v38, %v5899_v7  ;;  %v2929_v51 = vshll.u32 %v7551_v35, %v2926_v8  ;;  %v2932_v28 = vshll.u32 %v7543_v62, %v2926_v8  ;;  %v2938_v43 = vshll.u32 %v7545_v60, %v2926_v8 }
 0x36f   :  { %v1215_v13 = vmul.f32 %v1214_v52, %v1212_v61  ;;  %v1322_v31 = vsub.s32 4, %v5878_v47  ;;  %v2937_v6 = vor.u32 %v2936_v12, %v2935_v54  ;;  %v4077_v41 = vadd.s32 4294967169, %v3020_v9 }
 0x370   :  { %vm1238_vm11 = vcmp.lt.s32.totalorder %v5685_v48, 0  ;;  %v1304_v37 = vclz %v4014_v45  ;;  %v2931_v2 = vor.u32 %v2930_v27, %v2929_v51  ;;  %v2934_v50 = vor.u32 %v2933_v53, %v2932_v28 }
 0x371   :  { %v2940_v40 = vor.u32 %v2939_v11, %v2938_v43  ;;  %v1216_v58 = vxor.u32 2147483648, %v1215_v13  ;;  %v2928_v46 = vshrl.u32 %v7551_v35, %v2927_v5  ;;  %v2941_v20 = vshll.u32 %v7546_v63, %v2926_v8 }
 0x372   :  { %v2942_v0 = vshrl.u32 %v7552_v59, %v2927_v5  ;;  %v4015_v19 = vadd.s32 4294967294, %v1304_v37  ;;  %vm2944_vm12 = vcmp.lt.s32.totalorder %v5903_v36, 1  ;;  %vm2945_vm13 = vcmp.lt.s32.totalorder %v5903_v36, 2 }
 0x373   :  { %vm2947_vm14 = vcmp.lt.s32.totalorder %v5903_v36, 4  ;;  %v1217_v49 = vsel %vm1134_vm3, %v1216_v58, %v1215_v13  ;;  %vm2946_vm15 = vcmp.lt.s32.totalorder %v5903_v36, 3  ;;  %v2952_v5 = vsel %vm2944_vm12, %v2931_v2, %v2934_v50 }
 0x374   :  { %v2943_v55 = vor.u32 %v2942_v0, %v2941_v20  ;;  %v2949_v9 = vsel %vm2947_vm14, %v2937_v6, 2102212464  ;;  %v1220_v8 = vsel %vm5852_vm4, %v5675_v17, %v1217_v49  ;;  %vm4016_vm0 = vcmp.lt.s32.totalorder %v4015_v19, 0 }
 0x375   :  { %v2953_v38 = vsel %vm2947_vm14, %v2940_v40, 920167782  ;;  %4315 = vcosq.f32 %v1220_v8  ;;  %v1307_v27 = vsel %vm4016_vm0, 0, %v4015_v19  ;;  %v2948_v53 = vsel %vm2944_vm12, %v2928_v46, %v2931_v2 }
 0x376   :  { %v2954_v54 = vsel %vm2946_vm15, %v2937_v6, %v2953_v38  ;;  %4317 = vsinq.f32 %v1220_v8  ;;  %v1308_v61 = vsub.s32 32, %v1307_v27  ;;  %v1312_v52 = vsub.s32 4294967266, %v1307_v27 }
 0x377   :  { %v2950_v18 = vsel %vm2946_vm15, %v2934_v50, %v2949_v9  ;;  %v1309_v12 = vshll.u32 %v5899_v7, %v1307_v27  ;;  %v2955_v11 = vsel %vm2945_vm13, %v2952_v5, %v2954_v54  ;;  %v2956_v45 = vsel %vm2944_vm12, %v2934_v50, %v2937_v6 }
 0x378   :  { %v2957_v51 = vsel %vm2947_vm14, %v2943_v55, 1326507024  ;;  %v1310_v28 = vshrl.u32 %v1292_v25, %v1308_v61  ;;  %v1313_v43 = vadd.s32 127, %v1312_v52  ;;  %v3026_v37 = vadd.s32 1, %v4077_v41 }
 0x379   :  { %v2958_v13 = vsel %vm2946_vm15, %v2940_v40, %v2957_v51  ;;  %v1323_v2 = vsel %vm1238_vm11, %v1322_v31, %v5878_v47  ;;  %v5960_v58 = vmul.u32.u64.low %v5901_v21, %v2955_v11  ;;  %v5961_v46 = vmul.u32.u64.high %v5901_v21, %v2955_v11, %v5960_v58 }
 0x37a   :  { %v2959_v7 = vsel %vm2945_vm13, %v2956_v45, %v2958_v13  ;;  %v1311_v6 = vor.u32 %v1310_v28, %v1309_v12  ;;  %v1314_v50 = vshll.u32 %v1313_v43, 23  ;;  %vm1227_vm1 = vcmp.lt.s32.totalorder %v5895_v34, 2 }
 0x37b   :  { %v5965_v25 = vmul.u32.u64.low %v5901_v21, %v2959_v7  ;;  %v5966_v20 = vmul.u32.u64.high %v5901_v21, %v2959_v7, %v5965_v25  ;;  %vm5971_vm2 = vcmp.le.f32.partialorder %v1236_v56, 0.7853982  ;;  %v2951_v31 = vsel %vm2945_vm13, %v2948_v53, %v2950_v18 }
 0x37c   :  { %vm3027_vm3 = vcmp.gt.s32.totalorder %v3026_v37, 0  ;;  %vm1224_vm4 = vweird.f32 %v5675_v17  ;;  %vm1228_vm5 = vcmp.eq.s32.totalorder %v5895_v34, 0  ;;  %v1315_v41 = vor.u32 4788187, %v1314_v50 }
 0x37d   :  { %v1325_v40 = vsel %vm5971_vm2, 0, %v1323_v2  ;;  %v3028_v0 = vsel %vm3027_vm3, %v3026_v37, 0  ;;  %vm1231_vm6 = vcmp.eq.s32.totalorder %v5895_v34, 2  ;;  %v2970_v56 = vadd.s32 1, %v5961_v46 }
 0x37e   :  { %v3024_v19 = vor.u32 8388608, %v5907_v42  ;;  %v3030_v49 = vand.u32 31, %v3028_v0  ;;  %v1316_v55 = vand.u32 2147483647, %v1315_v41  ;;  %v1318_v36 = vcvt.s32.f32 %v1311_v6 }
 0x37f   :  { %v2967_v9 = vmul.u32 %v5901_v21, %v2951_v31  ;;  %vm2969_vm7 = vc.u32 %v5966_v20, %v5960_v58  ;;  %v4316_v8 = vpop.eup %4315  ;;  %v1329_v5 = vadd.s32 3, %v1325_v40  ;;  %v5988_v27 = vshrl.u32 %v3028_v0, 5 }
 0x380   :  { %v2971_v38 = vsel %vm2969_vm7, %v2970_v56, %v5961_v46  ;;  %v3031_v53 = vsub.s32 32, %v3030_v49  ;;  %v4318_v54 = vpop.eup %4317  ;;  %v1232_v61 = vxor.u32 2147483648, %v4316_v8  ;;  %v1319_v52 = vmul.f32 %v1318_v36, %v1316_v55 }
 0x381   :  { %v2972_v18 = vadd.s32 %v2971_v38, %v2967_v9  ;;  %v3033_v42 = vshll.u32 %v7551_v35, %v3030_v49  ;;  %v1229_v12 = vxor.u32 2147483648, %v4318_v54  ;;  %v3036_v21 = vshll.u32 %v7543_v62, %v3030_v49 }
 0x382   :  { %v3034_v11 = vshrl.u32 %v7543_v62, %v3031_v53  ;;  %v3037_v45 = vshrl.u32 %v7544_v1, %v3031_v53  ;;  %v1233_v51 = vsel %vm1231_vm6, %v1232_v61, %v4318_v54  ;;  %v1320_v28 = vxor.u32 2147483648, %v1319_v52 }
 0x383   :  { %v2973_v43 = vadd.s32 536870912, %v2972_v18  ;;  %v3040_v13 = vshrl.u32 %v7545_v60, %v3031_v53  ;;  %v1230_v37 = vsel %vm1228_vm5, %v4316_v8, %v1229_v12  ;;  %v3039_v46 = vshll.u32 %v7544_v1, %v3030_v49 }
 0x384   :  { %v3035_v2 = vor.u32 %v3034_v11, %v3033_v42  ;;  %v3038_v7 = vor.u32 %v3037_v45, %v3036_v21  ;;  %v1234_v6 = vsel %vm1227_vm1, %v1230_v37, %v1233_v51  ;;  %v1321_v50 = vsel %vm1238_vm11, %v1320_v28, %v1319_v52 }
 0x385   :  { %v2974_v25 = vshrl.u32 %v2973_v43, 30  ;;  %v3042_v31 = vshll.u32 %v7545_v60, %v3030_v49  ;;  %v1235_v41 = vsel %vm1224_vm4, nan, %v1234_v6  ;;  %v1324_v40 = vsel %vm5971_vm2, %v5685_v48, %v1321_v50 }
 0x386   :  { %v3041_v0 = vor.u32 %v3040_v13, %v3039_v46  ;;  %v3043_v56 = vshrl.u32 %v7546_v63, %v3031_v53  ;;  %4319 = vcosq.f32 %v1324_v40  ;;  %2178 = vst [vmem:[#allocation2 + $0x30] sm:$0xff] %v1235_v41  ;;  %v3045_v55 = vshll.u32 %v7546_v63, %v3030_v49 }
 0x387   :  { %v2975_v34 = vshll.u32 %v2974_v25, 30  ;;  %v3046_v36 = vshrl.u32 %v7552_v59, %v3031_v53  ;;  %4321 = vsinq.f32 %v1324_v40  ;;  %v1330_v9 = vand.u32 3, %v1329_v5 }
 0x388   :  { %v3044_v8 = vor.u32 %v3043_v56, %v3042_v31  ;;  %v6013_v38 = vshll.u32 %v3024_v19, 8  ;;  %vm3048_vm8 = vcmp.lt.s32.totalorder %v5988_v27, 1  ;;  %v437_v47 = vmul.f32 %v7584_v29, %v4583_v23 }
 0x389   :  { %v6015_v17 = vsub.s32 %v2972_v18, %v2975_v34  ;;  %v3047_v54 = vor.u32 %v3046_v36, %v3045_v55  ;;  %v3032_v61 = vshrl.u32 %v7551_v35, %v3031_v53  ;;  %vm3051_vm10 = vcmp.lt.s32.totalorder %v5988_v27, 4 }
 0x38a   :  { %v3056_v49 = vsel %vm3048_vm8, %v3035_v2, %v3038_v7  ;;  %v452_v5 = vadd.f32 %v5893_v3, %v5884_v10  ;;  %vm3050_vm9 = vcmp.lt.s32.totalorder %v5988_v27, 3  ;;  %v3053_v52 = vsel %vm3051_vm10, %v3041_v0, 2102212464  ;;  %v6036_v3 = vpop.permute.xlu0 %477 }
 0x38b   :  { %v2978_v19 = vsub.s32 0, %v6015_v17  ;;  %v3057_v18 = vsel %vm3051_vm10, %v3044_v8, 920167782  ;;  %v2998_v42 = vsub.s32 4, %v2974_v25  ;;  %vm3049_vm11 = vcmp.lt.s32.totalorder %v5988_v27, 2 }
 0x38c   :  { %v3058_v12 = vsel %vm3050_vm9, %v3041_v0, %v3057_v18  ;;  %v3061_v11 = vsel %vm3051_vm10, %v3047_v54, 1326507024  ;;  %v3052_v21 = vsel %vm3048_vm8, %v3032_v61, %v3035_v2  ;;  %v3060_v10 = vsel %vm3048_vm8, %v3038_v7, %v3041_v0 }
 0x38d   :  { %v4074_v53 = vmin.u32 %v2978_v19, %v6015_v17  ;;  %v3059_v45 = vsel %vm3049_vm11, %v3056_v49, %v3058_v12  ;;  %vm1328_vm12 = vweird.f32 %v5685_v48  ;;  %v3054_v51 = vsel %vm3050_vm9, %v3038_v7, %v3053_v52 }
 0x38e   :  { %v3062_v28 = vsel %vm3050_vm9, %v3044_v8, %v3061_v11  ;;  %v6040_v43 = vmul.u32.u64.low %v6013_v38, %v3059_v45  ;;  %v6041_v13 = vmul.u32.u64.high %v6013_v38, %v3059_v45, %v6040_v43  ;;  %vm1331_vm13 = vcmp.lt.s32.totalorder %v1330_v9, 2 }
 0x38f   :  { %vm6046_vm14 = vcmp.le.f32.partialorder %v2912_v33, 0.7853982  ;;  %vm2914_vm15 = vcmp.lt.s32.totalorder %v5802_v57, 0  ;;  %v2980_v2 = vclz %v4074_v53  ;;  %vm1332_vm0 = vcmp.eq.s32.totalorder %v1330_v9, 0 }
 0x390   :  { %vm1335_vm1 = vcmp.eq.s32.totalorder %v1330_v9, 2  ;;  %v3063_v7 = vsel %vm3049_vm11, %v3060_v10, %v3062_v28  ;;  %v6054_v46 = vadd.f32 %v6036_v3, %v452_v5  ;;  %v4320_v6 = vpop.eup %4319  ;;  %v3055_v31 = vsel %vm3049_vm11, %v3052_v21, %v3054_v51 }
 0x391   :  { %v4075_v50 = vadd.s32 4294967294, %v2980_v2  ;;  %v6059_v33 = vmul.u32.u64.low %v6013_v38, %v3063_v7  ;;  %v6060_v41 = vmul.u32.u64.high %v6013_v38, %v3063_v7, %v6059_v33  ;;  %v4322_v40 = vpop.eup %4321  ;;  %v1336_v0 = vxor.u32 2147483648, %v4320_v6 }
 0x392   :  { %v2968_v56 = vadd.s32 %v5960_v58, %v5966_v20  ;;  %v2999_v34 = vsel %vm2914_vm15, %v2998_v42, %v2974_v25  ;;  %v453_v55 = vadd.f32 %v437_v47, %v5888_v26  ;;  %v1333_v36 = vxor.u32 2147483648, %v4322_v40 }
 0x393   :  { %vm4076_vm2 = vcmp.lt.s32.totalorder %v4075_v50, 0  ;;  %v3074_v8 = vadd.s32 1, %v6041_v13  ;;  %v1343_v27 = vand.u32 2139095040, %v6054_v46  ;;  %v1337_v54 = vsel %vm1335_vm1, %v1336_v0, %v4322_v40 }
 0x394   :  { %v2983_v61 = vsel %vm4076_vm2, 0, %v4075_v50  ;;  %v3071_v49 = vmul.u32 %v6013_v38, %v3055_v31  ;;  %v1340_v5 = vand.u32 2147483647, %v6054_v46  ;;  %v1334_v58 = vsel %vm1332_vm0, %v4320_v6, %v1333_v36 }
 0x395   :  { %v2984_v20 = vsub.s32 32, %v2983_v61  ;;  %v2988_v19 = vsub.s32 4294967266, %v2983_v61  ;;  %v6074_v25 = vadd.f32 %v6036_v3, %v453_v55  ;;  %v1338_v26 = vsel %vm1331_vm13, %v1334_v58, %v1337_v54 }
 0x396   :  { %v2985_v47 = vshll.u32 %v6015_v17, %v2983_v61  ;;  %vm3073_vm3 = vc.u32 %v6060_v41, %v6040_v43  ;;  %v1344_v52 = vshrl.u32 %v1343_v27, 23  ;;  %v1339_v38 = vsel %vm1328_vm12, nan, %v1338_v26 }
 0x397   :  { %v2986_v18 = vshrl.u32 %v2968_v56, %v2984_v20  ;;  %v2989_v42 = vadd.s32 127, %v2988_v19  ;;  %v3075_v12 = vsel %vm3073_vm3, %v3074_v8, %v6041_v13  ;;  %2179 = vst [vmem:[#allocation2 + $0x38] sm:$0xff] %v1339_v38  ;;  %v3001_v11 = vsel %vm6046_vm14, 0, %v2999_v34 }
 0x398   :  { %v3076_v53 = vadd.s32 %v3075_v12, %v3071_v49  ;;  %v4017_v9 = vadd.s32 4294967169, %v1344_v52  ;;  %v1347_v17 = vand.u32 8388607, %v1340_v5  ;;  %v1447_v10 = vand.u32 2139095040, %v6074_v25 }
 0x399   :  { %v2987_v21 = vor.u32 %v2986_v18, %v2985_v47  ;;  %v2990_v45 = vshll.u32 %v2989_v42, 23  ;;  %v2214_v28 = vmul.f32 %v4579_v16, %v7583_v39  ;;  %v3005_v13 = vadd.s32 3, %v3001_v11 }
 0x39a   :  { %v3077_v51 = vadd.s32 536870912, %v3076_v53  ;;  %v1350_v48 = vadd.s32 1, %v4017_v9  ;;  %v2248_v7 = vmul.f32 %v4585_v24, %v7584_v29  ;;  %v1348_v50 = vor.u32 8388608, %v1347_v17 }
 0x39b   :  { %v2991_v2 = vor.u32 4788187, %v2990_v45  ;;  %v1444_v31 = vand.u32 2147483647, %v6074_v25  ;;  %v2994_v40 = vcvt.s32.f32 %v2987_v21  ;;  %v1448_v56 = vshrl.u32 %v1447_v10, 23 }
 0x39c   :  { %v3078_v6 = vshrl.u32 %v3077_v51, 30  ;;  %vm1351_vm4 = vcmp.gt.s32.totalorder %v1350_v48, 0  ;;  %v6095_v34 = vmul.f32 %v4598_v32, %v7583_v39  ;;  %v6097_v27 = vand.u32 3, %v3005_v13 }
 0x39d   :  { %v2992_v33 = vand.u32 2147483647, %v2991_v2  ;;  %v1352_v0 = vsel %vm1351_vm4, %v1350_v48, 0  ;;  %vm3018_vm5 = vcmp.lt.s32.totalorder %v5862_v44, 0  ;;  %v6102_v54 = vmul.f32 %v4595_v30, %v7584_v29 }
 0x39e   :  { %v3079_v55 = vshll.u32 %v3078_v6, 30  ;;  %v1354_v36 = vand.u32 31, %v1352_v0  ;;  %v6104_v61 = vadd.f32 %v2248_v7, %v2214_v28  ;;  %v3072_v49 = vadd.s32 %v6040_v43, %v6060_v41 }
 0x39f   :  { %v2995_v8 = vmul.f32 %v2994_v40, %v2992_v33  ;;  %v6110_v20 = vshll.u32 %v1348_v50, 8  ;;  %v3102_v26 = vsub.s32 4, %v3078_v6  ;;  %v4021_v47 = vadd.s32 4294967169, %v1448_v56 }
 0x3a0   :  { %v6108_v58 = vsub.s32 %v3076_v53, %v3079_v55  ;;  %v1355_v39 = vsub.s32 32, %v1354_v36  ;;  %v6114_v52 = vand.u32 8388607, %v1444_v31  ;;  %v1353_v38 = vshrl.u32 %v1352_v0, 5 }
 0x3a1   :  { %v2996_v19 = vxor.u32 2147483648, %v2995_v8  ;;  %v1357_v18 = vshll.u32 %v7551_v35, %v1354_v36  ;;  %v1360_v41 = vshll.u32 %v7543_v62, %v1354_v36  ;;  %v1363_v17 = vshll.u32 %v7544_v1, %v1354_v36 }
 0x3a2   :  { %v3082_v29 = vsub.s32 0, %v6108_v58  ;;  %v1358_v42 = vshrl.u32 %v7543_v62, %v1355_v39  ;;  %v1361_v12 = vshrl.u32 %v7544_v1, %v1355_v39  ;;  %v1364_v11 = vshrl.u32 %v7545_v60, %v1355_v39 }
 0x3a3   :  { %v2997_v43 = vsel %vm2914_vm15, %v2996_v19, %v2995_v8  ;;  %v1366_v21 = vshll.u32 %v7545_v60, %v1354_v36  ;;  %v1367_v51 = vshrl.u32 %v7546_v63, %v1355_v39  ;;  %v1454_v2 = vadd.s32 1, %v4021_v47 }
 0x3a4   :  { %v3000_v53 = vsel %vm6046_vm14, %v5802_v57, %v2997_v43  ;;  %v4078_v9 = vmin.u32 %v3082_v29, %v6108_v58  ;;  %v1359_v45 = vor.u32 %v1358_v42, %v1357_v18  ;;  %v1362_v10 = vor.u32 %v1361_v12, %v1360_v41 }
 0x3a5   :  { %4323 = vcosq.f32 %v3000_v53  ;;  %v1365_v28 = vor.u32 %v1364_v11, %v1363_v17  ;;  %v1356_v13 = vshrl.u32 %v7551_v35, %v1355_v39  ;;  %v1368_v7 = vor.u32 %v1367_v51, %v1366_v21 }
 0x3a6   :  { %4325 = vsinq.f32 %v3000_v53  ;;  %v3084_v48 = vclz %v4078_v9  ;;  %v1369_v37 = vshll.u32 %v7546_v63, %v1354_v36  ;;  %v1370_v50 = vshrl.u32 %v7552_v59, %v1355_v39 }
 0x3a7   :  { %v6136_v40 = vsel %vm3018_vm5, %v3102_v26, %v3078_v6  ;;  %vm1372_vm6 = vcmp.lt.s32.totalorder %v1353_v38, 1  ;;  %vm1374_vm7 = vcmp.lt.s32.totalorder %v1353_v38, 3  ;;  %vm6140_vm8 = vcmp.le.f32.partialorder %v3016_v4, 0.7853982 }
 0x3a8   :  { %v4079_v33 = vadd.s32 4294967294, %v3084_v48  ;;  %v1371_v56 = vor.u32 %v1370_v50, %v1369_v37  ;;  %vm1375_vm10 = vcmp.lt.s32.totalorder %v1353_v38, 4  ;;  %v1376_v55 = vsel %vm1372_vm6, %v1356_v13, %v1359_v45 }
 0x3a9   :  { %v1380_v8 = vsel %vm1372_vm6, %v1359_v45, %v1362_v10  ;;  %vm3008_vm9 = vcmp.eq.s32.totalorder %v6097_v27, 0  ;;  %v1377_v36 = vsel %vm1375_vm10, %v1365_v28, 2102212464  ;;  %v1381_v39 = vsel %vm1375_vm10, %v1368_v7, 920167782 }
 0x3aa   :  { %vm4080_vm11 = vcmp.lt.s32.totalorder %v4079_v33, 0  ;;  %v1384_v19 = vsel %vm1372_vm6, %v1362_v10, %v1365_v28  ;;  %vm3007_vm12 = vcmp.lt.s32.totalorder %v6097_v27, 2  ;;  %v1378_v26 = vsel %vm1374_vm7, %v1362_v10, %v1377_v36 }
 0x3ab   :  { %v3087_v6 = vsel %vm4080_vm11, 0, %v4079_v33  ;;  %v1382_v4 = vsel %vm1374_vm7, %v1365_v28, %v1381_v39  ;;  %v1385_v47 = vsel %vm1375_vm10, %v1371_v56, 1326507024  ;;  %vm3004_vm13 = vweird.f32 %v5802_v57 }
 0x3ac   :  { %v3088_v29 = vsub.s32 32, %v3087_v6  ;;  %v3089_v18 = vshll.u32 %v6108_v58, %v3087_v6  ;;  %v3092_v42 = vsub.s32 4294967266, %v3087_v6  ;;  %vm1373_vm14 = vcmp.lt.s32.totalorder %v1353_v38, 2 }
 0x3ad   :  { %v1379_v43 = vsel %vm1373_vm14, %v1376_v55, %v1378_v26  ;;  %v1383_v41 = vsel %vm1373_vm14, %v1380_v8, %v1382_v4  ;;  %v1386_v12 = vsel %vm1374_vm7, %v1368_v7, %v1385_v47  ;;  %vm1455_vm15 = vcmp.gt.s32.totalorder %v1454_v2, 0 }
 0x3ae   :  { %v3090_v11 = vshrl.u32 %v3072_v49, %v3088_v29  ;;  %v3093_v53 = vadd.s32 127, %v3092_v42  ;;  %v1387_v9 = vsel %vm1373_vm14, %v1384_v19, %v1386_v12  ;;  %v1456_v17 = vsel %vm1455_vm15, %v1454_v2, 0 }
 0x3af   :  { %v4324_v21 = vpop.eup %4323  ;;  %v6152_v45 = vmul.u32.u64.low %v6110_v20, %v1387_v9  ;;  %v6153_v10 = vmul.u32.u64.high %v6110_v20, %v1387_v9, %v6152_v45  ;;  %v6156_v51 = vmul.u32.u64.low %v6110_v20, %v1383_v41  ;;  %v6157_v48 = vmul.u32.u64.high %v6110_v20, %v1383_v41, %v6156_v51 }
 0x3b0   :  { %v4326_v58 = vpop.eup %4325  ;;  %vm3011_vm0 = vcmp.eq.s32.totalorder %v6097_v27, 2  ;;  %v3012_v38 = vxor.u32 2147483648, %v4324_v21  ;;  %v3091_v28 = vor.u32 %v3090_v11, %v3089_v18  ;;  %v3094_v13 = vshll.u32 %v3093_v53, 23 }
 0x3b1   :  { %v3009_v49 = vxor.u32 2147483648, %v4326_v58  ;;  %v1452_v7 = vor.u32 8388608, %v6114_v52  ;;  %v1458_v2 = vand.u32 31, %v1456_v17  ;;  %v6164_v37 = vadd.f32 %v6104_v61, %v6036_v3 }
 0x3b2   :  { %v3013_v50 = vsel %vm3011_vm0, %v3012_v38, %v4326_v58  ;;  %v3095_v33 = vor.u32 4788187, %v3094_v13  ;;  %v3105_v56 = vsel %vm6140_vm8, 0, %v6136_v40  ;;  %v1395_v55 = vmul.u32 %v6110_v20, %v1379_v43 }
 0x3b3   :  { %v3010_v8 = vsel %vm3008_vm9, %v4324_v21, %v3009_v49  ;;  %vm1397_vm1 = vc.u32 %v6153_v10, %v6156_v51  ;;  %v1398_v52 = vadd.s32 1, %v6157_v48  ;;  %v6175_v36 = vshrl.u32 %v1456_v17, 5 }
 0x3b4   :  { %v3014_v61 = vsel %vm3007_vm12, %v3010_v8, %v3013_v50  ;;  %v3096_v39 = vand.u32 2147483647, %v3095_v33  ;;  %v3098_v19 = vcvt.s32.f32 %v3091_v28  ;;  %v1459_v6 = vsub.s32 32, %v1458_v2 }
 0x3b5   :  { %v3015_v40 = vsel %vm3004_vm13, nan, %v3014_v61  ;;  %v1399_v20 = vsel %vm1397_vm1, %v1398_v52, %v6157_v48  ;;  %v1461_v26 = vshll.u32 %v7551_v35, %v1458_v2  ;;  %v1464_v4 = vshll.u32 %v7543_v62, %v1458_v2 }
 0x3b6   :  { %v3099_v47 = vmul.f32 %v3098_v19, %v3096_v39  ;;  %3959 = vst [vmem:[#allocation2 + $0xb0] sm:$0xff] %v3015_v40  ;;  %v1400_v29 = vadd.s32 %v1399_v20, %v1395_v55  ;;  %v1462_v18 = vshrl.u32 %v7543_v62, %v1459_v6  ;;  %v1467_v27 = vshll.u32 %v7544_v1, %v1458_v2 }
 0x3b7   :  { %v1465_v42 = vshrl.u32 %v7544_v1, %v1459_v6  ;;  %v1468_v43 = vshrl.u32 %v7545_v60, %v1459_v6  ;;  %v1470_v57 = vshll.u32 %v7545_v60, %v1458_v2  ;;  %v1471_v41 = vshrl.u32 %v7546_v63, %v1459_v6 }
 0x3b8   :  { %v3100_v12 = vxor.u32 2147483648, %v3099_v47  ;;  %v1401_v11 = vadd.s32 536870912, %v1400_v29  ;;  %v1463_v53 = vor.u32 %v1462_v18, %v1461_v26  ;;  %v1473_v9 = vshll.u32 %v7546_v63, %v1458_v2 }
 0x3b9   :  { %v1466_v17 = vor.u32 %v1465_v42, %v1464_v4  ;;  %v1469_v21 = vor.u32 %v1468_v43, %v1467_v27  ;;  %v1472_v45 = vor.u32 %v1471_v41, %v1470_v57  ;;  %v1474_v48 = vshrl.u32 %v7552_v59, %v1459_v6 }
 0x3ba   :  { %v3101_v58 = vsel %vm3018_vm5, %v3100_v12, %v3099_v47  ;;  %v3109_v38 = vadd.s32 3, %v3105_v56  ;;  %v1402_v28 = vshrl.u32 %v1401_v11, 30  ;;  %v1492_v13 = vshll.u32 %v1452_v7, 8 }
 0x3bb   :  { %v3104_v49 = vsel %vm6140_vm8, %v5862_v44, %v3101_v58  ;;  %v1460_v50 = vshrl.u32 %v7551_v35, %v1459_v6  ;;  %v1475_v33 = vor.u32 %v1474_v48, %v1473_v9  ;;  %vm1476_vm2 = vcmp.lt.s32.totalorder %v6175_v36, 1 }
 0x3bc   :  { %4327 = vcosq.f32 %v3104_v49  ;;  %v1403_v2 = vshll.u32 %v1402_v28, 30  ;;  %vm1478_vm3 = vcmp.lt.s32.totalorder %v6175_v36, 3  ;;  %vm1479_vm4 = vcmp.lt.s32.totalorder %v6175_v36, 4 }
 0x3bd   :  { %4329 = vsinq.f32 %v3104_v49  ;;  %v1481_v55 = vsel %vm1479_vm4, %v1469_v21, 2102212464  ;;  %v1484_v56 = vsel %vm1476_vm2, %v1463_v53, %v1466_v17  ;;  %v1485_v8 = vsel %vm1479_vm4, %v1472_v45, 920167782 }
 0x3be   :  { %v3110_v7 = vand.u32 3, %v3109_v38  ;;  %v6201_v52 = vsub.s32 %v1400_v29, %v1403_v2  ;;  %vm1477_vm5 = vcmp.lt.s32.totalorder %v6175_v36, 2  ;;  %v1486_v0 = vsel %vm1478_vm3, %v1469_v21, %v1485_v8 }
 0x3bf   :  { %v1480_v61 = vsel %vm1476_vm2, %v1460_v50, %v1463_v53  ;;  %v1487_v39 = vsel %vm1477_vm5, %v1484_v56, %v1486_v0  ;;  %v1488_v19 = vsel %vm1476_vm2, %v1466_v17, %v1469_v21  ;;  %v1489_v6 = vsel %vm1479_vm4, %v1475_v33, 1326507024 }
 0x3c0   :  { %v1406_v40 = vsub.s32 0, %v6201_v52  ;;  %v1426_v20 = vsub.s32 4, %v1402_v28  ;;  %v1482_v26 = vsel %vm1478_vm3, %v1466_v17, %v1481_v55  ;;  %v1490_v4 = vsel %vm1478_vm3, %v1472_v45, %v1489_v6 }
 0x3c1   :  { %v1491_v47 = vsel %vm1477_vm5, %v1488_v19, %v1490_v4  ;;  %v6215_v29 = vmul.u32.u64.low %v1492_v13, %v1487_v39  ;;  %v6216_v18 = vmul.u32.u64.high %v1492_v13, %v1487_v39, %v6215_v29  ;;  %v3123_v27 = vand.u32 2139095040, %v6164_v37 }
 0x3c2   :  { %v2265_v42 = vadd.f32 %v6102_v54, %v6095_v34  ;;  %v4018_v43 = vmin.u32 %v1406_v40, %v6201_v52  ;;  %v6222_v57 = vmul.u32.u64.low %v1492_v13, %v1491_v47  ;;  %v6223_v41 = vmul.u32.u64.high %v1492_v13, %v1491_v47, %v6222_v57 }
 0x3c3   :  { %vm3108_vm6 = vweird.f32 %v5862_v44  ;;  %vm6228_vm7 = vcmp.le.f32.partialorder %v1340_v5, 0.7853982  ;;  %vm1342_vm8 = vcmp.lt.s32.totalorder %v6054_v46, 0  ;;  %v1483_v11 = vsel %vm1477_vm5, %v1480_v61, %v1482_v26 }
 0x3c4   :  { %v3124_v53 = vshrl.u32 %v3123_v27, 23  ;;  %v1408_v34 = vclz %v4018_v43  ;;  %v1427_v54 = vsel %vm1342_vm8, %v1426_v20, %v1402_v28  ;;  %v6238_v9 = vadd.f32 %v2265_v42, %v6036_v3 }
 0x3c5   :  { %v3120_v17 = vand.u32 2147483647, %v6164_v37  ;;  %vm3111_vm10 = vcmp.lt.s32.totalorder %v3110_v7, 2  ;;  %vm3112_vm9 = vcmp.eq.s32.totalorder %v3110_v7, 0  ;;  %v1502_v5 = vadd.s32 1, %v6216_v18 }
 0x3c6   :  { %v4081_v21 = vadd.s32 4294967169, %v3124_v53  ;;  %v4328_v45 = vpop.eup %4327  ;;  %vm3115_vm11 = vcmp.eq.s32.totalorder %v3110_v7, 2  ;;  %v4019_v48 = vadd.s32 4294967294, %v1408_v34  ;;  %v1499_v36 = vmul.u32 %v1492_v13, %v1483_v11 }
 0x3c7   :  { %vm1501_vm12 = vc.u32 %v6223_v41, %v6215_v29  ;;  %v4330_v58 = vpop.eup %4329  ;;  %v3116_v38 = vxor.u32 2147483648, %v4328_v45  ;;  %v1429_v28 = vsel %vm6228_vm7, 0, %v1427_v54  ;;  %v1396_v33 = vadd.s32 %v6156_v51, %v6153_v10 }
 0x3c8   :  { %v1503_v3 = vsel %vm1501_vm12, %v1502_v5, %v6216_v18  ;;  %v3130_v49 = vadd.s32 1, %v4081_v21  ;;  %v3113_v50 = vxor.u32 2147483648, %v4330_v58  ;;  %vm4020_vm13 = vcmp.lt.s32.totalorder %v4019_v48, 0 }
 0x3c9   :  { %v1504_v2 = vadd.s32 %v1503_v3, %v1499_v36  ;;  %v3117_v55 = vsel %vm3115_vm11, %v3116_v38, %v4330_v58  ;;  %v1411_v56 = vsel %vm4020_vm13, 0, %v4019_v48  ;;  %v3127_v13 = vand.u32 8388607, %v3120_v17 }
 0x3ca   :  { %vm3131_vm14 = vcmp.gt.s32.totalorder %v3130_v49, 0  ;;  %v3114_v8 = vsel %vm3112_vm9, %v4328_v45, %v3113_v50  ;;  %v1412_v0 = vsub.s32 32, %v1411_v56  ;;  %v1416_v61 = vsub.s32 4294967266, %v1411_v56 }
 0x3cb   :  { %v1433_v39 = vadd.s32 3, %v1429_v28  ;;  %v3118_v19 = vsel %vm3111_vm10, %v3114_v8, %v3117_v55  ;;  %v1505_v6 = vadd.s32 536870912, %v1504_v2  ;;  %v3132_v40 = vsel %vm3131_vm14, %v3130_v49, 0 }
 0x3cc   :  { %v3227_v20 = vand.u32 2139095040, %v6238_v9  ;;  %v3119_v10 = vsel %vm3108_vm6, nan, %v3118_v19  ;;  %v1413_v51 = vshll.u32 %v6201_v52, %v1411_v56  ;;  %v1414_v26 = vshrl.u32 %v1396_v33, %v1412_v0 }
 0x3cd   :  { %v1417_v4 = vadd.s32 127, %v1416_v61  ;;  %3960 = vst [vmem:[#allocation2 + $0xb8] sm:$0xff] %v3119_v10  ;;  %v6256_v47 = vshrl.u32 %v1505_v6, 30  ;;  %v3128_v18 = vor.u32 8388608, %v3127_v13  ;;  %v3134_v27 = vand.u32 31, %v3132_v40 }
 0x3ce   :  { %v1415_v42 = vor.u32 %v1414_v26, %v1413_v51  ;;  %v3228_v11 = vshrl.u32 %v3227_v20, 23  ;;  %v6259_v34 = vand.u32 3, %v1433_v39  ;;  %v1500_v44 = vadd.s32 %v6215_v29, %v6223_v41 }
 0x3cf   :  { %v1418_v43 = vshll.u32 %v1417_v4, 23  ;;  %v1507_v7 = vshll.u32 %v6256_v47, 30  ;;  %v3135_v57 = vsub.s32 32, %v3134_v27  ;;  %v3224_v52 = vand.u32 2147483647, %v6238_v9 }
 0x3d0   :  { %v3133_v5 = vshrl.u32 %v3132_v40, 5  ;;  %v6266_v45 = vshll.u32 %v3128_v18, 8  ;;  %v1422_v36 = vcvt.s32.f32 %v1415_v42  ;;  %v3137_v3 = vshll.u32 %v7551_v35, %v3134_v27 }
 0x3d1   :  { %v1419_v53 = vor.u32 4788187, %v1418_v43  ;;  %v6263_v54 = vsub.s32 %v1504_v2, %v1507_v7  ;;  %v3138_v21 = vshrl.u32 %v7543_v62, %v3135_v57  ;;  %v3141_v58 = vshrl.u32 %v7544_v1, %v3135_v57 }
 0x3d2   :  { %v3144_v38 = vshrl.u32 %v7545_v60, %v3135_v57  ;;  %v3140_v29 = vshll.u32 %v7543_v62, %v3134_v27  ;;  %v4085_v41 = vadd.s32 4294967169, %v3228_v11  ;;  %v3143_v50 = vshll.u32 %v7544_v1, %v3134_v27 }
 0x3d3   :  { %v1420_v48 = vand.u32 2147483647, %v1419_v53  ;;  %v1510_v28 = vsub.s32 0, %v6263_v54  ;;  %v3146_v33 = vshll.u32 %v7545_v60, %v3134_v27  ;;  %v3147_v2 = vshrl.u32 %v7546_v63, %v3135_v57 }
 0x3d4   :  { %v3139_v56 = vor.u32 %v3138_v21, %v3137_v3  ;;  %v3142_v13 = vor.u32 %v3141_v58, %v3140_v29  ;;  %v3150_v8 = vshrl.u32 %v7552_v59, %v3135_v57  ;;  %v3145_v61 = vor.u32 %v3144_v38, %v3143_v50 }
 0x3d5   :  { %v1423_v49 = vmul.f32 %v1422_v36, %v1420_v48  ;;  %v4022_v55 = vmin.u32 %v1510_v28, %v6263_v54  ;;  %v3148_v39 = vor.u32 %v3147_v2, %v3146_v33  ;;  %v3149_v19 = vshll.u32 %v7546_v63, %v3134_v27 }
 0x3d6   :  { %vm1446_vm15 = vcmp.lt.s32.totalorder %v6074_v25, 0  ;;  %v1530_v40 = vsub.s32 4, %v6256_v47  ;;  %vm3152_vm0 = vcmp.lt.s32.totalorder %v3133_v5, 1  ;;  %vm3153_vm1 = vcmp.lt.s32.totalorder %v3133_v5, 2 }
 0x3d7   :  { %v1424_v0 = vxor.u32 2147483648, %v1423_v49  ;;  %v1512_v6 = vclz %v4022_v55  ;;  %v3136_v10 = vshrl.u32 %v7551_v35, %v3135_v57  ;;  %v3151_v51 = vor.u32 %v3150_v8, %v3149_v19 }
 0x3d8   :  { %vm3154_vm2 = vcmp.lt.s32.totalorder %v3133_v5, 3  ;;  %vm3155_vm3 = vcmp.lt.s32.totalorder %v3133_v5, 4  ;;  %v3160_v18 = vsel %vm3152_vm0, %v3139_v56, %v3142_v13  ;;  %v3164_v43 = vsel %vm3152_vm0, %v3142_v13, %v3145_v61 }
 0x3d9   :  { %v1425_v20 = vsel %vm1342_vm8, %v1424_v0, %v1423_v49  ;;  %v4023_v4 = vadd.s32 4294967294, %v1512_v6  ;;  %v3157_v27 = vsel %vm3155_vm3, %v3145_v61, 2102212464  ;;  %v3161_v42 = vsel %vm3155_vm3, %v3148_v39, 920167782 }
 0x3da   :  { %v1428_v26 = vsel %vm6228_vm7, %v6054_v46, %v1425_v20  ;;  %v3162_v7 = vsel %vm3154_vm2, %v3145_v61, %v3161_v42  ;;  %v3165_v57 = vsel %vm3155_vm3, %v3151_v51, 1326507024  ;;  %v3156_v53 = vsel %vm3152_vm0, %v3136_v10, %v3139_v56 }
 0x3db   :  { %4331 = vcosq.f32 %v1428_v26  ;;  %vm4024_vm4 = vcmp.lt.s32.totalorder %v4023_v4, 0  ;;  %v3163_v12 = vsel %vm3153_vm1, %v3160_v18, %v3162_v7  ;;  %v3166_v21 = vsel %vm3154_vm2, %v3148_v39, %v3165_v57 }
 0x3dc   :  { %4333 = vsinq.f32 %v1428_v26  ;;  %v1515_v11 = vsel %vm4024_vm4, 0, %v4023_v4  ;;  %v3158_v58 = vsel %vm3154_vm2, %v3142_v13, %v3157_v27  ;;  %v3167_v38 = vsel %vm3153_vm1, %v3164_v43, %v3166_v21 }
 0x3dd   :  { %v1516_v48 = vsub.s32 32, %v1515_v11  ;;  %v1520_v36 = vsub.s32 4294967266, %v1515_v11  ;;  %v6296_v28 = vmul.u32.u64.low %v6266_v45, %v3167_v38  ;;  %v6297_v3 = vmul.u32.u64.high %v6266_v45, %v3167_v38, %v6296_v28 }
 0x3de   :  { %v6300_v29 = vmul.u32.u64.low %v6266_v45, %v3163_v12  ;;  %v6301_v49 = vmul.u32.u64.high %v6266_v45, %v3163_v12, %v6300_v29  ;;  %v1517_v50 = vshll.u32 %v6263_v54, %v1515_v11  ;;  %v3234_v55 = vadd.s32 1, %v4085_v41 }
 0x3df   :  { %v1518_v33 = vshrl.u32 %v1500_v44, %v1516_v48  ;;  %v1521_v2 = vadd.s32 127, %v1520_v36  ;;  %vm6307_vm5 = vcmp.le.f32.partialorder %v1444_v31, 0.7853982  ;;  %v1531_v13 = vsel %vm1446_vm15, %v1530_v40, %v6256_v47 }
 0x3e0   :  { %v3159_v8 = vsel %vm3153_vm1, %v3156_v53, %v3158_v58  ;;  %vm1432_vm6 = vweird.f32 %v6054_v46  ;;  %vm1435_vm7 = vcmp.lt.s32.totalorder %v6259_v34, 2  ;;  %vm3235_vm8 = vcmp.gt.s32.totalorder %v3234_v55, 0 }
 0x3e1   :  { %v1519_v54 = vor.u32 %v1518_v33, %v1517_v50  ;;  %v1522_v44 = vshll.u32 %v1521_v2, 23  ;;  %vm3177_vm10 = vc.u32 %v6297_v3, %v6300_v29  ;;  %v3178_v31 = vadd.s32 1, %v6301_v49 }
 0x3e2   :  { %v3231_v41 = vand.u32 8388607, %v3224_v52  ;;  %v3236_v0 = vsel %vm3235_vm8, %v3234_v55, 0  ;;  %v1533_v47 = vsel %vm6307_vm5, 0, %v1531_v13  ;;  %v3175_v5 = vmul.u32 %v6266_v45, %v3159_v8 }
 0x3e3   :  { %v1523_v61 = vor.u32 4788187, %v1522_v44  ;;  %v3238_v39 = vand.u32 31, %v3236_v0  ;;  %vm1436_vm9 = vcmp.eq.s32.totalorder %v6259_v34, 0  ;;  %vm1439_vm11 = vcmp.eq.s32.totalorder %v6259_v34, 2 }
 0x3e4   :  { %v1526_v6 = vcvt.s32.f32 %v1519_v54  ;;  %v3179_v40 = vsel %vm3177_vm10, %v3178_v31, %v6301_v49  ;;  %v1537_v27 = vadd.s32 3, %v1533_v47  ;;  %v3232_v42 = vor.u32 8388608, %v3231_v41 }
 0x3e5   :  { %v4332_v19 = vpop.eup %4331  ;;  %v1524_v51 = vand.u32 2147483647, %v1523_v61  ;;  %v3180_v26 = vadd.s32 %v3179_v40, %v3175_v5  ;;  %v3239_v4 = vsub.s32 32, %v3238_v39  ;;  %v6328_v43 = vshrl.u32 %v3236_v0, 5 }
 0x3e6   :  { %v4334_v20 = vpop.eup %4333  ;;  %v1440_v10 = vxor.u32 2147483648, %v4332_v19  ;;  %v3241_v11 = vshll.u32 %v7551_v35, %v3238_v39  ;;  %v3244_v28 = vshll.u32 %v7543_v62, %v3238_v39  ;;  %v3247_v33 = vshll.u32 %v7544_v1, %v3238_v39 }
 0x3e7   :  { %v1437_v18 = vxor.u32 2147483648, %v4334_v20  ;;  %v1527_v7 = vmul.f32 %v1526_v6, %v1524_v51  ;;  %v3181_v57 = vadd.s32 536870912, %v3180_v26  ;;  %v3242_v12 = vshrl.u32 %v7543_v62, %v3239_v4 }
 0x3e8   :  { %v1441_v45 = vsel %vm1439_vm11, %v1440_v10, %v4334_v20  ;;  %v3245_v21 = vshrl.u32 %v7544_v1, %v3239_v4  ;;  %v3248_v48 = vshrl.u32 %v7545_v60, %v3239_v4  ;;  %v3250_v2 = vshll.u32 %v7545_v60, %v3238_v39 }
 0x3e9   :  { %v1438_v53 = vsel %vm1436_vm9, %v4332_v19, %v1437_v18  ;;  %v1528_v58 = vxor.u32 2147483648, %v1527_v7  ;;  %v3182_v38 = vshrl.u32 %v3181_v57, 30  ;;  %v3243_v50 = vor.u32 %v3242_v12, %v3241_v11 }
 0x3ea   :  { %v1442_v36 = vsel %vm1435_vm7, %v1438_v53, %v1441_v45  ;;  %v3246_v8 = vor.u32 %v3245_v21, %v3244_v28  ;;  %v3251_v34 = vshrl.u32 %v7546_v63, %v3239_v4  ;;  %v3249_v44 = vor.u32 %v3248_v48, %v3247_v33  ;;  %v7596_v21 = vld [vmem:[#allocation6_spill] sm:$0xff] }
 0x3eb   :  { %v1443_v49 = vsel %vm1432_vm6, nan, %v1442_v36  ;;  %v1529_v55 = vsel %vm1446_vm15, %v1528_v58, %v1527_v7  ;;  %v3183_v13 = vshll.u32 %v3182_v38, 30  ;;  %v3253_v46 = vshll.u32 %v7546_v63, %v3238_v39 }
 0x3ec   :  { %2180 = vst [vmem:[#allocation2 + $0x40] sm:$0xff] %v1443_v49  ;;  %v1532_v54 = vsel %vm6307_vm5, %v6074_v25, %v1529_v55  ;;  %v3254_v31 = vshrl.u32 %v7552_v59, %v3239_v4  ;;  %v3252_v0 = vor.u32 %v3251_v34, %v3250_v2  ;;  %v6353_v61 = vand.u32 3, %v1537_v27  ;;  %v7595_v27 = vld [vmem:[#allocation13_spill] sm:$0xff]  ;;  %v6397_v49 = vpop.permute.xlu1 %481 }
 0x3ed   :  { %4335 = vcosq.f32 %v1532_v54  ;;  %v6351_v41 = vsub.s32 %v3180_v26, %v3183_v13  ;;  %vm3122_vm12 = vcmp.lt.s32.totalorder %v6164_v37, 0  ;;  %vm3256_vm13 = vcmp.lt.s32.totalorder %v6328_v43, 1 }
 0x3ee   :  { %4337 = vsinq.f32 %v1532_v54  ;;  %v3255_v47 = vor.u32 %v3254_v31, %v3253_v46  ;;  %vm3259_vm14 = vcmp.lt.s32.totalorder %v6328_v43, 4  ;;  %v3272_v56 = vshll.u32 %v3232_v42, 8 }
 0x3ef   :  { %v3186_v5 = vsub.s32 0, %v6351_v41  ;;  %vm3258_vm15 = vcmp.lt.s32.totalorder %v6328_v43, 3  ;;  %v3261_v39 = vsel %vm3259_vm14, %v3249_v44, 2102212464  ;;  %v3264_v19 = vsel %vm3256_vm13, %v3243_v50, %v3246_v8 }
 0x3f0   :  { %v3265_v6 = vsel %vm3259_vm14, %v3252_v0, 920167782  ;;  %v3240_v20 = vshrl.u32 %v7551_v35, %v3239_v4  ;;  %vm3257_vm0 = vcmp.lt.s32.totalorder %v6328_v43, 2  ;;  %vm1540_vm1 = vcmp.eq.s32.totalorder %v6353_v61, 0 }
 0x3f1   :  { %v4082_v40 = vmin.u32 %v3186_v5, %v6351_v41  ;;  %v3266_v10 = vsel %vm3258_vm15, %v3249_v44, %v3265_v6  ;;  %v3268_v26 = vsel %vm3256_vm13, %v3246_v8, %v3249_v44  ;;  %v3269_v18 = vsel %vm3259_vm14, %v3255_v47, 1326507024 }
 0x3f2   :  { %v3267_v51 = vsel %vm3257_vm0, %v3264_v19, %v3266_v10  ;;  %v438_v42 = vmul.f32 %v7595_v27, %v4581_v22  ;;  %vm1539_vm2 = vcmp.lt.s32.totalorder %v6353_v61, 2  ;;  %v3206_v45 = vsub.s32 4, %v3182_v38 }
 0x3f3   :  { %v3188_v4 = vclz %v4082_v40  ;;  %v3260_v7 = vsel %vm3256_vm13, %v3240_v20, %v3243_v50  ;;  %v3262_v57 = vsel %vm3258_vm15, %v3246_v8, %v3261_v39  ;;  %vm1536_vm3 = vweird.f32 %v6074_v25 }
 0x3f4   :  { %v3270_v11 = vsel %vm3258_vm15, %v3252_v0, %v3269_v18  ;;  %v6382_v53 = vmul.u32.u64.low %v3272_v56, %v3267_v51  ;;  %v6383_v12 = vmul.u32.u64.high %v3272_v56, %v3267_v51, %v6382_v53  ;;  %v371_v48 = vmul.f32 %v7596_v21, %v4575_v14 }
 0x3f5   :  { %vm1543_vm4 = vcmp.eq.s32.totalorder %v6353_v61, 2  ;;  %vm6391_vm5 = vcmp.le.f32.partialorder %v3120_v17, 0.7853982  ;;  %v4083_v58 = vadd.s32 4294967294, %v3188_v4  ;;  %v3271_v28 = vsel %vm3257_vm0, %v3268_v26, %v3270_v11 }
 0x3f6   :  { %v439_v50 = vmul.f32 %v7595_v27, %v4583_v23  ;;  %v3263_v33 = vsel %vm3257_vm0, %v3260_v7, %v3262_v57  ;;  %v6403_v2 = vmul.u32.u64.low %v3272_v56, %v3271_v28  ;;  %v6404_v55 = vmul.u32.u64.high %v3272_v56, %v3271_v28, %v6403_v2 }
 0x3f7   :  { %v454_v13 = vadd.f32 %v438_v42, %v371_v48  ;;  %v4336_v17 = vpop.eup %4335  ;;  %v3176_v8 = vadd.s32 %v6300_v29, %v6297_v3  ;;  %vm4084_vm6 = vcmp.lt.s32.totalorder %v4083_v58, 0  ;;  %v3207_v34 = vsel %vm3122_vm12, %v3206_v45, %v3182_v38 }
 0x3f8   :  { %v372_v54 = vmul.f32 %v7596_v21, %v4577_v15  ;;  %v4338_v44 = vpop.eup %4337  ;;  %v1544_v46 = vxor.u32 2147483648, %v4336_v17  ;;  %v3191_v31 = vsel %vm4084_vm6, 0, %v4083_v58  ;;  %v3282_v43 = vadd.s32 1, %v6383_v12 }
 0x3f9   :  { %v6414_v0 = vadd.f32 %v6397_v49, %v454_v13  ;;  %v1541_v47 = vxor.u32 2147483648, %v4338_v44  ;;  %v3192_v5 = vsub.s32 32, %v3191_v31  ;;  %v3196_v39 = vsub.s32 4294967266, %v3191_v31 }
 0x3fa   :  { %v3279_v19 = vmul.u32 %v3272_v56, %v3263_v33  ;;  %v1545_v3 = vsel %vm1543_vm4, %v1544_v46, %v4338_v44  ;;  %v3193_v29 = vshll.u32 %v6351_v41, %v3191_v31  ;;  %vm3281_vm7 = vc.u32 %v6404_v55, %v6382_v53 }
 0x3fb   :  { %v455_v38 = vadd.f32 %v439_v50, %v372_v54  ;;  %v1542_v6 = vsel %vm1540_vm1, %v4336_v17, %v1541_v47  ;;  %v3194_v40 = vshrl.u32 %v3176_v8, %v3192_v5  ;;  %v3197_v20 = vadd.s32 127, %v3196_v39 }
 0x3fc   :  { %v3283_v10 = vsel %vm3281_vm7, %v3282_v43, %v6383_v12  ;;  %v1546_v51 = vsel %vm1539_vm2, %v1542_v6, %v1545_v3  ;;  %v1548_v41 = vand.u32 2147483647, %v6414_v0  ;;  %v1551_v45 = vand.u32 2139095040, %v6414_v0 }
 0x3fd   :  { %v3284_v56 = vadd.s32 %v3283_v10, %v3279_v19  ;;  %v6427_v26 = vadd.f32 %v6397_v49, %v455_v38  ;;  %v1547_v18 = vsel %vm1536_vm3, nan, %v1546_v51  ;;  %v3195_v42 = vor.u32 %v3194_v40, %v3193_v29 }
 0x3fe   :  { %v3198_v4 = vshll.u32 %v3197_v20, 23  ;;  %2181 = vst [vmem:[#allocation2 + $0x48] sm:$0xff] %v1547_v18  ;;  %v3209_v7 = vsel %vm6391_vm5, 0, %v3207_v34  ;;  %vm3226_vm8 = vcmp.lt.s32.totalorder %v6238_v9, 0  ;;  %v1552_v11 = vshrl.u32 %v1551_v45, 23 }
 0x3ff   :  { %v3285_v57 = vadd.s32 536870912, %v3284_v56  ;;  %vm6438_vm10 = vcmp.le.f32.partialorder %v3224_v52, 0.7853982  ;;  %v1555_v48 = vand.u32 8388607, %v1548_v41  ;;  %v1655_v28 = vand.u32 2139095040, %v6427_v26 }
 0x400   :  { %v3199_v61 = vor.u32 4788187, %v3198_v4  ;;  %v1652_v58 = vand.u32 2147483647, %v6427_v26  ;;  %v3202_v33 = vcvt.s32.f32 %v3195_v42  ;;  %v3213_v2 = vadd.s32 3, %v3209_v7 }
 0x401   :  { %v3286_v25 = vshrl.u32 %v3285_v57, 30  ;;  %v4025_v13 = vadd.s32 4294967169, %v1552_v11  ;;  %v2216_v52 = vmul.f32 %v4579_v16, %v7596_v21  ;;  %v1656_v34 = vshrl.u32 %v1655_v28, 23 }
 0x402   :  { %v3200_v50 = vand.u32 2147483647, %v3199_v61  ;;  %v6450_v44 = vmul.f32 %v4598_v32, %v7596_v21  ;;  %v2250_v31 = vmul.f32 %v4585_v24, %v7595_v27  ;;  %v1556_v47 = vor.u32 8388608, %v1555_v48 }
 0x403   :  { %v3287_v17 = vshll.u32 %v3286_v25, 30  ;;  %v3310_v8 = vsub.s32 4, %v3286_v25  ;;  %v1558_v46 = vadd.s32 1, %v4025_v13  ;;  %v4029_v5 = vadd.s32 4294967169, %v1656_v34 }
 0x404   :  { %v3203_v54 = vmul.f32 %v3202_v33, %v3200_v50  ;;  %v6458_v39 = vand.u32 8388607, %v1652_v58  ;;  %v6460_v3 = vand.u32 3, %v3213_v2  ;;  %v6464_v21 = vmul.f32 %v4595_v30, %v7595_v27 }
 0x405   :  { %v6454_v43 = vsub.s32 %v3284_v56, %v3287_v17  ;;  %vm1559_vm9 = vcmp.gt.s32.totalorder %v1558_v46, 0  ;;  %v6469_v38 = vsel %vm3226_vm8, %v3310_v8, %v3286_v25  ;;  %v1662_v40 = vadd.s32 1, %v4029_v5 }
 0x406   :  { %v3204_v19 = vxor.u32 2147483648, %v3203_v54  ;;  %v1560_v6 = vsel %vm1559_vm9, %v1558_v46, 0  ;;  %v3280_v10 = vadd.s32 %v6382_v53, %v6404_v55  ;;  %v2266_v56 = vadd.f32 %v2250_v31, %v2216_v52 }
 0x407   :  { %v3290_v29 = vsub.s32 0, %v6454_v43  ;;  %v1562_v51 = vand.u32 31, %v1560_v6  ;;  %v6479_v42 = vshll.u32 %v1556_v47, 8  ;;  %v1660_v4 = vor.u32 8388608, %v6458_v39 }
 0x408   :  { %v3205_v20 = vsel %vm3122_vm12, %v3204_v19, %v3203_v54  ;;  %v3313_v45 = vsel %vm6438_vm10, 0, %v6469_v38  ;;  %v6486_v53 = vadd.f32 %v2266_v56, %v6397_v49  ;;  %v1561_v57 = vshrl.u32 %v1560_v6, 5 }
 0x409   :  { %v3208_v27 = vsel %vm6391_vm5, %v6164_v37, %v3205_v20  ;;  %v4086_v18 = vmin.u32 %v3290_v29, %v6454_v43  ;;  %v1563_v7 = vsub.s32 32, %v1562_v51  ;;  %vm1663_vm11 = vcmp.gt.s32.totalorder %v1662_v40, 0 }
 0x40a   :  { %4339 = vcosq.f32 %v3208_v27  ;;  %v1565_v36 = vshll.u32 %v7551_v35, %v1562_v51  ;;  %v1568_v11 = vshll.u32 %v7543_v62, %v1562_v51  ;;  %v1571_v50 = vshll.u32 %v7544_v1, %v1562_v51 }
 0x40b   :  { %4341 = vsinq.f32 %v3208_v27  ;;  %v3292_v55 = vclz %v4086_v18  ;;  %v1566_v61 = vshrl.u32 %v7543_v62, %v1563_v7  ;;  %v1569_v25 = vshrl.u32 %v7544_v1, %v1563_v7 }
 0x40c   :  { %v1564_v28 = vshrl.u32 %v7551_v35, %v1563_v7  ;;  %v1572_v33 = vshrl.u32 %v7545_v60, %v1563_v7  ;;  %vm3219_vm12 = vcmp.eq.s32.totalorder %v6460_v3, 2  ;;  %v1574_v17 = vshll.u32 %v7545_v60, %v1562_v51 }
 0x40d   :  { %v4087_v48 = vadd.s32 4294967294, %v3292_v55  ;;  %v1567_v2 = vor.u32 %v1566_v61, %v1565_v36  ;;  %v1570_v13 = vor.u32 %v1569_v25, %v1568_v11  ;;  %v1575_v8 = vshrl.u32 %v7546_v63, %v1563_v7 }
 0x40e   :  { %vm3216_vm13 = vcmp.eq.s32.totalorder %v6460_v3, 0  ;;  %v1573_v52 = vor.u32 %v1572_v33, %v1571_v50  ;;  %v1577_v34 = vshll.u32 %v7546_v63, %v1562_v51  ;;  %v1578_v54 = vshrl.u32 %v7552_v59, %v1563_v7 }
 0x40f   :  { %vm4088_vm14 = vcmp.lt.s32.totalorder %v4087_v48, 0  ;;  %vm3215_vm15 = vcmp.lt.s32.totalorder %v6460_v3, 2  ;;  %v1576_v31 = vor.u32 %v1575_v8, %v1574_v17  ;;  %vm1580_vm0 = vcmp.lt.s32.totalorder %v1561_v57, 1 }
 0x410   :  { %v3295_v46 = vsel %vm4088_vm14, 0, %v4087_v48  ;;  %vm1581_vm1 = vcmp.lt.s32.totalorder %v1561_v57, 2  ;;  %vm3212_vm2 = vweird.f32 %v6164_v37  ;;  %v1579_v19 = vor.u32 %v1578_v54, %v1577_v34 }
 0x411   :  { %v3296_v47 = vsub.s32 32, %v3295_v46  ;;  %v3300_v5 = vsub.s32 4294967266, %v3295_v46  ;;  %vm1582_vm3 = vcmp.lt.s32.totalorder %v1561_v57, 3  ;;  %v3297_v29 = vshll.u32 %v6454_v43, %v3295_v46 }
 0x412   :  { %vm1583_vm4 = vcmp.lt.s32.totalorder %v1561_v57, 4  ;;  %v1584_v6 = vsel %vm1580_vm0, %v1564_v28, %v1567_v2  ;;  %v1588_v20 = vsel %vm1580_vm0, %v1567_v2, %v1570_v13  ;;  %v1592_v61 = vsel %vm1580_vm0, %v1570_v13, %v1573_v52 }
 0x413   :  { %v3298_v51 = vshrl.u32 %v3280_v10, %v3296_v47  ;;  %v3301_v56 = vadd.s32 127, %v3300_v5  ;;  %v1585_v27 = vsel %vm1583_vm4, %v1573_v52, 2102212464  ;;  %v1589_v18 = vsel %vm1583_vm4, %v1576_v31, 920167782 }
 0x414   :  { %v4340_v7 = vpop.eup %4339  ;;  %v1586_v55 = vsel %vm1582_vm3, %v1570_v13, %v1585_v27  ;;  %v1590_v36 = vsel %vm1582_vm3, %v1573_v52, %v1589_v18  ;;  %v1593_v11 = vsel %vm1583_vm4, %v1579_v19, 1326507024  ;;  %v1664_v28 = vsel %vm1663_vm11, %v1662_v40, 0 }
 0x415   :  { %v4342_v25 = vpop.eup %4341  ;;  %v3220_v48 = vxor.u32 2147483648, %v4340_v7  ;;  %v3299_v43 = vor.u32 %v3298_v51, %v3297_v29  ;;  %v3302_v50 = vshll.u32 %v3301_v56, 23  ;;  %v1587_v10 = vsel %vm1581_vm1, %v1584_v6, %v1586_v55 }
 0x416   :  { %v3217_v33 = vxor.u32 2147483648, %v4342_v25  ;;  %v1591_v2 = vsel %vm1581_vm1, %v1588_v20, %v1590_v36  ;;  %v1594_v17 = vsel %vm1582_vm3, %v1576_v31, %v1593_v11  ;;  %v6522_v47 = vshrl.u32 %v1664_v28, 5 }
 0x417   :  { %v3221_v8 = vsel %vm3219_vm12, %v3220_v48, %v4342_v25  ;;  %v3303_v34 = vor.u32 4788187, %v3302_v50  ;;  %v3306_v54 = vcvt.s32.f32 %v3299_v43  ;;  %v1595_v13 = vsel %vm1581_vm1, %v1592_v61, %v1594_v17 }
 0x418   :  { %v3218_v52 = vsel %vm3216_vm13, %v4340_v7, %v3217_v33  ;;  %v6519_v46 = vmul.u32.u64.low %v6479_v42, %v1595_v13  ;;  %v6520_v40 = vmul.u32.u64.high %v6479_v42, %v1595_v13, %v6519_v46  ;;  %v1666_v6 = vand.u32 31, %v1664_v28 }
 0x419   :  { %v3222_v5 = vsel %vm3215_vm15, %v3218_v52, %v3221_v8  ;;  %v3304_v31 = vand.u32 2147483647, %v3303_v34  ;;  %v6527_v19 = vmul.u32.u64.low %v6479_v42, %v1591_v2  ;;  %v6528_v29 = vmul.u32.u64.high %v6479_v42, %v1591_v2, %v6527_v19 }
 0x41a   :  { %v3223_v57 = vsel %vm3212_vm2, nan, %v3222_v5  ;;  %v6535_v20 = vadd.f32 %v6464_v21, %v6450_v44  ;;  %v3317_v3 = vadd.s32 3, %v3313_v45  ;;  %v6543_v56 = vshll.u32 %v1660_v4, 8 }
 0x41b   :  { %v3307_v51 = vmul.f32 %v3306_v54, %v3304_v31  ;;  %3961 = vst [vmem:[#allocation2 + $0xc0] sm:$0xff] %v3223_v57  ;;  %v3328_v27 = vand.u32 2147483647, %v6486_v53  ;;  %v1603_v37 = vmul.u32 %v6479_v42, %v1587_v10  ;;  %vm1605_vm5 = vc.u32 %v6520_v40, %v6527_v19 }
 0x41c   :  { %v1667_v44 = vsub.s32 32, %v1666_v6  ;;  %vm1684_vm6 = vcmp.lt.s32.totalorder %v6522_v47, 1  ;;  %v1606_v18 = vadd.s32 1, %v6528_v29  ;;  %v1669_v38 = vshll.u32 %v7551_v35, %v1666_v6 }
 0x41d   :  { %v3308_v21 = vxor.u32 2147483648, %v3307_v51  ;;  %v1672_v45 = vshll.u32 %v7543_v62, %v1666_v6  ;;  %v1675_v7 = vshll.u32 %v7544_v1, %v1666_v6  ;;  %v1678_v61 = vshll.u32 %v7545_v60, %v1666_v6 }
 0x41e   :  { %v1670_v39 = vshrl.u32 %v7543_v62, %v1667_v44  ;;  %v1673_v4 = vshrl.u32 %v7544_v1, %v1667_v44  ;;  %v1676_v42 = vshrl.u32 %v7545_v60, %v1667_v44  ;;  %v1607_v36 = vsel %vm1605_vm5, %v1606_v18, %v6528_v29 }
 0x41f   :  { %v3309_v55 = vsel %vm3226_vm8, %v3308_v21, %v3307_v51  ;;  %v1679_v11 = vshrl.u32 %v7546_v63, %v1667_v44  ;;  %v1608_v48 = vadd.s32 %v1607_v36, %v1603_v37  ;;  %vm1687_vm7 = vcmp.lt.s32.totalorder %v6522_v47, 4 }
 0x420   :  { %v3312_v25 = vsel %vm6438_vm10, %v6238_v9, %v3309_v55  ;;  %v1671_v43 = vor.u32 %v1670_v39, %v1669_v38  ;;  %v1674_v50 = vor.u32 %v1673_v4, %v1672_v45  ;;  %v1677_v28 = vor.u32 %v1676_v42, %v1675_v7 }
 0x421   :  { %4343 = vcosq.f32 %v3312_v25  ;;  %v1680_v33 = vor.u32 %v1679_v11, %v1678_v61  ;;  %v1609_v10 = vadd.s32 536870912, %v1608_v48  ;;  %v1681_v2 = vshll.u32 %v7546_v63, %v1666_v6 }
 0x422   :  { %4345 = vsinq.f32 %v3312_v25  ;;  %v1682_v17 = vshrl.u32 %v7552_v59, %v1667_v44  ;;  %vm1685_vm8 = vcmp.lt.s32.totalorder %v6522_v47, 2  ;;  %vm1686_vm9 = vcmp.lt.s32.totalorder %v6522_v47, 3 }
 0x423   :  { %v1692_v12 = vsel %vm1684_vm6, %v1671_v43, %v1674_v50  ;;  %v1693_v8 = vsel %vm1687_vm7, %v1680_v33, 920167782  ;;  %v1610_v34 = vshrl.u32 %v1609_v10, 30  ;;  %v1668_v54 = vshrl.u32 %v7551_v35, %v1667_v44 }
 0x424   :  { %v1683_v13 = vor.u32 %v1682_v17, %v1681_v2  ;;  %v1694_v52 = vsel %vm1686_vm9, %v1677_v28, %v1693_v8  ;;  %v1689_v46 = vsel %vm1687_vm7, %v1677_v28, 2102212464  ;;  %v1696_v31 = vsel %vm1684_vm6, %v1674_v50, %v1677_v28 }
 0x425   :  { %v1695_v5 = vsel %vm1685_vm8, %v1692_v12, %v1694_v52  ;;  %v3331_v29 = vand.u32 2139095040, %v6486_v53  ;;  %v3318_v57 = vand.u32 3, %v3317_v3  ;;  %v1611_v6 = vshll.u32 %v1610_v34, 30 }
 0x426   :  { %v1688_v51 = vsel %vm1684_vm6, %v1668_v54, %v1671_v43  ;;  %v1697_v37 = vsel %vm1687_vm7, %v1683_v13, 1326507024  ;;  %v6591_v21 = vmul.u32.u64.low %v6543_v56, %v1695_v5  ;;  %v6592_v18 = vmul.u32.u64.high %v6543_v56, %v1695_v5, %v6591_v21 }
 0x427   :  { %v1698_v44 = vsel %vm1686_vm9, %v1680_v33, %v1697_v37  ;;  %v3332_v38 = vshrl.u32 %v3331_v29, 23  ;;  %v6594_v45 = vsub.s32 %v1608_v48, %v1611_v6  ;;  %v1634_v39 = vsub.s32 4, %v1610_v34 }
 0x428   :  { %v1690_v3 = vsel %vm1686_vm9, %v1674_v50, %v1689_v46  ;;  %v1699_v4 = vsel %vm1685_vm8, %v1696_v31, %v1698_v44  ;;  %vm3316_vm10 = vweird.f32 %v6238_v9  ;;  %vm6607_vm11 = vcmp.le.f32.partialorder %v1548_v41, 0.7853982 }
 0x429   :  { %v6602_v7 = vmul.u32.u64.low %v6543_v56, %v1699_v4  ;;  %v6603_v42 = vmul.u32.u64.high %v6543_v56, %v1699_v4, %v6602_v7  ;;  %v4089_v55 = vadd.s32 4294967169, %v3332_v38  ;;  %vm1550_vm12 = vcmp.lt.s32.totalorder %v6414_v0, 0 }
 0x42a   :  { %v1614_v61 = vsub.s32 0, %v6594_v45  ;;  %v6615_v11 = vadd.f32 %v6535_v20, %v6397_v49  ;;  %vm3319_vm13 = vcmp.lt.s32.totalorder %v3318_v57, 2  ;;  %v1691_v48 = vsel %vm1685_vm8, %v1688_v51, %v1690_v3 }
 0x42b   :  { %v4344_v25 = vpop.eup %4343  ;;  %v1710_v43 = vadd.s32 1, %v6592_v18  ;;  %v3338_v50 = vadd.s32 1, %v4089_v55  ;;  %v1635_v10 = vsel %vm1550_vm12, %v1634_v39, %v1610_v34  ;;  %v3335_v2 = vand.u32 8388607, %v3328_v27 }
 0x42c   :  { %v4346_v41 = vpop.eup %4345  ;;  %v3324_v28 = vxor.u32 2147483648, %v4344_v25  ;;  %v4026_v33 = vmin.u32 %v1614_v61, %v6594_v45  ;;  %vm3323_vm14 = vcmp.eq.s32.totalorder %v3318_v57, 2  ;;  %vm1709_vm15 = vc.u32 %v6603_v42, %v6591_v21 }
 0x42d   :  { %v3321_v49 = vxor.u32 2147483648, %v4346_v41  ;;  %vm3339_vm0 = vcmp.gt.s32.totalorder %v3338_v50, 0  ;;  %vm3320_vm1 = vcmp.eq.s32.totalorder %v3318_v57, 0  ;;  %v1707_v17 = vmul.u32 %v6543_v56, %v1691_v48 }
 0x42e   :  { %v3325_v47 = vsel %vm3323_vm14, %v3324_v28, %v4346_v41  ;;  %v1616_v20 = vclz %v4026_v33  ;;  %v1637_v8 = vsel %vm6607_vm11, 0, %v1635_v10  ;;  %v1711_v54 = vsel %vm1709_vm15, %v1710_v43, %v6592_v18 }
 0x42f   :  { %v3322_v12 = vsel %vm3320_vm1, %v4344_v25, %v3321_v49  ;;  %v3340_v34 = vsel %vm3339_vm0, %v3338_v50, 0  ;;  %v1712_v46 = vadd.s32 %v1711_v54, %v1707_v17  ;;  %v3336_v5 = vor.u32 8388608, %v3335_v2 }
 0x430   :  { %v3326_v13 = vsel %vm3319_vm13, %v3322_v12, %v3325_v47  ;;  %v4027_v52 = vadd.s32 4294967294, %v1616_v20  ;;  %v3342_v29 = vand.u32 31, %v3340_v34  ;;  %v1604_v56 = vadd.s32 %v6527_v19, %v6520_v40 }
 0x431   :  { %v3327_v31 = vsel %vm3316_vm10, nan, %v3326_v13  ;;  %v1713_v6 = vadd.s32 536870912, %v1712_v46  ;;  %v6635_v37 = vadd.s32 3, %v1637_v8  ;;  %v3432_v57 = vand.u32 2147483647, %v6615_v11 }
 0x432   :  { %3962 = vst [vmem:[#allocation2 + $0xc8] sm:$0xff] %v3327_v31  ;;  %vm4028_vm2 = vcmp.lt.s32.totalorder %v4027_v52, 0  ;;  %v3343_v44 = vsub.s32 32, %v3342_v29  ;;  %v6638_v3 = vshll.u32 %v3336_v5, 8  ;;  %v6641_v9 = vadd.s32 %v6591_v21, %v6603_v42 }
 0x433   :  { %v1619_v51 = vsel %vm4028_vm2, 0, %v4027_v52  ;;  %v1714_v39 = vshrl.u32 %v1713_v6, 30  ;;  %v6643_v4 = vshrl.u32 %v3340_v34, 5  ;;  %vm1654_vm3 = vcmp.lt.s32.totalorder %v6427_v26, 0 }
 0x434   :  { %v1620_v18 = vsub.s32 32, %v1619_v51  ;;  %v1624_v38 = vsub.s32 4294967266, %v1619_v51  ;;  %v3346_v40 = vshrl.u32 %v7543_v62, %v3343_v44  ;;  %v3349_v19 = vshrl.u32 %v7544_v1, %v3343_v44 }
 0x435   :  { %v1621_v7 = vshll.u32 %v6594_v45, %v1619_v51  ;;  %v1715_v25 = vshll.u32 %v1714_v39, 30  ;;  %v3345_v48 = vshll.u32 %v7551_v35, %v3342_v29  ;;  %v3348_v43 = vshll.u32 %v7543_v62, %v3342_v29 }
 0x436   :  { %v1622_v55 = vshrl.u32 %v1604_v56, %v1620_v18  ;;  %v1625_v61 = vadd.s32 127, %v1624_v38  ;;  %v3352_v21 = vshrl.u32 %v7545_v60, %v3343_v44  ;;  %v3435_v42 = vand.u32 2139095040, %v6615_v11 }
 0x437   :  { %v6653_v28 = vsub.s32 %v1712_v46, %v1715_v25  ;;  %v3351_v33 = vshll.u32 %v7544_v1, %v3342_v29  ;;  %v3347_v45 = vor.u32 %v3346_v40, %v3345_v48  ;;  %v3350_v10 = vor.u32 %v3349_v19, %v3348_v43 }
 0x438   :  { %v1623_v50 = vor.u32 %v1622_v55, %v1621_v7  ;;  %v1626_v41 = vshll.u32 %v1625_v61, 23  ;;  %v3354_v2 = vshll.u32 %v7545_v60, %v3342_v29  ;;  %v3355_v49 = vshrl.u32 %v7546_v63, %v3343_v44 }
 0x439   :  { %vm6660_vm4 = vcmp.le.f32.partialorder %v1652_v58, 0.7853982  ;;  %v1718_v17 = vsub.s32 0, %v6653_v28  ;;  %v3353_v12 = vor.u32 %v3352_v21, %v3351_v33  ;;  %vm3360_vm5 = vcmp.lt.s32.totalorder %v6643_v4, 1 }
 0x43a   :  { %v1627_v47 = vor.u32 4788187, %v1626_v41  ;;  %v1738_v8 = vsub.s32 4, %v1714_v39  ;;  %v3356_v54 = vor.u32 %v3355_v49, %v3354_v2  ;;  %v3357_v34 = vshll.u32 %v7546_v63, %v3342_v29 }
 0x43b   :  { %v3358_v13 = vshrl.u32 %v7552_v59, %v3343_v44  ;;  %v1630_v46 = vcvt.s32.f32 %v1623_v50  ;;  %v4030_v5 = vmin.u32 %v1718_v17, %v6653_v28  ;;  %vm3363_vm6 = vcmp.lt.s32.totalorder %v6643_v4, 4 }
 0x43c   :  { %v1628_v52 = vand.u32 2147483647, %v1627_v47  ;;  %v3344_v58 = vshrl.u32 %v7551_v35, %v3343_v44  ;;  %v3368_v56 = vsel %vm3360_vm5, %v3347_v45, %v3350_v10  ;;  %v3369_v6 = vsel %vm3363_vm6, %v3356_v54, 920167782 }
 0x43d   :  { %v3359_v31 = vor.u32 %v3358_v13, %v3357_v34  ;;  %v1720_v18 = vclz %v4030_v5  ;;  %vm3362_vm7 = vcmp.lt.s32.totalorder %v6643_v4, 3  ;;  %v3365_v29 = vsel %vm3363_vm6, %v3353_v12, 2102212464  ;;  %v7606_v5 = vld [vmem:[#allocation9_spill] sm:$0xff] }
 0x43e   :  { %v1631_v51 = vmul.f32 %v1630_v46, %v1628_v52  ;;  %v1739_v38 = vsel %vm1654_vm3, %v1738_v8, %v1714_v39  ;;  %vm3361_vm8 = vcmp.lt.s32.totalorder %v6643_v4, 2  ;;  %v3364_v44 = vsel %vm3360_vm5, %v3344_v58, %v3347_v45  ;;  %v7605_v52 = vld [vmem:[#allocation11_spill] sm:$0xff] }
 0x43f   :  { %v3370_v40 = vsel %vm3362_vm7, %v3353_v12, %v3369_v6  ;;  %v4031_v7 = vadd.s32 4294967294, %v1720_v18  ;;  %v3372_v61 = vsel %vm3360_vm5, %v3350_v10, %v3353_v12  ;;  %v3366_v25 = vsel %vm3362_vm7, %v3350_v10, %v3365_v29 }
 0x440   :  { %v1632_v19 = vxor.u32 2147483648, %v1631_v51  ;;  %v3371_v55 = vsel %vm3361_vm8, %v3368_v56, %v3370_v40  ;;  %v3373_v48 = vsel %vm3363_vm6, %v3359_v31, 1326507024  ;;  %v3436_v41 = vshrl.u32 %v3435_v42, 23 }
 0x441   :  { %v6690_v39 = vmul.u32.u64.low %v6638_v3, %v3371_v55  ;;  %v6691_v43 = vmul.u32.u64.high %v6638_v3, %v3371_v55, %v6690_v39  ;;  %vm4032_vm9 = vcmp.lt.s32.totalorder %v4031_v7, 0  ;;  %v3374_v50 = vsel %vm3362_vm7, %v3356_v54, %v3373_v48 }
 0x442   :  { %v1633_v21 = vsel %vm1550_vm12, %v1632_v19, %v1631_v51  ;;  %v1723_v45 = vsel %vm4032_vm9, 0, %v4031_v7  ;;  %v1741_v10 = vsel %vm6660_vm4, 0, %v1739_v38  ;;  %v3375_v2 = vsel %vm3361_vm8, %v3372_v61, %v3374_v50 }
 0x443   :  { %v1636_v33 = vsel %vm6607_vm11, %v6414_v0, %v1633_v21  ;;  %v1724_v49 = vsub.s32 32, %v1723_v45  ;;  %v1728_v47 = vsub.s32 4294967266, %v1723_v45  ;;  %v3367_v17 = vsel %vm3361_vm8, %v3364_v44, %v3366_v25 }
 0x444   :  { %4347 = vcosq.f32 %v1636_v33  ;;  %v1725_v42 = vshll.u32 %v6653_v28, %v1723_v45  ;;  %v6707_v12 = vmul.u32.u64.low %v6638_v3, %v3375_v2  ;;  %v6708_v36 = vmul.u32.u64.high %v6638_v3, %v3375_v2, %v6707_v12 }
 0x445   :  { %4349 = vsinq.f32 %v1636_v33  ;;  %v1726_v8 = vshrl.u32 %v6641_v9, %v1724_v49  ;;  %v1729_v54 = vadd.s32 127, %v1728_v47  ;;  %v3386_v34 = vadd.s32 1, %v6691_v43 }
 0x446   :  { %v4093_v13 = vadd.s32 4294967169, %v3436_v41  ;;  %v373_v46 = vmul.f32 %v7605_v52, %v4575_v14  ;;  %v6716_v4 = vmul.f32 %v7605_v52, %v4577_v15  ;;  %v2219_v28 = vmul.f32 %v4598_v32, %v7605_v52 }
 0x447   :  { %v440_v58 = vmul.f32 %v7606_v5, %v4581_v22  ;;  %v1642_v31 = vand.u32 3, %v6635_v37  ;;  %v1727_v9 = vor.u32 %v1726_v8, %v1725_v42  ;;  %v1730_v56 = vshll.u32 %v1729_v54, 23  ;;  %v6731_v37 = vpop.permute.xlu0 %485 }
 0x448   :  { %v3442_v6 = vadd.s32 1, %v4093_v13  ;;  %v1745_v51 = vadd.s32 3, %v1741_v10  ;;  %v3383_v18 = vmul.u32 %v6638_v3, %v3367_v17  ;;  %vm3385_vm10 = vc.u32 %v6708_v36, %v6690_v39 }
 0x449   :  { %v2253_v29 = vmul.f32 %v4595_v30, %v7606_v5  ;;  %v1731_v38 = vor.u32 4788187, %v1730_v56  ;;  %v3387_v44 = vsel %vm3385_vm10, %v3386_v34, %v6691_v43  ;;  %v3439_v40 = vand.u32 8388607, %v3432_v57 }
 0x44a   :  { %vm3443_vm11 = vcmp.gt.s32.totalorder %v3442_v6, 0  ;;  %vm1640_vm12 = vweird.f32 %v6414_v0  ;;  %v3388_v19 = vadd.s32 %v3387_v44, %v3383_v18  ;;  %vm1643_vm13 = vcmp.lt.s32.totalorder %v1642_v31, 2 }
 0x44b   :  { %v3444_v7 = vsel %vm3443_vm11, %v3442_v6, 0  ;;  %v2269_v3 = vadd.f32 %v2253_v29, %v2219_v28  ;;  %v1732_v55 = vand.u32 2147483647, %v1731_v38  ;;  %v1734_v61 = vcvt.s32.f32 %v1727_v9 }
 0x44c   :  { %v3446_v25 = vand.u32 31, %v3444_v7  ;;  %vm1644_vm14 = vcmp.eq.s32.totalorder %v1642_v31, 0  ;;  %vm1647_vm15 = vcmp.eq.s32.totalorder %v1642_v31, 2  ;;  %v3389_v48 = vadd.s32 536870912, %v3388_v19 }
 0x44d   :  { %v6735_v43 = vadd.f32 %v2269_v3, %v6731_v37  ;;  %v1735_v50 = vmul.f32 %v1734_v61, %v1732_v55  ;;  %v6737_v41 = vand.u32 3, %v1745_v51  ;;  %v3440_v33 = vor.u32 8388608, %v3439_v40 }
 0x44e   :  { %v4348_v21 = vpop.eup %4347  ;;  %v3447_v45 = vsub.s32 32, %v3446_v25  ;;  %vm3330_vm0 = vcmp.lt.s32.totalorder %v6486_v53, 0  ;;  %v3390_v49 = vshrl.u32 %v3389_v48, 30  ;;  %v6742_v47 = vmul.f32 %v7606_v5, %v4583_v23 }
 0x44f   :  { %v4350_v10 = vpop.eup %4349  ;;  %v1648_v2 = vxor.u32 2147483648, %v4348_v21  ;;  %v456_v17 = vadd.f32 %v440_v58, %v373_v46  ;;  %v1736_v12 = vxor.u32 2147483648, %v1735_v50  ;;  %v6744_v8 = vshrl.u32 %v3444_v7, 5 }
 0x450   :  { %v1645_v42 = vxor.u32 2147483648, %v4350_v10  ;;  %v3449_v54 = vshll.u32 %v7551_v35, %v3446_v25  ;;  %v3391_v13 = vshll.u32 %v3390_v49, 30  ;;  %v3450_v28 = vshrl.u32 %v7543_v62, %v3447_v45 }
 0x451   :  { %v1649_v34 = vsel %vm1647_vm15, %v1648_v2, %v4350_v10  ;;  %v3453_v9 = vshrl.u32 %v7544_v1, %v3447_v45  ;;  %v1737_v6 = vsel %vm1654_vm3, %v1736_v12, %v1735_v50  ;;  %v3452_v46 = vshll.u32 %v7543_v62, %v3446_v25 }
 0x452   :  { %v1646_v56 = vsel %vm1644_vm14, %v4348_v21, %v1645_v42  ;;  %v3456_v58 = vshrl.u32 %v7545_v60, %v3447_v45  ;;  %v1740_v18 = vsel %vm6660_vm4, %v6427_v26, %v1737_v6  ;;  %v6759_v29 = vsub.s32 %v3388_v19, %v3391_v13 }
 0x453   :  { %v1650_v51 = vsel %vm1643_vm13, %v1646_v56, %v1649_v34  ;;  %v3455_v38 = vshll.u32 %v7544_v1, %v3446_v25  ;;  %4351 = vcosq.f32 %v1740_v18  ;;  %v3414_v40 = vsub.s32 4, %v3390_v49 }
 0x454   :  { %v1651_v44 = vsel %vm1640_vm12, nan, %v1650_v51  ;;  %v3458_v7 = vshll.u32 %v7545_v60, %v3446_v25  ;;  %4353 = vsinq.f32 %v1740_v18  ;;  %v3394_v31 = vsub.s32 0, %v6759_v29 }
 0x455   :  { %2182 = vst [vmem:[#allocation2 + $0x50] sm:$0xff] %v1651_v44  ;;  %v3451_v3 = vor.u32 %v3450_v28, %v3449_v54  ;;  %v3454_v55 = vor.u32 %v3453_v9, %v3452_v46  ;;  %v3457_v61 = vor.u32 %v3456_v58, %v3455_v38  ;;  %v3459_v20 = vshrl.u32 %v7546_v63, %v3447_v45 }
 0x456   :  { %v3461_v19 = vshll.u32 %v7546_v63, %v3446_v25  ;;  %v3462_v48 = vshrl.u32 %v7552_v59, %v3447_v45  ;;  %vm6771_vm1 = vcmp.le.f32.partialorder %v3328_v27, 0.7853982  ;;  %v3384_v21 = vadd.s32 %v6690_v39, %v6708_v36 }
 0x457   :  { %v4090_v50 = vmin.u32 %v3394_v31, %v6759_v29  ;;  %v3480_v10 = vshll.u32 %v3440_v33, 8  ;;  %v6779_v2 = vadd.f32 %v6731_v37, %v456_v17  ;;  %vm1751_vm2 = vcmp.eq.s32.totalorder %v6737_v41, 2 }
 0x458   :  { %v6784_v25 = vsel %vm3330_vm0, %v3414_v40, %v3390_v49  ;;  %v3448_v27 = vshrl.u32 %v7551_v35, %v3447_v45  ;;  %v3460_v42 = vor.u32 %v3459_v20, %v3458_v7  ;;  %v3463_v12 = vor.u32 %v3462_v48, %v3461_v19 }
 0x459   :  { %vm1748_vm3 = vcmp.eq.s32.totalorder %v6737_v41, 0  ;;  %v3396_v54 = vclz %v4090_v50  ;;  %vm3464_vm4 = vcmp.lt.s32.totalorder %v6744_v8, 1  ;;  %vm3466_vm5 = vcmp.lt.s32.totalorder %v6744_v8, 3 }
 0x45a   :  { %vm3467_vm6 = vcmp.lt.s32.totalorder %v6744_v8, 4  ;;  %vm1747_vm7 = vcmp.lt.s32.totalorder %v6737_v41, 2  ;;  %v3472_v36 = vsel %vm3464_vm4, %v3451_v3, %v3454_v55  ;;  %v3476_v49 = vsel %vm3464_vm4, %v3454_v55, %v3457_v61 }
 0x45b   :  { %v3469_v39 = vsel %vm3467_vm6, %v3457_v61, 2102212464  ;;  %v3473_v33 = vsel %vm3467_vm6, %v3460_v42, 920167782  ;;  %vm1744_vm8 = vweird.f32 %v6427_v26  ;;  %v4091_v45 = vadd.s32 4294967294, %v3396_v54 }
 0x45c   :  { %vm3465_vm9 = vcmp.lt.s32.totalorder %v6744_v8, 2  ;;  %v3474_v17 = vsel %vm3466_vm5, %v3457_v61, %v3473_v33  ;;  %v3477_v34 = vsel %vm3467_vm6, %v3463_v12, 1326507024  ;;  %v3468_v13 = vsel %vm3464_vm4, %v3448_v27, %v3451_v3 }
 0x45d   :  { %v3470_v28 = vsel %vm3466_vm5, %v3454_v55, %v3469_v39  ;;  %v3475_v9 = vsel %vm3465_vm9, %v3472_v36, %v3474_v17  ;;  %v3478_v56 = vsel %vm3466_vm5, %v3460_v42, %v3477_v34  ;;  %vm4092_vm10 = vcmp.lt.s32.totalorder %v4091_v45, 0  ;;  %v4352_v51 = vpop.eup %4351 }
 0x45e   :  { %v3479_v6 = vsel %vm3465_vm9, %v3476_v49, %v3478_v56  ;;  %v6798_v46 = vmul.u32.u64.low %v3480_v10, %v3475_v9  ;;  %v6799_v58 = vmul.u32.u64.high %v3480_v10, %v3475_v9, %v6798_v46  ;;  %v3399_v18 = vsel %vm4092_vm10, 0, %v4091_v45  ;;  %v4354_v7 = vpop.eup %4353 }
 0x45f   :  { %v6801_v38 = vmul.u32.u64.low %v3480_v10, %v3479_v6  ;;  %v6802_v44 = vmul.u32.u64.high %v3480_v10, %v3479_v6, %v6801_v38  ;;  %v457_v40 = vadd.f32 %v6742_v47, %v6716_v4  ;;  %v1752_v31 = vxor.u32 2147483648, %v4352_v51 }
 0x460   :  { %v3400_v3 = vsub.s32 32, %v3399_v18  ;;  %v3404_v55 = vsub.s32 4294967266, %v3399_v18  ;;  %v3471_v61 = vsel %vm3465_vm9, %v3468_v13, %v3470_v28  ;;  %v1749_v20 = vxor.u32 2147483648, %v4354_v7 }
 0x461   :  { %v3401_v19 = vshll.u32 %v6759_v29, %v3399_v18  ;;  %v3417_v48 = vsel %vm6771_vm1, 0, %v6784_v25  ;;  %v1759_v50 = vand.u32 2139095040, %v6779_v2  ;;  %v1753_v27 = vsel %vm1751_vm2, %v1752_v31, %v4354_v7 }
 0x462   :  { %v3402_v4 = vshrl.u32 %v3384_v21, %v3400_v3  ;;  %v3405_v47 = vadd.s32 127, %v3404_v55  ;;  %v3490_v42 = vadd.s32 1, %v6799_v58  ;;  %v1750_v8 = vsel %vm1748_vm3, %v4352_v51, %v1749_v20 }
 0x463   :  { %v3487_v12 = vmul.u32 %v3480_v10, %v3471_v61  ;;  %vm3489_vm11 = vc.u32 %v6802_v44, %v6798_v46  ;;  %v1760_v29 = vshrl.u32 %v1759_v50, 23  ;;  %v1754_v54 = vsel %vm1747_vm7, %v1750_v8, %v1753_v27 }
 0x464   :  { %v3403_v25 = vor.u32 %v3402_v4, %v3401_v19  ;;  %v3406_v39 = vshll.u32 %v3405_v47, 23  ;;  %v3491_v36 = vsel %vm3489_vm11, %v3490_v42, %v6799_v58  ;;  %v1755_v21 = vsel %vm1744_vm8, nan, %v1754_v54 }
 0x465   :  { %v3492_v33 = vadd.s32 %v3491_v36, %v3487_v12  ;;  %v1756_v49 = vand.u32 2147483647, %v6779_v2  ;;  %v4033_v45 = vadd.s32 4294967169, %v1760_v29  ;;  %2183 = vst [vmem:[#allocation2 + $0x58] sm:$0xff] %v1755_v21  ;;  %v6826_v10 = vadd.f32 %v6731_v37, %v457_v40 }
 0x466   :  { %v3407_v17 = vor.u32 4788187, %v3406_v39  ;;  %v3410_v28 = vcvt.s32.f32 %v3403_v25  ;;  %v3421_v9 = vadd.s32 3, %v3417_v48  ;;  %v6832_v26 = vmul.f32 %v4579_v16, %v7605_v52 }
 0x467   :  { %v3493_v34 = vadd.s32 536870912, %v3492_v33  ;;  %v1766_v13 = vadd.s32 1, %v4033_v45  ;;  %v1763_v6 = vand.u32 8388607, %v1756_v49  ;;  %v1863_v18 = vand.u32 2139095040, %v6826_v10 }
 0x468   :  { %v3408_v41 = vand.u32 2147483647, %v3407_v17  ;;  %vm6837_vm13 = vcmp.le.f32.partialorder %v3432_v57, 0.7853982  ;;  %vm3434_vm14 = vcmp.lt.s32.totalorder %v6615_v11, 0  ;;  %v6842_v3 = vand.u32 3, %v3421_v9 }
 0x469   :  { %v3494_v56 = vshrl.u32 %v3493_v34, 30  ;;  %vm1767_vm12 = vcmp.gt.s32.totalorder %v1766_v13, 0  ;;  %v6845_v52 = vadd.s32 %v6798_v46, %v6802_v44  ;;  %v6849_v55 = vmul.f32 %v4585_v24, %v7606_v5 }
 0x46a   :  { %v3411_v58 = vmul.f32 %v3410_v28, %v3408_v41  ;;  %v1768_v51 = vsel %vm1767_vm12, %v1766_v13, 0  ;;  %v1764_v20 = vor.u32 8388608, %v1763_v6  ;;  %v1864_v4 = vshrl.u32 %v1863_v18, 23 }
 0x46b   :  { %v3495_v40 = vshll.u32 %v3494_v56, 30  ;;  %v1770_v7 = vand.u32 31, %v1768_v51  ;;  %v3518_v57 = vsub.s32 4, %v3494_v56  ;;  %v6855_v50 = vshrl.u32 %v1768_v51, 5 }
 0x46c   :  { %v3412_v31 = vxor.u32 2147483648, %v3411_v58  ;;  %v6872_v45 = vshll.u32 %v1764_v20, 8  ;;  %v1860_v17 = vand.u32 2147483647, %v6826_v10  ;;  %v4037_v34 = vadd.s32 4294967169, %v1864_v4 }
 0x46d   :  { %v6851_v61 = vsub.s32 %v3492_v33, %v3495_v40  ;;  %v1771_v19 = vsub.s32 32, %v1770_v7  ;;  %v1773_v27 = vshll.u32 %v7551_v35, %v1770_v7  ;;  %v1776_v44 = vshll.u32 %v7543_v62, %v1770_v7 }
 0x46e   :  { %v3413_v48 = vsel %vm3330_vm0, %v3412_v31, %v3411_v58  ;;  %v1779_v47 = vshll.u32 %v7544_v1, %v1770_v7  ;;  %v3519_v0 = vsel %vm3434_vm14, %v3518_v57, %v3494_v56  ;;  %v1782_v54 = vshll.u32 %v7545_v60, %v1770_v7 }
 0x46f   :  { %v3416_v46 = vsel %vm6771_vm1, %v6486_v53, %v3413_v48  ;;  %v3498_v5 = vsub.s32 0, %v6851_v61  ;;  %v1774_v42 = vshrl.u32 %v7543_v62, %v1771_v19  ;;  %v1777_v8 = vshrl.u32 %v7544_v1, %v1771_v19 }
 0x470   :  { %4355 = vcosq.f32 %v3416_v46  ;;  %v1780_v12 = vshrl.u32 %v7545_v60, %v1771_v19  ;;  %v1783_v21 = vshrl.u32 %v7546_v63, %v1771_v19  ;;  %vm3427_vm15 = vcmp.eq.s32.totalorder %v6842_v3, 2 }
 0x471   :  { %4357 = vsinq.f32 %v3416_v46  ;;  %v4094_v29 = vmin.u32 %v3498_v5, %v6851_v61  ;;  %v1775_v25 = vor.u32 %v1774_v42, %v1773_v27  ;;  %v1778_v39 = vor.u32 %v1777_v8, %v1776_v44 }
 0x472   :  { %v1781_v36 = vor.u32 %v1780_v12, %v1779_v47  ;;  %v3521_v13 = vsel %vm6837_vm13, 0, %v3519_v0  ;;  %v1784_v41 = vor.u32 %v1783_v21, %v1782_v54  ;;  %v1785_v28 = vshll.u32 %v7546_v63, %v1770_v7 }
 0x473   :  { %v3500_v33 = vclz %v4094_v29  ;;  %v1786_v9 = vshrl.u32 %v7552_v59, %v1771_v19  ;;  %vm3424_vm0 = vcmp.eq.s32.totalorder %v6842_v3, 0  ;;  %v1772_v6 = vshrl.u32 %v7551_v35, %v1771_v19 }
 0x474   :  { %vm1788_vm1 = vcmp.lt.s32.totalorder %v6855_v50, 1  ;;  %vm1791_vm2 = vcmp.lt.s32.totalorder %v6855_v50, 4  ;;  %vm3423_vm3 = vcmp.lt.s32.totalorder %v6842_v3, 2  ;;  %vm1789_vm4 = vcmp.lt.s32.totalorder %v6855_v50, 2 }
 0x475   :  { %v4095_v56 = vadd.s32 4294967294, %v3500_v33  ;;  %v1787_v58 = vor.u32 %v1786_v9, %v1785_v28  ;;  %v1793_v51 = vsel %vm1791_vm2, %v1781_v36, 2102212464  ;;  %v1796_v18 = vsel %vm1788_vm1, %v1775_v25, %v1778_v39 }
 0x476   :  { %vm3420_vm5 = vweird.f32 %v6486_v53  ;;  %vm1790_vm7 = vcmp.lt.s32.totalorder %v6855_v50, 3  ;;  %v1792_v40 = vsel %vm1788_vm1, %v1772_v6, %v1775_v25  ;;  %v1797_v7 = vsel %vm1791_vm2, %v1784_v41, 920167782 }
 0x477   :  { %vm4096_vm6 = vcmp.lt.s32.totalorder %v4095_v56, 0  ;;  %v1798_v57 = vsel %vm1790_vm7, %v1781_v36, %v1797_v7  ;;  %v1800_v20 = vsel %vm1788_vm1, %v1778_v39, %v1781_v36  ;;  %v1801_v19 = vsel %vm1791_vm2, %v1787_v58, 1326507024 }
 0x478   :  { %v3503_v31 = vsel %vm4096_vm6, 0, %v4095_v56  ;;  %v1794_v4 = vsel %vm1790_vm7, %v1778_v39, %v1793_v51  ;;  %v1799_v46 = vsel %vm1789_vm4, %v1796_v18, %v1798_v57  ;;  %v1802_v47 = vsel %vm1790_vm7, %v1784_v41, %v1801_v19 }
 0x479   :  { %v3504_v48 = vsub.s32 32, %v3503_v31  ;;  %v3508_v27 = vsub.s32 4294967266, %v3503_v31  ;;  %v3505_v44 = vshll.u32 %v6851_v61, %v3503_v31  ;;  %v1803_v25 = vsel %vm1789_vm4, %v1800_v20, %v1802_v47 }
 0x47a   :  { %v4356_v5 = vpop.eup %4355  ;;  %v6892_v42 = vmul.u32.u64.low %v6872_v45, %v1799_v46  ;;  %v6893_v8 = vmul.u32.u64.high %v6872_v45, %v1799_v46, %v6892_v42  ;;  %v6900_v36 = vmul.u32.u64.low %v6872_v45, %v1803_v25  ;;  %v6901_v21 = vmul.u32.u64.high %v6872_v45, %v1803_v25, %v6900_v36 }
 0x47b   :  { %v4358_v12 = vpop.eup %4357  ;;  %v3428_v29 = vxor.u32 2147483648, %v4356_v5  ;;  %v3506_v0 = vshrl.u32 %v6845_v52, %v3504_v48  ;;  %v3509_v54 = vadd.s32 127, %v3508_v27  ;;  %v1870_v61 = vadd.s32 1, %v4037_v34 }
 0x47c   :  { %v3425_v39 = vxor.u32 2147483648, %v4358_v12  ;;  %v1795_v9 = vsel %vm1789_vm4, %v1792_v40, %v1794_v4  ;;  %v1814_v56 = vadd.s32 1, %v6893_v8  ;;  %v1867_v6 = vand.u32 8388607, %v1860_v17 }
 0x47d   :  { %v3429_v33 = vsel %vm3427_vm15, %v3428_v29, %v4358_v12  ;;  %v3507_v41 = vor.u32 %v3506_v0, %v3505_v44  ;;  %v3510_v28 = vshll.u32 %v3509_v54, 23  ;;  %vm1871_vm8 = vcmp.gt.s32.totalorder %v1870_v61, 0 }
 0x47e   :  { %v3426_v52 = vsel %vm3424_vm0, %v4356_v5, %v3425_v39  ;;  %v3525_v51 = vadd.s32 3, %v3521_v13  ;;  %v1872_v18 = vsel %vm1871_vm8, %v1870_v61, 0  ;;  %v2268_v50 = vadd.f32 %v6849_v55, %v6832_v26 }
 0x47f   :  { %v3430_v34 = vsel %vm3423_vm3, %v3426_v52, %v3429_v33  ;;  %v3511_v58 = vor.u32 4788187, %v3510_v28  ;;  %v1811_v40 = vmul.u32 %v6872_v45, %v1795_v9  ;;  %vm1813_vm9 = vc.u32 %v6901_v21, %v6892_v42 }
 0x480   :  { %v3431_v7 = vsel %vm3420_vm5, nan, %v3430_v34  ;;  %v3514_v57 = vcvt.s32.f32 %v3507_v41  ;;  %v1815_v3 = vsel %vm1813_vm9, %v1814_v56, %v6893_v8  ;;  %v1874_v20 = vand.u32 31, %v1872_v18 }
 0x481   :  { %v3512_v31 = vand.u32 2147483647, %v3511_v58  ;;  %3963 = vst [vmem:[#allocation2 + $0xd0] sm:$0xff] %v3431_v7  ;;  %v1816_v19 = vadd.s32 %v1815_v3, %v1811_v40  ;;  %v1868_v13 = vor.u32 8388608, %v1867_v6  ;;  %v6923_v48 = vadd.f32 %v2268_v50, %v6731_v37 }
 0x482   :  { %v6925_v27 = vand.u32 3, %v3525_v51  ;;  %v6927_v26 = vshrl.u32 %v1872_v18, 5  ;;  %v1875_v55 = vsub.s32 32, %v1874_v20  ;;  %v1877_v4 = vshll.u32 %v7551_v35, %v1874_v20 }
 0x483   :  { %v3515_v53 = vmul.f32 %v3514_v57, %v3512_v31  ;;  %v1817_v45 = vadd.s32 536870912, %v1816_v19  ;;  %v1880_v46 = vshll.u32 %v7543_v62, %v1874_v20  ;;  %v1883_v5 = vshll.u32 %v7544_v1, %v1874_v20 }
 0x484   :  { %vm1758_vm10 = vcmp.lt.s32.totalorder %v6779_v2, 0  ;;  %v1878_v47 = vshrl.u32 %v7543_v62, %v1875_v55  ;;  %v1881_v37 = vshrl.u32 %v7544_v1, %v1875_v55  ;;  %v1886_v8 = vshll.u32 %v7545_v60, %v1874_v20 }
 0x485   :  { %v3516_v44 = vxor.u32 2147483648, %v3515_v53  ;;  %v1818_v12 = vshrl.u32 %v1817_v45, 30  ;;  %v1884_v29 = vshrl.u32 %v7545_v60, %v1875_v55  ;;  %v1887_v0 = vshrl.u32 %v7546_v63, %v1875_v55 }
 0x486   :  { %v1890_v54 = vshrl.u32 %v7552_v59, %v1875_v55  ;;  %v1879_v39 = vor.u32 %v1878_v47, %v1877_v4  ;;  %v1882_v36 = vor.u32 %v1881_v37, %v1880_v46  ;;  %v1889_v61 = vshll.u32 %v7546_v63, %v1874_v20 }
 0x487   :  { %v3517_v25 = vsel %vm3434_vm14, %v3516_v44, %v3515_v53  ;;  %v1819_v41 = vshll.u32 %v1818_v12, 30  ;;  %v1885_v28 = vor.u32 %v1884_v29, %v1883_v5  ;;  %v3539_v9 = vand.u32 2139095040, %v6923_v48 }
 0x488   :  { %v3520_v33 = vsel %vm6837_vm13, %v6615_v11, %v3517_v25  ;;  %v1888_v52 = vor.u32 %v1887_v0, %v1886_v8  ;;  %v1891_v56 = vor.u32 %v1890_v54, %v1889_v61  ;;  %vm1892_vm11 = vcmp.lt.s32.totalorder %v6927_v26, 1 }
 0x489   :  { %4359 = vcosq.f32 %v3520_v33  ;;  %v6947_v6 = vsub.s32 %v1816_v19, %v1819_v41  ;;  %v1842_v34 = vsub.s32 4, %v1818_v12  ;;  %vm1895_vm12 = vcmp.lt.s32.totalorder %v6927_v26, 4 }
 0x48a   :  { %4361 = vsinq.f32 %v3520_v33  ;;  %vm1894_vm14 = vcmp.lt.s32.totalorder %v6927_v26, 3  ;;  %v1900_v38 = vsel %vm1892_vm11, %v1879_v39, %v1882_v36  ;;  %v1901_v58 = vsel %vm1895_vm12, %v1888_v52, 920167782 }
 0x48b   :  { %v1908_v51 = vshll.u32 %v1868_v13, 8  ;;  %v1822_v18 = vsub.s32 0, %v6947_v6  ;;  %v1876_v7 = vshrl.u32 %v7551_v35, %v1875_v55  ;;  %vm1893_vm13 = vcmp.lt.s32.totalorder %v6927_v26, 2 }
 0x48c   :  { %v1902_v50 = vsel %vm1894_vm14, %v1885_v28, %v1901_v58  ;;  %v1897_v40 = vsel %vm1895_vm12, %v1885_v28, 2102212464  ;;  %v1904_v57 = vsel %vm1892_vm11, %v1882_v36, %v1885_v28  ;;  %v1905_v3 = vsel %vm1895_vm12, %v1891_v56, 1326507024 }
 0x48d   :  { %v1903_v31 = vsel %vm1893_vm13, %v1900_v38, %v1902_v50  ;;  %v4034_v20 = vmin.u32 %v1822_v18, %v6947_v6  ;;  %v1843_v19 = vsel %vm1758_vm10, %v1842_v34, %v1818_v12  ;;  %v1906_v13 = vsel %vm1894_vm14, %v1888_v52, %v1905_v3 }
 0x48e   :  { %v3540_v53 = vshrl.u32 %v3539_v9, 23  ;;  %vm6969_vm15 = vcmp.le.f32.partialorder %v1756_v49, 0.7853982  ;;  %v1907_v45 = vsel %vm1893_vm13, %v1904_v57, %v1906_v13  ;;  %vm3524_vm0 = vweird.f32 %v6615_v11 }
 0x48f   :  { %v6975_v4 = vmul.u32.u64.low %v1908_v51, %v1903_v31  ;;  %v6976_v46 = vmul.u32.u64.high %v1908_v51, %v1903_v31, %v6975_v4  ;;  %v1824_v5 = vclz %v4034_v20  ;;  %v1896_v44 = vsel %vm1892_vm11, %v1876_v7, %v1879_v39 }
 0x490   :  { %v1898_v47 = vsel %vm1894_vm14, %v1882_v36, %v1897_v40  ;;  %v3536_v49 = vand.u32 2147483647, %v6923_v48  ;;  %v1845_v37 = vsel %vm6969_vm15, 0, %v1843_v19  ;;  %v4097_v29 = vadd.s32 4294967169, %v3540_v53 }
 0x491   :  { %v6987_v8 = vmul.u32.u64.low %v1908_v51, %v1907_v45  ;;  %v6988_v12 = vmul.u32.u64.high %v1908_v51, %v1907_v45, %v6987_v8  ;;  %vm3527_vm1 = vcmp.lt.s32.totalorder %v6925_v27, 2  ;;  %vm3528_vm2 = vcmp.eq.s32.totalorder %v6925_v27, 0 }
 0x492   :  { %vm3531_vm3 = vcmp.eq.s32.totalorder %v6925_v27, 2  ;;  %v4035_v0 = vadd.s32 4294967294, %v1824_v5  ;;  %v1812_v25 = vadd.s32 %v6892_v42, %v6901_v21  ;;  %v1899_v39 = vsel %vm1893_vm13, %v1896_v44, %v1898_v47 }
 0x493   :  { %v4360_v54 = vpop.eup %4359  ;;  %v1918_v36 = vadd.s32 1, %v6976_v46  ;;  %v3546_v61 = vadd.s32 1, %v4097_v29  ;;  %v1849_v28 = vadd.s32 3, %v1845_v37  ;;  %v3543_v9 = vand.u32 8388607, %v3536_v49 }
 0x494   :  { %v4362_v33 = vpop.eup %4361  ;;  %v3532_v41 = vxor.u32 2147483648, %v4360_v54  ;;  %vm4036_vm4 = vcmp.lt.s32.totalorder %v4035_v0, 0  ;;  %vm1917_vm5 = vc.u32 %v6988_v12, %v6975_v4  ;;  %v3643_v42 = vand.u32 2139095040, %v6735_v43 }
 0x495   :  { %v3529_v52 = vxor.u32 2147483648, %v4362_v33  ;;  %v1827_v56 = vsel %vm4036_vm4, 0, %v4035_v0  ;;  %v1915_v38 = vmul.u32 %v1908_v51, %v1899_v39  ;;  %v1919_v7 = vsel %vm1917_vm5, %v1918_v36, %v6976_v46 }
 0x496   :  { %v3533_v21 = vsel %vm3531_vm3, %v3532_v41, %v4362_v33  ;;  %v1828_v26 = vsub.s32 32, %v1827_v56  ;;  %v1832_v34 = vsub.s32 4294967266, %v1827_v56  ;;  %v1829_v18 = vshll.u32 %v6947_v6, %v1827_v56 }
 0x497   :  { %v3530_v58 = vsel %vm3528_vm2, %v4360_v54, %v3529_v52  ;;  %vm3547_vm6 = vcmp.gt.s32.totalorder %v3546_v61, 0  ;;  %v1920_v57 = vadd.s32 %v1919_v7, %v1915_v38  ;;  %v3544_v20 = vor.u32 8388608, %v3543_v9 }
 0x498   :  { %v3534_v50 = vsel %vm3527_vm1, %v3530_v58, %v3533_v21  ;;  %v1830_v40 = vshrl.u32 %v1812_v25, %v1828_v26  ;;  %v1833_v31 = vadd.s32 127, %v1832_v34  ;;  %v3548_v19 = vsel %vm3547_vm6, %v3546_v61, 0 }
 0x499   :  { %v3535_v3 = vsel %vm3524_vm0, nan, %v3534_v50  ;;  %v3644_v51 = vshrl.u32 %v3643_v42, 23  ;;  %v1921_v45 = vadd.s32 536870912, %v1920_v57  ;;  %v3640_v6 = vand.u32 2147483647, %v6735_v43 }
 0x49a   :  { %3964 = vst [vmem:[#allocation2 + $0xd8] sm:$0xff] %v3535_v3  ;;  %v1831_v13 = vor.u32 %v1830_v40, %v1829_v18  ;;  %v1834_v53 = vshll.u32 %v1833_v31, 23  ;;  %v3550_v46 = vand.u32 31, %v3548_v19  ;;  %v7016_v27 = vand.u32 3, %v1849_v28 }
 0x49b   :  { %v7014_v44 = vshrl.u32 %v1921_v45, 30  ;;  %v7018_v37 = vshll.u32 %v3544_v20, 8  ;;  %v4101_v11 = vadd.s32 4294967169, %v3644_v51  ;;  %v7023_v54 = vand.u32 8388607, %v3640_v6 }
 0x49c   :  { %v1835_v5 = vor.u32 4788187, %v1834_v53  ;;  %v3551_v47 = vsub.s32 32, %v3550_v46  ;;  %v1838_v29 = vcvt.s32.f32 %v1831_v13  ;;  %v3549_v25 = vshrl.u32 %v3548_v19, 5 }
 0x49d   :  { %v1923_v0 = vshll.u32 %v7014_v44, 30  ;;  %v3559_v28 = vshll.u32 %v7544_v1, %v3550_v46  ;;  %v1916_v52 = vadd.s32 %v6975_v4, %v6988_v12  ;;  %v3553_v56 = vshll.u32 %v7551_v35, %v3550_v46 }
 0x49e   :  { %v1836_v8 = vand.u32 2147483647, %v1835_v5  ;;  %v3554_v39 = vshrl.u32 %v7543_v62, %v3551_v47  ;;  %v3557_v36 = vshrl.u32 %v7544_v1, %v3551_v47  ;;  %v3560_v61 = vshrl.u32 %v7545_v60, %v3551_v47 }
 0x49f   :  { %v7028_v41 = vsub.s32 %v1920_v57, %v1923_v0  ;;  %v3563_v9 = vshrl.u32 %v7546_v63, %v3551_v47  ;;  %v3556_v42 = vshll.u32 %v7543_v62, %v3550_v46  ;;  %v3650_v21 = vadd.s32 1, %v4101_v11 }
 0x4a0   :  { %v1839_v33 = vmul.f32 %v1838_v29, %v1836_v8  ;;  %v3561_v38 = vor.u32 %v3560_v61, %v3559_v28  ;;  %v3562_v58 = vshll.u32 %v7545_v60, %v3550_v46  ;;  %vm1862_vm7 = vcmp.lt.s32.totalorder %v6826_v10, 0 }
 0x4a1   :  { %v1926_v34 = vsub.s32 0, %v7028_v41  ;;  %v3555_v18 = vor.u32 %v3554_v39, %v3553_v56  ;;  %v3558_v7 = vor.u32 %v3557_v36, %v3556_v42  ;;  %v3565_v50 = vshll.u32 %v7546_v63, %v3550_v46 }
 0x4a2   :  { %v1840_v26 = vxor.u32 2147483648, %v1839_v33  ;;  %v3566_v40 = vshrl.u32 %v7552_v59, %v3551_v47  ;;  %v3564_v31 = vor.u32 %v3563_v9, %v3562_v58  ;;  %vm3568_vm8 = vcmp.lt.s32.totalorder %v3549_v25, 1 }
 0x4a3   :  { %v4038_v12 = vmin.u32 %v1926_v34, %v7028_v41  ;;  %v1946_v3 = vsub.s32 4, %v7014_v44  ;;  %vm3571_vm9 = vcmp.lt.s32.totalorder %v3549_v25, 4  ;;  %vm7050_vm11 = vcmp.le.f32.partialorder %v1860_v17, 0.7853982 }
 0x4a4   :  { %v1841_v4 = vsel %vm1758_vm10, %v1840_v26, %v1839_v33  ;;  %v3567_v20 = vor.u32 %v3566_v40, %v3565_v50  ;;  %v3552_v13 = vshrl.u32 %v7551_v35, %v3551_v47  ;;  %v3573_v53 = vsel %vm3571_vm9, %v3561_v38, 2102212464 }
 0x4a5   :  { %v1844_v57 = vsel %vm6969_vm15, %v6779_v2, %v1841_v4  ;;  %v1928_v51 = vclz %v4038_v12  ;;  %vm3569_vm10 = vcmp.lt.s32.totalorder %v3549_v25, 2  ;;  %vm3570_vm12 = vcmp.lt.s32.totalorder %v3549_v25, 3 }
 0x4a6   :  { %4363 = vcosq.f32 %v1844_v57  ;;  %v3576_v55 = vsel %vm3568_vm8, %v3555_v18, %v3558_v7  ;;  %v3572_v46 = vsel %vm3568_vm8, %v3552_v13, %v3555_v18  ;;  %v3577_v5 = vsel %vm3571_vm9, %v3564_v31, 920167782 }
 0x4a7   :  { %4365 = vsinq.f32 %v1844_v57  ;;  %v4039_v45 = vadd.s32 4294967294, %v1928_v51  ;;  %v3580_v17 = vsel %vm3568_vm8, %v3558_v7, %v3561_v38  ;;  %v3574_v11 = vsel %vm3570_vm12, %v3558_v7, %v3573_v53 }
 0x4a8   :  { %v3578_v8 = vsel %vm3570_vm12, %v3561_v38, %v3577_v5  ;;  %v3581_v29 = vsel %vm3571_vm9, %v3567_v20, 1326507024  ;;  %vm3651_vm14 = vcmp.gt.s32.totalorder %v3650_v21, 0  ;;  %vm1852_vm15 = vcmp.eq.s32.totalorder %v7016_v27, 0 }
 0x4a9   :  { %vm4040_vm13 = vcmp.lt.s32.totalorder %v4039_v45, 0  ;;  %v3579_v47 = vsel %vm3569_vm10, %v3576_v55, %v3578_v8  ;;  %v3582_v0 = vsel %vm3570_vm12, %v3564_v31, %v3581_v29  ;;  %v3652_v39 = vsel %vm3651_vm14, %v3650_v21, 0 }
 0x4aa   :  { %v1931_v36 = vsel %vm4040_vm13, 0, %v4039_v45  ;;  %v3583_v61 = vsel %vm3569_vm10, %v3580_v17, %v3582_v0  ;;  %v7065_v33 = vmul.u32.u64.low %v7018_v37, %v3579_v47  ;;  %v7066_v28 = vmul.u32.u64.high %v7018_v37, %v3579_v47, %v7065_v33 }
 0x4ab   :  { %vm1851_vm0 = vcmp.lt.s32.totalorder %v7016_v27, 2  ;;  %v1932_v9 = vsub.s32 32, %v1931_v36  ;;  %v1936_v56 = vsub.s32 4294967266, %v1931_v36  ;;  %v1947_v42 = vsel %vm1862_vm7, %v1946_v3, %v7014_v44 }
 0x4ac   :  { %v3575_v21 = vsel %vm3569_vm10, %v3572_v46, %v3574_v11  ;;  %vm1848_vm1 = vweird.f32 %v6779_v2  ;;  %vm1855_vm2 = vcmp.eq.s32.totalorder %v7016_v27, 2  ;;  %v3654_v38 = vand.u32 31, %v3652_v39 }
 0x4ad   :  { %v7077_v26 = vmul.u32.u64.low %v7018_v37, %v3583_v61  ;;  %v7078_v34 = vmul.u32.u64.high %v7018_v37, %v3583_v61, %v7077_v26  ;;  %v1933_v58 = vshll.u32 %v7028_v41, %v1931_v36  ;;  %v1934_v18 = vshrl.u32 %v1916_v52, %v1932_v9 }
 0x4ae   :  { %v1937_v7 = vadd.s32 127, %v1936_v56  ;;  %v3648_v50 = vor.u32 8388608, %v7023_v54  ;;  %v1949_v44 = vsel %vm7050_vm11, 0, %v1947_v42  ;;  %v3591_v25 = vmul.u32 %v7018_v37, %v3575_v21 }
 0x4af   :  { %v3594_v40 = vadd.s32 1, %v7066_v28  ;;  %v3655_v4 = vsub.s32 32, %v3654_v38  ;;  %v1935_v31 = vor.u32 %v1934_v18, %v1933_v58  ;;  %v7086_v3 = vshrl.u32 %v3652_v39, 5 }
 0x4b0   :  { %v4364_v12 = vpop.eup %4363  ;;  %v1938_v57 = vshll.u32 %v1937_v7, 23  ;;  %v3657_v20 = vshll.u32 %v7551_v35, %v3654_v38  ;;  %vm3593_vm3 = vc.u32 %v7078_v34, %v7065_v33  ;;  %v3660_v54 = vshll.u32 %v7543_v62, %v3654_v38 }
 0x4b1   :  { %v4366_v41 = vpop.eup %4365  ;;  %v1856_v52 = vxor.u32 2147483648, %v4364_v12  ;;  %v3666_v51 = vshll.u32 %v7545_v60, %v3654_v38  ;;  %v1942_v53 = vcvt.s32.f32 %v1935_v31  ;;  %v3595_v55 = vsel %vm3593_vm3, %v3594_v40, %v7066_v28 }
 0x4b2   :  { %v1853_v37 = vxor.u32 2147483648, %v4366_v41  ;;  %v1939_v13 = vor.u32 4788187, %v1938_v57  ;;  %v3596_v46 = vadd.s32 %v3595_v55, %v3591_v25  ;;  %v3658_v5 = vshrl.u32 %v7543_v62, %v3655_v4 }
 0x4b3   :  { %v1857_v45 = vsel %vm1855_vm2, %v1856_v52, %v4366_v41  ;;  %v3661_v17 = vshrl.u32 %v7544_v1, %v3655_v4  ;;  %v3664_v29 = vshrl.u32 %v7545_v60, %v3655_v4  ;;  %v3667_v47 = vshrl.u32 %v7546_v63, %v3655_v4 }
 0x4b4   :  { %v1854_v11 = vsel %vm1852_vm15, %v4364_v12, %v1853_v37  ;;  %v1940_v8 = vand.u32 2147483647, %v1939_v13  ;;  %v3597_v39 = vadd.s32 536870912, %v3596_v46  ;;  %v3659_v36 = vor.u32 %v3658_v5, %v3657_v20 }
 0x4b5   :  { %v1858_v0 = vsel %vm1851_vm0, %v1854_v11, %v1857_v45  ;;  %v3663_v61 = vshll.u32 %v7544_v1, %v3654_v38  ;;  %v3662_v56 = vor.u32 %v3661_v17, %v3660_v54  ;;  %v3668_v42 = vor.u32 %v3667_v47, %v3666_v51 }
 0x4b6   :  { %v1859_v28 = vsel %vm1848_vm1, nan, %v1858_v0  ;;  %v1943_v9 = vmul.f32 %v1942_v53, %v1940_v8  ;;  %v3598_v21 = vshrl.u32 %v3597_v39, 30  ;;  %v3669_v58 = vshll.u32 %v7546_v63, %v3654_v38  ;;  %v7615_v39 = vld [vmem:[#allocation7_spill] sm:$0xff] }
 0x4b7   :  { %2184 = vst [vmem:[#allocation2 + $0x60] sm:$0xff] %v1859_v28  ;;  %v3665_v26 = vor.u32 %v3664_v29, %v3663_v61  ;;  %v3670_v18 = vshrl.u32 %v7552_v59, %v3655_v4  ;;  %v1953_v27 = vadd.s32 3, %v1949_v44  ;;  %vm3672_vm4 = vcmp.lt.s32.totalorder %v7086_v3, 1  ;;  %v7616_v61 = vld [vmem:[#allocation14_spill] sm:$0xff] }
 0x4b8   :  { %v1944_v7 = vxor.u32 2147483648, %v1943_v9  ;;  %v3688_v25 = vshll.u32 %v3648_v50, 8  ;;  %v3599_v40 = vshll.u32 %v3598_v21, 30  ;;  %vm3673_vm5 = vcmp.lt.s32.totalorder %v7086_v3, 2 }
 0x4b9   :  { %v3671_v12 = vor.u32 %v3670_v18, %v3669_v58  ;;  %vm3675_vm6 = vcmp.lt.s32.totalorder %v7086_v3, 4  ;;  %v3656_v31 = vshrl.u32 %v7551_v35, %v3655_v4  ;;  %v3680_v38 = vsel %vm3672_vm4, %v3659_v36, %v3662_v56 }
 0x4ba   :  { %v1945_v2 = vsel %vm1862_vm7, %v1944_v7, %v1943_v9  ;;  %v3681_v57 = vsel %vm3675_vm6, %v3668_v42, 920167782  ;;  %v7120_v50 = vsub.s32 %v3596_v46, %v3599_v40  ;;  %vm3674_vm8 = vcmp.lt.s32.totalorder %v7086_v3, 3 }
 0x4bb   :  { %v1948_v44 = vsel %vm7050_vm11, %v6826_v10, %v1945_v2  ;;  %v3677_v20 = vsel %vm3675_vm6, %v3665_v26, 2102212464  ;;  %v3682_v41 = vsel %vm3674_vm8, %v3665_v26, %v3681_v57  ;;  %v3684_v52 = vsel %vm3672_vm4, %v3662_v56, %v3665_v26 }
 0x4bc   :  { %4367 = vcosq.f32 %v1948_v44  ;;  %v3685_v54 = vsel %vm3675_vm6, %v3671_v12, 1326507024  ;;  %v3602_v4 = vsub.s32 0, %v7120_v50  ;;  %v3676_v51 = vsel %vm3672_vm4, %v3656_v31, %v3659_v36 }
 0x4bd   :  { %4369 = vsinq.f32 %v1948_v44  ;;  %v3683_v19 = vsel %vm3673_vm5, %v3680_v38, %v3682_v41  ;;  %v3678_v37 = vsel %vm3674_vm8, %v3662_v56, %v3677_v20  ;;  %v3686_v13 = vsel %vm3674_vm8, %v3668_v42, %v3685_v54  ;;  %v7155_v56 = vpop.permute.xlu1 %489 }
 0x4be   :  { %v7130_v53 = vmul.u32.u64.low %v3688_v25, %v3683_v19  ;;  %v7131_v55 = vmul.u32.u64.high %v3688_v25, %v3683_v19, %v7130_v53  ;;  %v1954_v45 = vand.u32 3, %v1953_v27  ;;  %v4098_v46 = vmin.u32 %v3602_v4, %v7120_v50 }
 0x4bf   :  { %v3687_v5 = vsel %vm3673_vm5, %v3684_v52, %v3686_v13  ;;  %v3622_v29 = vsub.s32 4, %v3598_v21  ;;  %v3679_v47 = vsel %vm3673_vm5, %v3676_v51, %v3678_v37  ;;  %v375_v36 = vmul.f32 %v7615_v39, %v4575_v14 }
 0x4c0   :  { %v7137_v17 = vmul.u32.u64.low %v3688_v25, %v3687_v5  ;;  %v7138_v11 = vmul.u32.u64.high %v3688_v25, %v3687_v5, %v7137_v17  ;;  %v3604_v8 = vclz %v4098_v46  ;;  %v3698_v0 = vadd.s32 1, %v7131_v55 }
 0x4c1   :  { %v442_v28 = vmul.f32 %v7616_v61, %v4581_v22  ;;  %vm1952_vm7 = vweird.f32 %v6826_v10  ;;  %vm1956_vm9 = vcmp.eq.s32.totalorder %v1954_v45, 0  ;;  %vm7150_vm11 = vcmp.le.f32.partialorder %v3536_v49, 0.7853982 }
 0x4c2   :  { %vm3538_vm10 = vcmp.lt.s32.totalorder %v6923_v48, 0  ;;  %v4099_v3 = vadd.s32 4294967294, %v3604_v8  ;;  %vm1959_vm12 = vcmp.eq.s32.totalorder %v1954_v45, 2  ;;  %v3695_v42 = vmul.u32 %v3688_v25, %v3679_v47 }
 0x4c3   :  { %vm3697_vm14 = vc.u32 %v7138_v11, %v7130_v53  ;;  %v458_v14 = vadd.f32 %v442_v28, %v375_v36  ;;  %v3592_v22 = vadd.s32 %v7065_v33, %v7078_v34  ;;  %v3623_v49 = vsel %vm3538_vm10, %v3622_v29, %v3598_v21 }
 0x4c4   :  { %vm4100_vm13 = vcmp.lt.s32.totalorder %v4099_v3, 0  ;;  %v3699_v26 = vsel %vm3697_vm14, %v3698_v0, %v7131_v55  ;;  %v443_v27 = vmul.f32 %v7616_v61, %v4583_v23  ;;  %v376_v33 = vmul.f32 %v7615_v39, %v4577_v15 }
 0x4c5   :  { %v3607_v18 = vsel %vm4100_vm13, 0, %v4099_v3  ;;  %v3700_v7 = vadd.s32 %v3699_v26, %v3695_v42  ;;  %v7167_v25 = vadd.f32 %v7155_v56, %v458_v14  ;;  %vm1955_vm15 = vcmp.lt.s32.totalorder %v1954_v45, 2 }
 0x4c6   :  { %v4368_v58 = vpop.eup %4367  ;;  %v3608_v2 = vsub.s32 32, %v3607_v18  ;;  %v3612_v31 = vsub.s32 4294967266, %v3607_v18  ;;  %v3609_v21 = vshll.u32 %v7120_v50, %v3607_v18  ;;  %v459_v4 = vadd.f32 %v443_v27, %v376_v33 }
 0x4c7   :  { %v4370_v40 = vpop.eup %4369  ;;  %v1960_v12 = vxor.u32 2147483648, %v4368_v58  ;;  %v3701_v38 = vadd.s32 536870912, %v3700_v7  ;;  %v1964_v57 = vand.u32 2147483647, %v7167_v25  ;;  %v1967_v41 = vand.u32 2139095040, %v7167_v25 }
 0x4c8   :  { %v1957_v34 = vxor.u32 2147483648, %v4370_v40  ;;  %v3610_v20 = vshrl.u32 %v3592_v22, %v3608_v2  ;;  %v3613_v23 = vadd.s32 127, %v3612_v31  ;;  %v3625_v13 = vsel %vm7150_vm11, 0, %v3623_v49 }
 0x4c9   :  { %v1961_v44 = vsel %vm1959_vm12, %v1960_v12, %v4370_v40  ;;  %v3702_v54 = vshrl.u32 %v3701_v38, 30  ;;  %v1968_v37 = vshrl.u32 %v1967_v41, 23  ;;  %v1971_v46 = vand.u32 8388607, %v1964_v57 }
 0x4ca   :  { %v1958_v52 = vsel %vm1956_vm9, %v4368_v58, %v1957_v34  ;;  %v3611_v19 = vor.u32 %v3610_v20, %v3609_v21  ;;  %v3614_v15 = vshll.u32 %v3613_v23, 23  ;;  %v7183_v17 = vadd.f32 %v7155_v56, %v459_v4 }
 0x4cb   :  { %v1962_v51 = vsel %vm1955_vm15, %v1958_v52, %v1961_v44  ;;  %v3703_v55 = vshll.u32 %v3702_v54, 30  ;;  %v3726_v45 = vsub.s32 4, %v3702_v54  ;;  %v4041_v8 = vadd.s32 4294967169, %v1968_v37 }
 0x4cc   :  { %v1963_v50 = vsel %vm1952_vm7, nan, %v1962_v51  ;;  %v3615_v5 = vor.u32 4788187, %v3614_v15  ;;  %v3618_v0 = vcvt.s32.f32 %v3611_v19  ;;  %v3629_v10 = vadd.s32 3, %v3625_v13 }
 0x4cd   :  { %2185 = vst [vmem:[#allocation2 + $0x68] sm:$0xff] %v1963_v50  ;;  %v7185_v29 = vsub.s32 %v3700_v7, %v3703_v55  ;;  %v1974_v36 = vadd.s32 1, %v4041_v8  ;;  %vm3642_vm0 = vcmp.lt.s32.totalorder %v6735_v43, 0  ;;  %v1972_v3 = vor.u32 8388608, %v1971_v46 }
 0x4ce   :  { %v3616_v47 = vand.u32 2147483647, %v3615_v5  ;;  %v7191_v14 = vsel %vm3642_vm0, %v3726_v45, %v3702_v54  ;;  %v2071_v22 = vand.u32 2139095040, %v7183_v17  ;;  %vm7196_vm2 = vcmp.le.f32.partialorder %v3640_v6, 0.7853982 }
 0x4cf   :  { %v3706_v28 = vsub.s32 0, %v7185_v29  ;;  %vm1975_vm1 = vcmp.gt.s32.totalorder %v1974_v36, 0  ;;  %v7201_v7 = vand.u32 3, %v3629_v10  ;;  %v7205_v27 = vmul.f32 %v4579_v16, %v7615_v39 }
 0x4d0   :  { %v3619_v42 = vmul.f32 %v3618_v0, %v3616_v47  ;;  %v1976_v58 = vsel %vm1975_vm1, %v1974_v36, 0  ;;  %v3696_v12 = vadd.s32 %v7130_v53, %v7138_v11  ;;  %v3729_v6 = vsel %vm7196_vm2, 0, %v7191_v14 }
 0x4d1   :  { %v4102_v26 = vmin.u32 %v3706_v28, %v7185_v29  ;;  %v1978_v40 = vand.u32 31, %v1976_v58  ;;  %v7212_v31 = vshll.u32 %v1972_v3, 8  ;;  %v1977_v34 = vshrl.u32 %v1976_v58, 5 }
 0x4d2   :  { %v3620_v18 = vxor.u32 2147483648, %v3619_v42  ;;  %v2072_v38 = vshrl.u32 %v2071_v22, 23  ;;  %vm3635_vm4 = vcmp.eq.s32.totalorder %v7201_v7, 2  ;;  %vm3631_vm8 = vcmp.lt.s32.totalorder %v7201_v7, 2 }
 0x4d3   :  { %v3708_v2 = vclz %v4102_v26  ;;  %v1979_v21 = vsub.s32 32, %v1978_v40  ;;  %v1981_v53 = vshll.u32 %v7551_v35, %v1978_v40  ;;  %v1984_v11 = vshll.u32 %v7543_v62, %v1978_v40 }
 0x4d4   :  { %v3621_v33 = vsel %vm3538_vm10, %v3620_v18, %v3619_v42  ;;  %v1987_v41 = vshll.u32 %v7544_v1, %v1978_v40  ;;  %v1990_v19 = vshll.u32 %v7545_v60, %v1978_v40  ;;  %v1993_v5 = vshll.u32 %v7546_v63, %v1978_v40 }
 0x4d5   :  { %v3624_v16 = vsel %vm7150_vm11, %v6923_v48, %v3621_v33  ;;  %v4103_v44 = vadd.s32 4294967294, %v3708_v2  ;;  %v1982_v20 = vshrl.u32 %v7543_v62, %v1979_v21  ;;  %v1985_v23 = vshrl.u32 %v7544_v1, %v1979_v21 }
 0x4d6   :  { %4371 = vcosq.f32 %v3624_v16  ;;  %v1988_v52 = vshrl.u32 %v7545_v60, %v1979_v21  ;;  %v1991_v54 = vshrl.u32 %v7546_v63, %v1979_v21  ;;  %v1980_v50 = vshrl.u32 %v7551_v35, %v1979_v21 }
 0x4d7   :  { %4373 = vsinq.f32 %v3624_v16  ;;  %vm4104_vm3 = vcmp.lt.s32.totalorder %v4103_v44, 0  ;;  %v1983_v4 = vor.u32 %v1982_v20, %v1981_v53  ;;  %v1986_v51 = vor.u32 %v1985_v23, %v1984_v11 }
 0x4d8   :  { %v3711_v9 = vsel %vm4104_vm3, 0, %v4103_v44  ;;  %v1989_v13 = vor.u32 %v1988_v52, %v1987_v41  ;;  %v1992_v46 = vor.u32 %v1991_v54, %v1990_v19  ;;  %v1994_v45 = vshrl.u32 %v7552_v59, %v1979_v21 }
 0x4d9   :  { %v3712_v15 = vsub.s32 32, %v3711_v9  ;;  %v3716_v37 = vsub.s32 4294967266, %v3711_v9  ;;  %v3713_v55 = vshll.u32 %v7185_v29, %v3711_v9  ;;  %vm1996_vm5 = vcmp.lt.s32.totalorder %v1977_v34, 1 }
 0x4da   :  { %vm1999_vm6 = vcmp.lt.s32.totalorder %v1977_v34, 4  ;;  %v1995_v0 = vor.u32 %v1994_v45, %v1993_v5  ;;  %vm1997_vm7 = vcmp.lt.s32.totalorder %v1977_v34, 2  ;;  %v2004_v36 = vsel %vm1996_vm5, %v1983_v4, %v1986_v51 }
 0x4db   :  { %v3714_v8 = vshrl.u32 %v3696_v12, %v3712_v15  ;;  %v3717_v47 = vadd.s32 127, %v3716_v37  ;;  %v2001_v10 = vsel %vm1999_vm6, %v1989_v13, 2102212464  ;;  %vm3628_vm9 = vweird.f32 %v6923_v48 }
 0x4dc   :  { %vm1998_vm11 = vcmp.lt.s32.totalorder %v1977_v34, 3  ;;  %v2005_v29 = vsel %vm1999_vm6, %v1992_v46, 920167782  ;;  %v2000_v42 = vsel %vm1996_vm5, %v1980_v50, %v1983_v4  ;;  %v2008_v26 = vsel %vm1996_vm5, %v1986_v51, %v1989_v13 }
 0x4dd   :  { %v3715_v28 = vor.u32 %v3714_v8, %v3713_v55  ;;  %v3718_v3 = vshll.u32 %v3717_v47, 23  ;;  %v2006_v22 = vsel %vm1998_vm11, %v1989_v13, %v2005_v29  ;;  %v2009_v58 = vsel %vm1999_vm6, %v1995_v0, 1326507024 }
 0x4de   :  { %v2002_v40 = vsel %vm1998_vm11, %v1986_v51, %v2001_v10  ;;  %v2007_v12 = vsel %vm1997_vm7, %v2004_v36, %v2006_v22  ;;  %v2010_v2 = vsel %vm1998_vm11, %v1992_v46, %v2009_v58  ;;  %v2068_v4 = vand.u32 2147483647, %v7183_v17 }
 0x4df   :  { %v3719_v18 = vor.u32 4788187, %v3718_v3  ;;  %v3722_v21 = vcvt.s32.f32 %v3715_v28  ;;  %v2011_v16 = vsel %vm1997_vm7, %v2008_v26, %v2010_v2  ;;  %v2003_v9 = vsel %vm1997_vm7, %v2000_v42, %v2002_v40 }
 0x4e0   :  { %v4372_v33 = vpop.eup %4371  ;;  %v7237_v44 = vmul.u32.u64.low %v7212_v31, %v2007_v12  ;;  %v7238_v53 = vmul.u32.u64.high %v7212_v31, %v2007_v12, %v7237_v44  ;;  %v7242_v41 = vmul.u32.u64.low %v7212_v31, %v2011_v16  ;;  %v7243_v52 = vmul.u32.u64.high %v7212_v31, %v2011_v16, %v7242_v41 }
 0x4e1   :  { %v4374_v11 = vpop.eup %4373  ;;  %v3636_v20 = vxor.u32 2147483648, %v4372_v33  ;;  %v3720_v23 = vand.u32 2147483647, %v3719_v18  ;;  %v4045_v51 = vadd.s32 4294967169, %v2072_v38  ;;  %vm3632_vm10 = vcmp.eq.s32.totalorder %v7201_v7, 0 }
 0x4e2   :  { %v3633_v54 = vxor.u32 2147483648, %v4374_v11  ;;  %v2254_v37 = vmul.f32 %v4585_v24, %v7616_v61  ;;  %v3733_v13 = vadd.s32 3, %v3729_v6  ;;  %v2022_v34 = vadd.s32 1, %v7238_v53 }
 0x4e3   :  { %v3637_v19 = vsel %vm3635_vm4, %v3636_v20, %v4374_v11  ;;  %v3723_v15 = vmul.f32 %v3722_v21, %v3720_v23  ;;  %v2078_v55 = vadd.s32 1, %v4045_v51  ;;  %v2019_v5 = vmul.u32 %v7212_v31, %v2003_v9 }
 0x4e4   :  { %v3634_v50 = vsel %vm3632_vm10, %v4372_v33, %v3633_v54  ;;  %vm2021_vm12 = vc.u32 %v7243_v52, %v7237_v44  ;;  %v2075_v14 = vand.u32 8388607, %v2068_v4  ;;  %v2221_v48 = vmul.f32 %v4598_v32, %v7615_v39 }
 0x4e5   :  { %v3638_v38 = vsel %vm3631_vm8, %v3634_v50, %v3637_v19  ;;  %v3724_v46 = vxor.u32 2147483648, %v3723_v15  ;;  %v2023_v45 = vsel %vm2021_vm12, %v2022_v34, %v7238_v53  ;;  %vm2079_vm14 = vcmp.gt.s32.totalorder %v2078_v55, 0 }
 0x4e6   :  { %v3639_v24 = vsel %vm3628_vm9, nan, %v3638_v38  ;;  %v2024_v7 = vadd.s32 %v2023_v45, %v2019_v5  ;;  %v2080_v8 = vsel %vm2079_vm14, %v2078_v55, 0  ;;  %v2270_v0 = vadd.f32 %v2254_v37, %v7205_v27 }
 0x4e7   :  { %v3725_v6 = vsel %vm3642_vm0, %v3724_v46, %v3723_v15  ;;  %3965 = vst [vmem:[#allocation2 + $0xe0] sm:$0xff] %v3639_v24  ;;  %v2082_v47 = vand.u32 31, %v2080_v8  ;;  %v7275_v10 = vand.u32 3, %v3733_v13  ;;  %v2255_v28 = vmul.f32 %v4595_v30, %v7616_v61 }
 0x4e8   :  { %v3728_v31 = vsel %vm7196_vm2, %v6735_v43, %v3725_v6  ;;  %v2025_v36 = vadd.s32 536870912, %v2024_v7  ;;  %v2076_v3 = vor.u32 8388608, %v2075_v14  ;;  %v7280_v42 = vadd.f32 %v2270_v0, %v7155_v56 }
 0x4e9   :  { %4375 = vcosq.f32 %v3728_v31  ;;  %v2083_v29 = vsub.s32 32, %v2082_v47  ;;  %v7284_v22 = vshrl.u32 %v2080_v8, 5  ;;  %v2085_v32 = vshll.u32 %v7551_v35, %v2082_v47 }
 0x4ea   :  { %4377 = vsinq.f32 %v3728_v31  ;;  %v7282_v49 = vshrl.u32 %v2025_v36, 30  ;;  %v2088_v39 = vshll.u32 %v7543_v62, %v2082_v47  ;;  %v2091_v30 = vshll.u32 %v7544_v1, %v2082_v47 }
 0x4eb   :  { %v2086_v27 = vshrl.u32 %v7543_v62, %v2083_v29  ;;  %v2089_v26 = vshrl.u32 %v7544_v1, %v2083_v29  ;;  %v2092_v61 = vshrl.u32 %v7545_v60, %v2083_v29  ;;  %v2094_v18 = vshll.u32 %v7545_v60, %v2082_v47 }
 0x4ec   :  { %v2027_v58 = vshll.u32 %v7282_v49, 30  ;;  %v2095_v40 = vshrl.u32 %v7546_v63, %v2083_v29  ;;  %v2098_v12 = vshrl.u32 %v7552_v59, %v2083_v29  ;;  %v2097_v33 = vshll.u32 %v7546_v63, %v2082_v47 }
 0x4ed   :  { %v2087_v2 = vor.u32 %v2086_v27, %v2085_v32  ;;  %v7297_v21 = vadd.f32 %v2255_v28, %v2221_v48  ;;  %vm3735_vm13 = vcmp.lt.s32.totalorder %v7275_v10, 2  ;;  %v2090_v53 = vor.u32 %v2089_v26, %v2088_v39 }
 0x4ee   :  { %v7300_v16 = vsub.s32 %v2024_v7, %v2027_v58  ;;  %v2093_v11 = vor.u32 %v2092_v61, %v2091_v30  ;;  %v2096_v20 = vor.u32 %v2095_v40, %v2094_v18  ;;  %vm3732_vm15 = vweird.f32 %v6735_v43 }
 0x4ef   :  { %vm3736_vm0 = vcmp.eq.s32.totalorder %v7275_v10, 0  ;;  %vm3739_vm1 = vcmp.eq.s32.totalorder %v7275_v10, 2  ;;  %v2099_v23 = vor.u32 %v2098_v12, %v2097_v33  ;;  %v7305_v41 = vshll.u32 %v2076_v3, 8 }
 0x4f0   :  { %v2030_v54 = vsub.s32 0, %v7300_v16  ;;  %vm2103_vm2 = vcmp.lt.s32.totalorder %v7284_v22, 4  ;;  %v3744_v9 = vand.u32 2147483647, %v7280_v42  ;;  %v3747_v51 = vand.u32 2139095040, %v7280_v42 }
 0x4f1   :  { %v2084_v19 = vshrl.u32 %v7551_v35, %v2083_v29  ;;  %vm2100_vm3 = vcmp.lt.s32.totalorder %v7284_v22, 1  ;;  %vm2102_vm4 = vcmp.lt.s32.totalorder %v7284_v22, 3  ;;  %v2109_v15 = vsel %vm2103_vm2, %v2096_v20, 920167782 }
 0x4f2   :  { %v4042_v50 = vmin.u32 %v2030_v54, %v7300_v16  ;;  %v2050_v13 = vsub.s32 4, %v7282_v49  ;;  %v2108_v34 = vsel %vm2100_vm3, %v2087_v2, %v2090_v53  ;;  %v2110_v55 = vsel %vm2102_vm4, %v2093_v11, %v2109_v15 }
 0x4f3   :  { %v4376_v37 = vpop.eup %4375  ;;  %v2105_v5 = vsel %vm2103_vm2, %v2093_v11, 2102212464  ;;  %v2112_v24 = vsel %vm2100_vm3, %v2090_v53, %v2093_v11  ;;  %v2113_v45 = vsel %vm2103_vm2, %v2099_v23, 1326507024  ;;  %vm2101_vm5 = vcmp.lt.s32.totalorder %v7284_v22, 2 }
 0x4f4   :  { %v4378_v38 = vpop.eup %4377  ;;  %v3740_v46 = vxor.u32 2147483648, %v4376_v37  ;;  %v2032_v6 = vclz %v4042_v50  ;;  %v2104_v7 = vsel %vm2100_vm3, %v2084_v19, %v2087_v2  ;;  %v2111_v31 = vsel %vm2101_vm5, %v2108_v34, %v2110_v55 }
 0x4f5   :  { %v3737_v14 = vxor.u32 2147483648, %v4378_v38  ;;  %v2114_v48 = vsel %vm2102_vm4, %v2096_v20, %v2113_v45  ;;  %v3748_v47 = vshrl.u32 %v3747_v51, 23  ;;  %v2106_v28 = vsel %vm2102_vm4, %v2090_v53, %v2105_v5 }
 0x4f6   :  { %v3741_v8 = vsel %vm3739_vm1, %v3740_v46, %v4378_v38  ;;  %v4043_v36 = vadd.s32 4294967294, %v2032_v6  ;;  %v2115_v3 = vsel %vm2101_vm5, %v2112_v24, %v2114_v48  ;;  %vm1966_vm8 = vcmp.lt.s32.totalorder %v7167_v25, 0 }
 0x4f7   :  { %v3738_v0 = vsel %vm3736_vm0, %v4376_v37, %v3737_v14  ;;  %v7346_v32 = vmul.u32.u64.low %v7305_v41, %v2115_v3  ;;  %v7347_v39 = vmul.u32.u64.high %v7305_v41, %v2115_v3, %v7346_v32  ;;  %v4105_v27 = vadd.s32 4294967169, %v3748_v47 }
 0x4f8   :  { %v3742_v29 = vsel %vm3735_vm13, %v3738_v0, %v3741_v8  ;;  %vm4044_vm6 = vcmp.lt.s32.totalorder %v4043_v36, 0  ;;  %v7352_v30 = vmul.u32.u64.low %v7305_v41, %v2111_v31  ;;  %v7353_v61 = vmul.u32.u64.high %v7305_v41, %v2111_v31, %v7352_v30 }
 0x4f9   :  { %v3743_v26 = vsel %vm3732_vm15, nan, %v3742_v29  ;;  %v2020_v10 = vadd.s32 %v7237_v44, %v7243_v52  ;;  %v2035_v58 = vsel %vm4044_vm6, 0, %v4043_v36  ;;  %v3754_v18 = vadd.s32 1, %v4105_v27 }
 0x4fa   :  { %3966 = vst [vmem:[#allocation2 + $0xe8] sm:$0xff] %v3743_v26  ;;  %v2036_v40 = vsub.s32 32, %v2035_v58  ;;  %v2040_v12 = vsub.s32 4294967266, %v2035_v58  ;;  %v2107_v43 = vsel %vm2101_vm5, %v2104_v7, %v2106_v28  ;;  %v3751_v2 = vand.u32 8388607, %v3744_v9 }
 0x4fb   :  { %v2037_v33 = vshll.u32 %v7300_v16, %v2035_v58  ;;  %v2051_v53 = vsel %vm1966_vm8, %v2050_v13, %v7282_v49  ;;  %vm2125_vm7 = vc.u32 %v7347_v39, %v7352_v30  ;;  %vm3755_vm9 = vcmp.gt.s32.totalorder %v3754_v18, 0 }
 0x4fc   :  { %v2038_v44 = vshrl.u32 %v2020_v10, %v2036_v40  ;;  %v2041_v52 = vadd.s32 127, %v2040_v12  ;;  %v2126_v11 = vadd.s32 1, %v7353_v61  ;;  %v3756_v20 = vsel %vm3755_vm9, %v3754_v18, 0 }
 0x4fd   :  { %vm7372_vm11 = vcmp.le.f32.partialorder %v1964_v57, 0.7853982  ;;  %v2123_v16 = vmul.u32 %v7305_v41, %v2107_v43  ;;  %v3758_v23 = vand.u32 31, %v3756_v20  ;;  %v7380_v19 = vadd.f32 %v7297_v21, %v7155_v56 }
 0x4fe   :  { %v2039_v54 = vor.u32 %v2038_v44, %v2037_v33  ;;  %v2042_v49 = vshll.u32 %v2041_v52, 23  ;;  %v2127_v51 = vsel %vm2125_vm7, %v2126_v11, %v7353_v61  ;;  %v2053_v15 = vsel %vm7372_vm11, 0, %v2051_v53 }
 0x4ff   :  { %v2128_v37 = vadd.s32 %v2127_v51, %v2123_v16  ;;  %v3752_v50 = vor.u32 8388608, %v3751_v2  ;;  %v3759_v57 = vsub.s32 32, %v3758_v23  ;;  %v3757_v34 = vshrl.u32 %v3756_v20, 5 }
 0x500   :  { %v2043_v13 = vor.u32 4788187, %v2042_v49  ;;  %v3761_v55 = vshll.u32 %v7551_v35, %v3758_v23  ;;  %v3764_v41 = vshll.u32 %v7543_v62, %v3758_v23  ;;  %v2046_v38 = vcvt.s32.f32 %v2039_v54 }
 0x501   :  { %v2129_v46 = vadd.s32 536870912, %v2128_v37  ;;  %v3762_v5 = vshrl.u32 %v7543_v62, %v3759_v57  ;;  %v3765_v24 = vshrl.u32 %v7544_v1, %v3759_v57  ;;  %v3768_v21 = vshrl.u32 %v7545_v60, %v3759_v57 }
 0x502   :  { %v2044_v56 = vand.u32 2147483647, %v2043_v13  ;;  %v3770_v45 = vshll.u32 %v7545_v60, %v3758_v23  ;;  %v3771_v14 = vshrl.u32 %v7546_v63, %v3759_v57  ;;  %v3767_v7 = vshll.u32 %v7544_v1, %v3758_v23 }
 0x503   :  { %v7391_v6 = vshrl.u32 %v2129_v46, 30  ;;  %v3773_v8 = vshll.u32 %v7546_v63, %v3758_v23  ;;  %v3774_v31 = vshrl.u32 %v7552_v59, %v3759_v57  ;;  %v3763_v47 = vor.u32 %v3762_v5, %v3761_v55 }
 0x504   :  { %v2047_v48 = vmul.f32 %v2046_v38, %v2044_v56  ;;  %v3766_v0 = vor.u32 %v3765_v24, %v3764_v41  ;;  %v3772_v36 = vor.u32 %v3771_v14, %v3770_v45  ;;  %v2057_v29 = vadd.s32 3, %v2053_v15 }
 0x505   :  { %v2131_v28 = vshll.u32 %v7391_v6, 30  ;;  %v3769_v32 = vor.u32 %v3768_v21, %v3767_v7  ;;  %v3775_v27 = vor.u32 %v3774_v31, %v3773_v8  ;;  %vm3776_vm10 = vcmp.lt.s32.totalorder %v3757_v34, 1 }
 0x506   :  { %v2048_v3 = vxor.u32 2147483648, %v2047_v48  ;;  %vm3779_vm12 = vcmp.lt.s32.totalorder %v3757_v34, 4  ;;  %v3792_v61 = vshll.u32 %v3752_v50, 8  ;;  %v3784_v58 = vsel %vm3776_vm10, %v3763_v47, %v3766_v0 }
 0x507   :  { %v7397_v26 = vsub.s32 %v2128_v37, %v2131_v28  ;;  %v3785_v18 = vsel %vm3779_vm12, %v3772_v36, 920167782  ;;  %v3851_v40 = vand.u32 2139095040, %v7380_v19  ;;  %vm3777_vm14 = vcmp.lt.s32.totalorder %v3757_v34, 2 }
 0x508   :  { %v2049_v10 = vsel %vm1966_vm8, %v2048_v3, %v2047_v48  ;;  %vm3778_vm13 = vcmp.lt.s32.totalorder %v3757_v34, 3  ;;  %v3781_v2 = vsel %vm3779_vm12, %v3769_v32, 2102212464  ;;  %v3789_v53 = vsel %vm3779_vm12, %v3775_v27, 1326507024 }
 0x509   :  { %v2052_v12 = vsel %vm7372_vm11, %v7167_v25, %v2049_v10  ;;  %v2134_v43 = vsub.s32 0, %v7397_v26  ;;  %v3786_v33 = vsel %vm3778_vm13, %v3769_v32, %v3785_v18  ;;  %v3788_v11 = vsel %vm3776_vm10, %v3766_v0, %v3769_v32 }
 0x50a   :  { %4379 = vcosq.f32 %v2052_v12  ;;  %v3787_v52 = vsel %vm3777_vm14, %v3784_v58, %v3786_v33  ;;  %v3760_v20 = vshrl.u32 %v7551_v35, %v3759_v57  ;;  %v3790_v16 = vsel %vm3778_vm13, %v3772_v36, %v3789_v53 }
 0x50b   :  { %4381 = vsinq.f32 %v2052_v12  ;;  %v4046_v44 = vmin.u32 %v2134_v43, %v7397_v26  ;;  %v7411_v22 = vmul.u32.u64.low %v3792_v61, %v3787_v52  ;;  %v7412_v23 = vmul.u32.u64.high %v3792_v61, %v3787_v52, %v7411_v22 }
 0x50c   :  { %v2058_v54 = vand.u32 3, %v2057_v29  ;;  %v3780_v51 = vsel %vm3776_vm10, %v3760_v20, %v3763_v47  ;;  %v3782_v15 = vsel %vm3778_vm13, %v3766_v0, %v3781_v2  ;;  %v3791_v37 = vsel %vm3777_vm14, %v3788_v11, %v3790_v16 }
 0x50d   :  { %v2136_v49 = vclz %v4046_v44  ;;  %v3852_v50 = vshrl.u32 %v3851_v40, 23  ;;  %v7417_v55 = vmul.u32.u64.low %v3792_v61, %v3791_v37  ;;  %v7418_v41 = vmul.u32.u64.high %v3792_v61, %v3791_v37, %v7417_v55 }
 0x50e   :  { %vm2070_vm15 = vcmp.lt.s32.totalorder %v7183_v17, 0  ;;  %vm2059_vm0 = vcmp.lt.s32.totalorder %v2058_v54, 2  ;;  %v3783_v38 = vsel %vm3777_vm14, %v3780_v51, %v3782_v15  ;;  %v3802_v46 = vadd.s32 1, %v7412_v23 }
 0x50f   :  { %v4047_v13 = vadd.s32 4294967294, %v2136_v49  ;;  %v4109_v57 = vadd.s32 4294967169, %v3852_v50  ;;  %vm2060_vm2 = vcmp.eq.s32.totalorder %v2058_v54, 0  ;;  %v3848_v24 = vand.u32 2147483647, %v7380_v19 }
 0x510   :  { %v2124_v21 = vadd.s32 %v7352_v30, %v7347_v39  ;;  %v2154_v7 = vsub.s32 4, %v7391_v6  ;;  %v3799_v48 = vmul.u32 %v3792_v61, %v3783_v38  ;;  %vm3801_vm3 = vc.u32 %v7418_v41, %v7411_v22 }
 0x511   :  { %vm4048_vm1 = vcmp.lt.s32.totalorder %v4047_v13, 0  ;;  %v3858_v56 = vadd.s32 1, %v4109_v57  ;;  %v3803_v28 = vsel %vm3801_vm3, %v3802_v46, %v7412_v23  ;;  %vm2063_vm5 = vcmp.eq.s32.totalorder %v2058_v54, 2 }
 0x512   :  { %v2139_v5 = vsel %vm4048_vm1, 0, %v4047_v13  ;;  %v3804_v39 = vadd.s32 %v3803_v28, %v3799_v48  ;;  %v2155_v10 = vsel %vm2070_vm15, %v2154_v7, %v7391_v6  ;;  %vm2056_vm6 = vweird.f32 %v7167_v25 }
 0x513   :  { %v2140_v45 = vsub.s32 32, %v2139_v5  ;;  %v2144_v14 = vsub.s32 4294967266, %v2139_v5  ;;  %v2141_v31 = vshll.u32 %v7397_v26, %v2139_v5  ;;  %vm3859_vm4 = vcmp.gt.s32.totalorder %v3858_v56, 0 }
 0x514   :  { %v4380_v8 = vpop.eup %4379  ;;  %v3860_v30 = vsel %vm3859_vm4, %v3858_v56, 0  ;;  %v3855_v26 = vand.u32 8388607, %v3848_v24  ;;  %v3805_v58 = vadd.s32 536870912, %v3804_v39  ;;  %vm7441_vm8 = vcmp.le.f32.partialorder %v2068_v4, 0.7853982 }
 0x515   :  { %v4382_v34 = vpop.eup %4381  ;;  %v2064_v47 = vxor.u32 2147483648, %v4380_v8  ;;  %v2142_v0 = vshrl.u32 %v2124_v21, %v2140_v45  ;;  %v2145_v36 = vadd.s32 127, %v2144_v14  ;;  %v3862_v18 = vand.u32 31, %v3860_v30 }
 0x516   :  { %v2061_v3 = vxor.u32 2147483648, %v4382_v34  ;;  %v7445_v33 = vshrl.u32 %v3805_v58, 30  ;;  %v2157_v6 = vsel %vm7441_vm8, 0, %v2155_v10  ;;  %v3856_v11 = vor.u32 8388608, %v3855_v26 }
 0x517   :  { %v2065_v29 = vsel %vm2063_vm5, %v2064_v47, %v4382_v34  ;;  %v2143_v32 = vor.u32 %v2142_v0, %v2141_v31  ;;  %v2146_v27 = vshll.u32 %v2145_v36, 23  ;;  %v3863_v53 = vsub.s32 32, %v3862_v18 }
 0x518   :  { %v2062_v61 = vsel %vm2060_vm2, %v4380_v8, %v2061_v3  ;;  %v3807_v25 = vshll.u32 %v7445_v33, 30  ;;  %v3865_v20 = vshll.u32 %v7551_v35, %v3862_v18  ;;  %v3861_v15 = vshrl.u32 %v3860_v30, 5 }
 0x519   :  { %v2066_v40 = vsel %vm2059_vm0, %v2062_v61, %v2065_v29  ;;  %v2147_v12 = vor.u32 4788187, %v2146_v27  ;;  %v2150_v52 = vcvt.s32.f32 %v2143_v32  ;;  %v3866_v16 = vshrl.u32 %v7543_v62, %v3863_v53 }
 0x51a   :  { %v2067_v43 = vsel %vm2056_vm6, nan, %v2066_v40  ;;  %v3869_v23 = vshrl.u32 %v7544_v1, %v3863_v53  ;;  %v3872_v54 = vshrl.u32 %v7545_v60, %v3863_v53  ;;  %v3875_v49 = vshrl.u32 %v7546_v63, %v3863_v53 }
 0x51b   :  { %v2148_v44 = vand.u32 2147483647, %v2147_v12  ;;  %2186 = vst [vmem:[#allocation2 + $0x70] sm:$0xff] %v2067_v43  ;;  %v3808_v51 = vsub.s32 %v3804_v39, %v3807_v25  ;;  %v3868_v37 = vshll.u32 %v7543_v62, %v3862_v18  ;;  %v3871_v50 = vshll.u32 %v7544_v1, %v3862_v18 }
 0x51c   :  { %v3867_v55 = vor.u32 %v3866_v16, %v3865_v20  ;;  %v3874_v57 = vshll.u32 %v7545_v60, %v3862_v18  ;;  %v3877_v38 = vshll.u32 %v7546_v63, %v3862_v18  ;;  %v3878_v21 = vshrl.u32 %v7552_v59, %v3863_v53 }
 0x51d   :  { %v2151_v4 = vmul.f32 %v2150_v52, %v2148_v44  ;;  %v3810_v46 = vsub.s32 0, %v3808_v51  ;;  %v3870_v5 = vor.u32 %v3869_v23, %v3868_v37  ;;  %v3873_v56 = vor.u32 %v3872_v54, %v3871_v50 }
 0x51e   :  { %v3876_v14 = vor.u32 %v3875_v49, %v3874_v57  ;;  %v2161_v1 = vadd.s32 3, %v2157_v6  ;;  %v3879_v8 = vor.u32 %v3878_v21, %v3877_v38  ;;  %vm3880_vm7 = vcmp.lt.s32.totalorder %v3861_v15, 1 }
 0x51f   :  { %v2152_v13 = vxor.u32 2147483648, %v2151_v4  ;;  %v4106_v7 = vmin.u32 %v3810_v46, %v3808_v51  ;;  %vm3883_vm9 = vcmp.lt.s32.totalorder %v3861_v15, 4  ;;  %v3896_v60 = vshll.u32 %v3856_v11, 8 }
 0x520   :  { %v3885_v31 = vsel %vm3883_vm9, %v3873_v56, 2102212464  ;;  %v3888_v48 = vsel %vm3880_vm7, %v3867_v55, %v3870_v5  ;;  %v3864_v59 = vshrl.u32 %v7551_v35, %v3863_v53  ;;  %vm3882_vm11 = vcmp.lt.s32.totalorder %v3861_v15, 3 }
 0x521   :  { %v2153_v45 = vsel %vm2070_vm15, %v2152_v13, %v2151_v4  ;;  %v3812_v63 = vclz %v4106_v7  ;;  %v3889_v34 = vsel %vm3883_vm9, %v3876_v14, 920167782  ;;  %v3892_v47 = vsel %vm3880_vm7, %v3870_v5, %v3873_v56 }
 0x522   :  { %v2156_v62 = vsel %vm7441_vm8, %v7183_v17, %v2153_v45  ;;  %vm3881_vm10 = vcmp.lt.s32.totalorder %v3861_v15, 2  ;;  %v3890_v36 = vsel %vm3882_vm11, %v3873_v56, %v3889_v34  ;;  %v3893_v28 = vsel %vm3883_vm9, %v3879_v8, 1326507024 }
 0x523   :  { %4383 = vcosq.f32 %v2156_v62  ;;  %v4107_v0 = vadd.s32 4294967294, %v3812_v63  ;;  %v3884_v3 = vsel %vm3880_vm7, %v3864_v59, %v3867_v55  ;;  %v3886_v39 = vsel %vm3882_vm11, %v3870_v5, %v3885_v31 }
 0x524   :  { %4385 = vsinq.f32 %v2156_v62  ;;  %v3891_v30 = vsel %vm3881_vm10, %v3888_v48, %v3890_v36  ;;  %v3894_v29 = vsel %vm3882_vm11, %v3876_v14, %v3893_v28  ;;  %v3800_v35 = vadd.s32 %v7411_v22, %v7418_v41 }
 0x525   :  { %vm4108_vm12 = vcmp.lt.s32.totalorder %v4107_v0, 0  ;;  %v3895_v32 = vsel %vm3881_vm10, %v3892_v47, %v3894_v29  ;;  %v7466_v27 = vmul.u32.u64.low %v3896_v60, %v3891_v30  ;;  %v7467_v26 = vmul.u32.u64.high %v3896_v60, %v3891_v30, %v7466_v27 }
 0x526   :  { %v3815_v61 = vsel %vm4108_vm12, 0, %v4107_v0  ;;  %v7469_v10 = vmul.u32.u64.low %v3896_v60, %v3895_v32  ;;  %v7470_v58 = vmul.u32.u64.high %v3896_v60, %v3895_v32, %v7469_v10  ;;  %v3887_v12 = vsel %vm3881_vm10, %v3884_v3, %v3886_v39 }
 0x527   :  { %v3816_v18 = vsub.s32 32, %v3815_v61  ;;  %v3820_v40 = vsub.s32 4294967266, %v3815_v61  ;;  %v2162_v43 = vand.u32 3, %v2161_v1  ;;  %v3817_v2 = vshll.u32 %v3808_v51, %v3815_v61 }
 0x528   :  { %v3906_v52 = vadd.s32 1, %v7467_v26  ;;  %v3903_v25 = vmul.u32 %v3896_v60, %v3887_v12  ;;  %vm3905_vm14 = vc.u32 %v7470_v58, %v7466_v27  ;;  %vm2160_vm1 = vweird.f32 %v7183_v17 }
 0x529   :  { %v3818_v53 = vshrl.u32 %v3800_v35, %v3816_v18  ;;  %v3821_v44 = vadd.s32 127, %v3820_v40  ;;  %vm2167_vm13 = vcmp.eq.s32.totalorder %v2162_v43, 2  ;;  %vm2164_vm15 = vcmp.eq.s32.totalorder %v2162_v43, 0 }
 0x52a   :  { %v3907_v23 = vsel %vm3905_vm14, %v3906_v52, %v7467_v26  ;;  %vm2163_vm0 = vcmp.lt.s32.totalorder %v2162_v43, 2  ;;  %v3830_v46 = vsub.s32 4, %v7445_v33  ;;  %vm3746_vm2 = vcmp.lt.s32.totalorder %v7280_v42, 0 }
 0x52b   :  { %v3819_v16 = vor.u32 %v3818_v53, %v3817_v2  ;;  %v3822_v4 = vshll.u32 %v3821_v44, 23  ;;  %v3908_v41 = vadd.s32 %v3907_v23, %v3903_v25  ;;  %vm3745_vm3 = vcmp.le.f32.partialorder %v3744_v9, 0.7853982 }
 0x52c   :  { %v3831_v17 = vsel %vm3746_vm2, %v3830_v46, %v7445_v33  ;;  %v3904_v59 = vadd.s32 %v7466_v27, %v7470_v58  ;;  %vm3836_vm7 = vweird.f32 %v7280_v42  ;;  %vm3850_vm9 = vcmp.lt.s32.totalorder %v7380_v19, 0 }
 0x52d   :  { %v4384_v6 = vpop.eup %4383  ;;  %v3823_v49 = vor.u32 4788187, %v3822_v4  ;;  %v3909_v15 = vadd.s32 536870912, %v3908_v41  ;;  %v3826_v13 = vcvt.s32.f32 %v3819_v16  ;;  %v3833_v1 = vsel %vm3745_vm3, 0, %v3831_v17 }
 0x52e   :  { %v4386_v11 = vpop.eup %4385  ;;  %v2168_v20 = vxor.u32 2147483648, %v4384_v6  ;;  %v3837_v60 = vadd.s32 3, %v3833_v1  ;;  %vm3849_vm11 = vcmp.le.f32.partialorder %v3848_v24, 0.7853982 }
 0x52f   :  { %v2165_v22 = vxor.u32 2147483648, %v4386_v11  ;;  %v3824_v50 = vand.u32 2147483647, %v3823_v49  ;;  %v3910_v57 = vshrl.u32 %v3909_v15, 30 }
 0x530   :  { %v2169_v54 = vsel %vm2167_vm13, %v2168_v20, %v4386_v11  ;;  %v3838_v31 = vand.u32 3, %v3837_v60  ;;  %vm3940_vm13 = vweird.f32 %v7380_v19 }
 0x531   :  { %v2166_v51 = vsel %vm2164_vm15, %v4384_v6, %v2165_v22  ;;  %v3827_v38 = vmul.f32 %v3826_v13, %v3824_v50  ;;  %v3911_v5 = vshll.u32 %v3910_v57, 30  ;;  %v3934_v40 = vsub.s32 4, %v3910_v57 }
 0x532   :  { %v2170_v37 = vsel %vm2163_vm0, %v2166_v51, %v2169_v54  ;;  %vm3843_vm5 = vcmp.eq.s32.totalorder %v3838_v31, 2  ;;  %vm3840_vm6 = vcmp.eq.s32.totalorder %v3838_v31, 0  ;;  %vm3839_vm8 = vcmp.lt.s32.totalorder %v3838_v31, 2 }
 0x533   :  { %v2171_v55 = vsel %vm2160_vm1, nan, %v2170_v37  ;;  %v3828_v56 = vxor.u32 2147483648, %v3827_v38  ;;  %v3912_v21 = vsub.s32 %v3908_v41, %v3911_v5  ;;  %v3935_v2 = vsel %vm3850_vm9, %v3934_v40, %v3910_v57 }
 0x534   :  { %2187 = vst [vmem:[#allocation2 + $0x78] sm:$0xff] %v2171_v55 }
 0x535   :  { %v3829_v45 = vsel %vm3746_vm2, %v3828_v56, %v3827_v38  ;;  %v3914_v62 = vsub.s32 0, %v3912_v21 }
 0x536   :  { %v3832_v14 = vsel %vm3745_vm3, %v7280_v42, %v3829_v45  ;;  %v3937_v42 = vsel %vm3849_vm11, 0, %v3935_v2 }
 0x537   :  { %4387 = vcosq.f32 %v3832_v14  ;;  %v4110_v7 = vmin.u32 %v3914_v62, %v3912_v21  ;;  %v3941_v44 = vadd.s32 3, %v3937_v42 }
 0x538   :  { %4389 = vsinq.f32 %v3832_v14 }
 0x539   :  { %v3916_v8 = vclz %v4110_v7  ;;  %v3942_v52 = vand.u32 3, %v3941_v44 }
 0x53b   :  { %v4111_v63 = vadd.s32 4294967294, %v3916_v8  ;;  %vm3947_vm10 = vcmp.eq.s32.totalorder %v3942_v52, 2  ;;  %vm3944_vm12 = vcmp.eq.s32.totalorder %v3942_v52, 0  ;;  %vm3943_vm14 = vcmp.lt.s32.totalorder %v3942_v52, 2 }
 0x53d   :  { %vm4112_vm4 = vcmp.lt.s32.totalorder %v4111_v63, 0 }
 0x53e   :  { %v3919_v48 = vsel %vm4112_vm4, 0, %v4111_v63 }
 0x53f   :  { %v3920_v34 = vsub.s32 32, %v3919_v48  ;;  %v3924_v9 = vsub.s32 4294967266, %v3919_v48  ;;  %v3921_v36 = vshll.u32 %v3912_v21, %v3919_v48 }
 0x541   :  { %v4388_v47 = vpop.eup %4387  ;;  %v3922_v28 = vshrl.u32 %v3904_v59, %v3920_v34  ;;  %v3925_v3 = vadd.s32 127, %v3924_v9 }
 0x542   :  { %v4390_v0 = vpop.eup %4389  ;;  %v3844_v33 = vxor.u32 2147483648, %v4388_v47 }
 0x543   :  { %v3841_v39 = vxor.u32 2147483648, %v4390_v0  ;;  %v3923_v29 = vor.u32 %v3922_v28, %v3921_v36  ;;  %v3926_v32 = vshll.u32 %v3925_v3, 23 }
 0x544   :  { %v3845_v30 = vsel %vm3843_vm5, %v3844_v33, %v4390_v0 }
 0x545   :  { %v3842_v26 = vsel %vm3840_vm6, %v4388_v47, %v3841_v39  ;;  %v3927_v27 = vor.u32 4788187, %v3926_v32  ;;  %v3930_v35 = vcvt.s32.f32 %v3923_v29 }
 0x546   :  { %v3846_v61 = vsel %vm3839_vm8, %v3842_v26, %v3845_v30 }
 0x547   :  { %v3847_v10 = vsel %vm3836_vm7, nan, %v3846_v61  ;;  %v3928_v58 = vand.u32 2147483647, %v3927_v27 }
 0x548   :  { %3967 = vst [vmem:[#allocation2 + $0xf0] sm:$0xff] %v3847_v10 }
 0x549   :  { %v3931_v18 = vmul.f32 %v3930_v35, %v3928_v58 }
 0x54b   :  { %v3932_v12 = vxor.u32 2147483648, %v3931_v18 }
 0x54d   :  { %v3933_v43 = vsel %vm3850_vm9, %v3932_v12, %v3931_v18 }
 0x54e   :  { %v3936_v53 = vsel %vm3849_vm11, %v7380_v19, %v3933_v43 }
 0x54f   :  { %4391 = vcosq.f32 %v3936_v53 }
 0x550   :  { %4393 = vsinq.f32 %v3936_v53 }
 0x559   :  { %v4392_v6 = vpop.eup %4391 }
 0x55a   :  { %v4394_v25 = vpop.eup %4393  ;;  %v3948_v11 = vxor.u32 2147483648, %v4392_v6 }
 0x55b   :  { %v3945_v20 = vxor.u32 2147483648, %v4394_v25 }
 0x55c   :  { %v3949_v16 = vsel %vm3947_vm10, %v3948_v11, %v4394_v25 }
 0x55d   :  { %v3946_v24 = vsel %vm3944_vm12, %v4392_v6, %v3945_v20 }
 0x55e   :  { %v3950_v4 = vsel %vm3943_vm14, %v3946_v24, %v3949_v16 }
 0x55f   :  { %v3951_v23 = vsel %vm3940_vm13, nan, %v3950_v4 }
 0x560   :  { %3968 = vst [vmem:[#allocation2 + $0xf8] sm:$0xff] %v3951_v23 }
 0x561   :  { %4406 = shalt.err (!%p4403_p4)
}
 0x562   :  { %s4407_s9 = scalar_lea.hbm %s7506_s2, 4096 }
 0x563   :  { %p4408_p5 = scmp.ne.s32.totalorder %s7506_s2, %s4407_s9  ;;  %p4411_p6 = scmp.lt.u32.totalorder %s4407_s9, %s7506_s2 }
 0x565   :  { %p4413_p7 = pnand %p4411_p6, %p4408_p5 }
 0x567   :  { %4416 = shalt.err (!%p4413_p7)
}
 0x568   :  { %s4438_s14 = smov 256  }
 0x569   :  { %3980 = dma.vmem_to_hbm [thread:$0]  %s3975_s5, 4096, %s7506_s2, [#allocation3], %s4438_s14, %s4438_s14, %s4423_s0  }
 0x56a   :  { %4417 = dma.done.wait [#allocation3], 4096  }
 0x56b   :  { %4418 = vsyncadd [#allocation3], 4294963200 }
 0x56c   :  { %3984 = vsyncpa [#allocation3], 1 }

</bundles_post_ra>
